<compile_context>
chip_gen: v7x
topology: tpu7x:2x2x1
jax: 0.10.0
libtpu: 0.0.40
codegen_flags: <defaults>
</compile_context>

<pallas_src>
import functools

import jax
import jax.numpy as jnp
import numpy as np
from jax.experimental import pallas as pl

LANE = 128          # padded hidden width (H=32 -> 128 lanes); one gate per tile
GN = 3 * LANE       # 384 lanes = 3 gates (r, z, n), each in its own 128-lane tile


# --------------------------------------------------------------------------
# Fused Pallas kernel
# --------------------------------------------------------------------------

def _fused_kernel(T_max, T_obs, T_cmd, rows, D2,
                  x_ref, w_ref, b_ref, out_ref):
    """x_ref: (T_max*rows + 8, >=max(D2,128)) f32  per-call data slab
       w_ref: (D2 + 256, 384) mxu-dtype            cached recurrence weights
       b_ref: (384 + 2*rows + 8, 384) f32          cached state/head weights + biases
       out_ref: (rows + 8, 128) f32                single lane-dense output block
    """
    f32 = jnp.float32
    mxu_dt = w_ref.dtype
    n_x = T_max * rows

    # static layout of the cached f32 slab
    o_wihs, o_whhs, o_whead = 0, LANE, 2 * LANE
    o_bgi = 3 * LANE
    o_bgh = o_bgi + rows
    o_sc = o_bgh + rows          # scalar rows: b_gis, b_ghs, head biases

    # per-row GRU biases (row 0 = obs GRU, rows 1.. = cmd GRU)
    b_gi = b_ref[o_bgi:o_bgi + rows, :]
    b_gh = b_ref[o_bgh:o_bgh + rows, :]

    # ---- hoisted input projection: fc_dim_reduction fused with w_ih -------
    # x rows carry obs data in lanes [0,D) and cmd data in lanes [D,2D); the
    # K-stacked W_comb routes each row through its own GRU's input weights.
    gi_all = jnp.dot(x_ref[0:n_x, 0:D2].astype(mxu_dt), w_ref[0:D2, :],
                     preferred_element_type=f32)            # (T_max*rows, 384)

    # ---- merged obs+cmd GRU recurrence (fully unrolled) --------------------
    row_ids = jax.lax.broadcasted_iota(jnp.int32, (rows, 1), 0)
    m_obs = (row_ids == 0).astype(f32)                      # row 0 = observation
    m_cmd = 1.0 - m_obs
    # Padded lanes (>= H) of h stay exactly 0 because the packed weight
    # columns AND bias lanes there are exactly 0 (tanh(0)=0 => n=0 => h_new=0).
    h = jnp.zeros((rows, LANE), f32)
    for t in range(T_max):                                  # static unroll, T_max <= 8
        gi = gi_all[t * rows:(t + 1) * rows, :] + b_gi
        h_aug = jnp.concatenate([h * m_obs, h * m_cmd], axis=1).astype(mxu_dt)
        gh = jnp.dot(h_aug, w_ref[D2:D2 + 2 * LANE, :],
                     preferred_element_type=f32) + b_gh
        # PyTorch gate order: r, z, n (each gate occupies one 128-lane tile)
        r = jax.nn.sigmoid(gi[:, 0:LANE] + gh[:, 0:LANE])
        z = jax.nn.sigmoid(gi[:, LANE:2 * LANE] + gh[:, LANE:2 * LANE])
        n = jnp.tanh(gi[:, 2 * LANE:] + r * gh[:, 2 * LANE:])
        h_new = (1.0 - z) * n + z * h
        obs_ok, cmd_ok = t < T_obs, t < T_cmd               # Python-static per step
        if obs_ok and cmd_ok:
            h = h_new
        elif obs_ok:
            h = h_new * m_obs + h * m_cmd                   # freeze cmd rows past T_cmd
        else:
            h = h * m_obs + h_new * m_cmd                   # freeze obs row past T_obs

    # ---- state GRU: one step, batch 1, f32 ---------------------------------
    obs_h = h[0:1, :]                                       # obs-encoder hidden
    sh = x_ref[n_x:n_x + 1, 0:LANE]                         # previous state_hidden
    gi_s = jnp.dot(obs_h, b_ref[o_wihs:o_wihs + LANE, :],
                   preferred_element_type=f32) + b_ref[o_sc:o_sc + 1, :]
    gh_s = jnp.dot(sh, b_ref[o_whhs:o_whhs + LANE, :],
                   preferred_element_type=f32) + b_ref[o_sc + 1:o_sc + 2, :]
    r_s = jax.nn.sigmoid(gi_s[:, 0:LANE] + gh_s[:, 0:LANE])
    z_s = jax.nn.sigmoid(gi_s[:, LANE:2 * LANE] + gh_s[:, LANE:2 * LANE])
    n_s = jnp.tanh(gi_s[:, 2 * LANE:] + r_s * gh_s[:, 2 * LANE:])
    st = (1.0 - z_s) * n_s + z_s * sh                       # (1, 128) new state

    # ---- fused head: ONE matmul gives value / s_state / per-cmd scores -----
    big = jnp.concatenate([h, st, jnp.zeros((7, LANE), f32)], axis=0)  # (rows+8,128)
    head = jnp.dot(big, b_ref[o_whead:o_whead + LANE, 0:LANE],
                   preferred_element_type=f32)                          # (rows+8,128)
    b_head = b_ref[o_sc + 2:o_sc + 3, 0:LANE]      # lane0 = critic_b, lane1 = att_b
    val_row = head[rows:rows + 1, :] + b_head      # lane0 = value, lane1 = s_state+att_b
    s_state_b = val_row[:, 1:2]                    # (1,1) scalar-like
    # scores (softmax/probs dropped: caller samples categorical from logits)
    scores = jnp.maximum(head[0:rows, :] + s_state_b, 0.0)  # lane 2 = relu score/row

    # single lane-dense output block (one DMA):
    #   rows [0, rows):  lane 2 = score of h-row r (row 0 = obs, rows 1..C = cmds)
    #   row  rows:       lane 0 = critic value
    #   row  rows+1:     new state_hidden (lanes [0, H))
    out_ref[...] = jnp.concatenate(
        [scores, val_row, st, jnp.zeros((6, LANE), f32)], axis=0)


# --------------------------------------------------------------------------
# Weight packing (done ONCE per params, cached outside the per-step jit)
# --------------------------------------------------------------------------

def _gate_pad_w(w, H, in_pad):
    """torch GRU weight (3H, in_dim) -> (in_pad, 384); gate g in lanes [128g,128g+H)."""
    in_dim = w.shape[1]
    w3 = jnp.transpose(w.reshape(3, H, in_dim), (0, 2, 1))            # (3, in, H)
    w3 = jnp.pad(w3, ((0, 0), (0, in_pad - in_dim), (0, LANE - H)))   # (3, in_pad, 128)
    return jnp.concatenate([w3[0], w3[1], w3[2]], axis=1)             # (in_pad, 384)


def _gate_pad_b(b, H):
    # Padded gate lanes MUST stay exactly zero (keeps padded h lanes at 0).
    return jnp.pad(b.reshape(3, H), ((0, 0), (0, LANE - H))).reshape(1, GN)


def pack_params(params, nb_cmds, mxu_dtype=jnp.bfloat16):
    """Returns (w_slab, b_slab): w_slab holds the recurrence weights in mxu_dtype,
    b_slab holds state-GRU / head weights and all biases in f32."""
    hp = jax.lax.Precision.HIGHEST
    H = params["critic_w"].shape[1]
    R, D = params["fc_w"].shape
    rows = ((1 + nb_cmds + 7) // 8) * 8
    og, cg, sg = params["obs_gru"], params["cmd_gru"], params["state_gru"]
    fc_wT = params["fc_w"].T                                           # (D, R)
    fc_b = params["fc_b"].reshape(1, R)

    # fc_dim_reduction fused into the GRU input projections (K-stacked obs/cmd)
    wih_o = _gate_pad_w(og["w_ih"], H, R)                              # (R, 384)
    wih_c = _gate_pad_w(cg["w_ih"], H, R)
    w_comb = jnp.concatenate([jnp.dot(fc_wT, wih_o, precision=hp),
                              jnp.dot(fc_wT, wih_c, precision=hp)], axis=0)  # (2D, 384)
    whh = jnp.concatenate([_gate_pad_w(og["w_hh"], H, LANE),
                           _gate_pad_w(cg["w_hh"], H, LANE)], axis=0)        # (256, 384)
    w_slab = jnp.concatenate([w_comb, whh], axis=0).astype(mxu_dtype)

    b_gi = jnp.concatenate(
        [jnp.dot(fc_b, wih_o, precision=hp) + _gate_pad_b(og["b_ih"], H),
         jnp.tile(jnp.dot(fc_b, wih_c, precision=hp) + _gate_pad_b(cg["b_ih"], H),
                  (rows - 1, 1))], axis=0)                             # (rows, 384)
    b_gh = jnp.concatenate(
        [_gate_pad_b(og["b_hh"], H),
         jnp.tile(_gate_pad_b(cg["b_hh"], H), (rows - 1, 1))], axis=0)

    wihs = _gate_pad_w(sg["w_ih"], H, LANE)                            # (128, 384)
    whhs = _gate_pad_w(sg["w_hh"], H, LANE)

    # fused head: col0 = critic_w, col1 = att_w[:, :H] (state), col2 = att_w[:, H:] (cmd)
    whead = jnp.zeros((LANE, LANE), jnp.float32)
    whead = whead.at[:H, 0].set(params["critic_w"][0])
    whead = whead.at[:H, 1].set(params["att_w"][0, :H])
    whead = whead.at[:H, 2].set(params["att_w"][0, H:])
    whead = jnp.pad(whead, ((0, 0), (0, GN - LANE)))                   # (128, 384)

    b_head = jnp.zeros((1, GN), jnp.float32)
    b_head = b_head.at[0, 0].set(params["critic_b"][0])
    b_head = b_head.at[0, 1].set(params["att_b"][0])

    b_slab = jnp.concatenate(
        [wihs, whhs, whead, b_gi, b_gh,
         _gate_pad_b(sg["b_ih"], H), _gate_pad_b(sg["b_hh"], H), b_head,
         jnp.zeros((5, GN), jnp.float32)], axis=0)                     # (384+2*rows+8, 384)
    return w_slab, b_slab


# --------------------------------------------------------------------------
# Parameters (deterministic, PyTorch-style uniform init)
# --------------------------------------------------------------------------

def init_params(key, bert_dim, reduced_dim, hidden_size):
    H = hidden_size
    keys = jax.random.split(key, 18)

    def unif(k, shape, fan_in):
        bound = 1.0 / float(np.sqrt(fan_in))
        return jax.random.uniform(k, shape, jnp.float32, -bound, bound)

    def gru_params(ks, din):
        return dict(
            w_ih=unif(ks[0], (3 * H, din), H),
            w_hh=unif(ks[1], (3 * H, H), H),
            b_ih=unif(ks[2], (3 * H,), H),
            b_hh=unif(ks[3], (3 * H,), H),
        )

    return dict(
        fc_w=unif(keys[0], (reduced_dim, bert_dim), bert_dim),
        fc_b=unif(keys[1], (reduced_dim,), bert_dim),
        obs_gru=gru_params(keys[2:6], reduced_dim),
        cmd_gru=gru_params(keys[6:10], reduced_dim),
        state_gru=gru_params(keys[10:14], H),
        critic_w=unif(keys[14], (1, H), H),
        critic_b=unif(keys[15], (1,), H),
        att_w=unif(keys[16], (1, 2 * H), 2 * H),
        att_b=unif(keys[17], (1,), 2 * H),
    )


# --------------------------------------------------------------------------
# Forward pass: per-call data assembly in JAX, all compute in the fused kernel
# --------------------------------------------------------------------------

@jax.jit
def forward(w_slab, b_slab, obs_embedded, cmds_embedded, state_hidden, sample_key):
    """obs_embedded: (T_obs, 1, D_bert); cmds_embedded: (T_cmd, C, D_bert);
    state_hidden: (1, 1, H).  Returns (scores, index, value, new_state_hidden)."""
    T_o, Bo, D = obs_embedded.shape
    assert Bo == 1, "module is defined for batch_size == 1"
    T_c, C, _ = cmds_embedded.shape
    H = state_hidden.shape[-1]
    T_max = max(T_o, T_c)
    rows = ((1 + C + 7) // 8) * 8            # obs row + C cmd rows, padded to sublanes
    D2 = 2 * D
    SW = max(D2, LANE)
    assert w_slab.shape == (D2 + 2 * LANE, GN)
    assert b_slab.shape == (3 * LANE + 2 * rows + 8, GN)

    # per-call x slab: row 0 of each timestep = obs (lanes [0,D)),
    # rows 1..C = commands (lanes [D,2D)); last block carries state_hidden.
    x3 = jnp.zeros((T_max, rows, SW), jnp.float32)
    x3 = x3.at[:T_o, 0:1, 0:D].set(obs_embedded)
    x3 = x3.at[:T_c, 1:1 + C, D:D2].set(cmds_embedded)
    tail = jnp.zeros((8, SW), jnp.float32).at[0, :H].set(state_hidden.reshape(H))
    x_slab = jnp.concatenate([x3.reshape(T_max * rows, SW), tail], axis=0)

    kernel = functools.partial(_fused_kernel, T_max, T_o, T_c, rows, D2)
    out = pl.pallas_call(
        kernel,
        out_shape=jax.ShapeDtypeStruct((rows + 8, LANE), jnp.float32),
    )(x_slab, w_slab, b_slab)

    scores = out[1:1 + C, 2].reshape(1, 1, C)                # matches torch (1,1,C)
    value = out[rows, 0].reshape(1, 1, 1)
    new_state_hidden = out[rows + 1, :H].reshape(1, 1, H)
    # TODO(synk): torch.multinomial sampling is stochastic glue; sampled in plain JAX.
    # categorical(logits=relu_scores) is exactly multinomial(softmax(relu_scores)).
    index = jax.random.categorical(sample_key, scores, axis=-1).reshape(1, 1, 1)
    return scores, index, value, new_state_hidden


# --------------------------------------------------------------------------
# Pure-JAX reference (for correctness check)
# --------------------------------------------------------------------------

def _ref_gru(x, h0, w_ih, w_hh, b_ih, b_hh):
    H = h0.shape[-1]
    h = h0
    hp = jax.lax.Precision.HIGHEST
    for t in range(x.shape[0]):
        gi = jnp.dot(x[t], w_ih.T, precision=hp) + b_ih
        gh = jnp.dot(h, w_hh.T, precision=hp) + b_hh
        r = jax.nn.sigmoid(gi[:, :H] + gh[:, :H])
        z = jax.nn.sigmoid(gi[:, H:2 * H] + gh[:, H:2 * H])
        n = jnp.tanh(gi[:, 2 * H:] + r * gh[:, 2 * H:])
        h = (1 - z) * n + z * h
    return h


def _ref_forward(params, obs_embedded, cmds_embedded, state_hidden):
    hp = jax.lax.Precision.HIGHEST
    H = params["critic_w"].shape[1]
    T_o, Bo, _ = obs_embedded.shape
    T_c, C, _ = cmds_embedded.shape
    obs_red = jnp.dot(obs_embedded, params["fc_w"].T, precision=hp) + params["fc_b"]
    cmd_red = jnp.dot(cmds_embedded, params["fc_w"].T, precision=hp) + params["fc_b"]
    g = params["obs_gru"]
    obs_h = _ref_gru(obs_red, jnp.zeros((Bo, H)), g["w_ih"], g["w_hh"], g["b_ih"], g["b_hh"])
    g = params["cmd_gru"]
    cmds_h = _ref_gru(cmd_red, jnp.zeros((C, H)), g["w_ih"], g["w_hh"], g["b_ih"], g["b_hh"])
    g = params["state_gru"]
    st = _ref_gru(obs_h[None], state_hidden.reshape(Bo, H),
                  g["w_ih"], g["w_hh"], g["b_ih"], g["b_hh"])
    value = jnp.dot(st, params["critic_w"].T, precision=hp) + params["critic_b"]
    cat = jnp.concatenate([jnp.broadcast_to(st, (C, H)), cmds_h], axis=-1)
    scores = jax.nn.relu(jnp.dot(cat, params["att_w"].T, precision=hp) + params["att_b"])
    return scores.reshape(1, 1, C), value.reshape(1, 1, 1), st.reshape(1, 1, H)


# --------------------------------------------------------------------------

if __name__ == "__main__":
    # Small synthetic shapes consistent with the forward pass:
    #   BERT hidden (stand-in) D_bert = 64, reduced_dim R = 32, hidden H = 32
    #   obs: 8 tokens (batch 1); commands: 5 commands, 6 tokens each
    D_BERT, R, H = 64, 32, 32
    T_OBS, T_CMD, NB_CMDS = 8, 6, 5

    root = jax.random.PRNGKey(0)
    k_param, k_obs, k_cmd, k_sample = jax.random.split(root, 4)

    params = init_params(k_param, D_BERT, R, H)
    obs_embedded = jax.random.normal(k_obs, (T_OBS, 1, D_BERT), jnp.float32)
    cmds_embedded = jax.random.normal(k_cmd, (T_CMD, NB_CMDS, D_BERT), jnp.float32)
    state_hidden = jnp.zeros((1, 1, H), jnp.float32)   # module's initial self.state_hidden

    ref_scores, ref_value, ref_state = _ref_forward(
        params, obs_embedded, cmds_embedded, state_hidden)

    # ---- perf configuration: bf16 MXU operands on the recurrent critical path
    w_bf16, b_f32 = pack_params(params, NB_CMDS, mxu_dtype=jnp.bfloat16)
    scores, index, value, new_state_hidden = forward(
        w_bf16, b_f32, obs_embedded, cmds_embedded, state_hidden, k_sample)
    jax.block_until_ready((scores, index, value, new_state_hidden))
    np.testing.assert_allclose(np.asarray(scores), np.asarray(ref_scores),
                               rtol=2e-2, atol=2e-2)
    np.testing.assert_allclose(np.asarray(value), np.asarray(ref_value),
                               rtol=2e-2, atol=2e-2)
    np.testing.assert_allclose(np.asarray(new_state_hidden), np.asarray(ref_state),
                               rtol=2e-2, atol=2e-2)

    # ---- full-f32 MXU path must reproduce the reference tightly (structure check)
    w_f32, b_f32b = pack_params(params, NB_CMDS, mxu_dtype=jnp.float32)
    s32, i32, v32, st32 = forward(
        w_f32, b_f32b, obs_embedded, cmds_embedded, state_hidden, k_sample)
    jax.block_until_ready((s32, v32, st32))
    np.testing.assert_allclose(np.asarray(s32), np.asarray(ref_scores),
                               rtol=2e-3, atol=2e-3)
    np.testing.assert_allclose(np.asarray(v32), np.asarray(ref_value),
                               rtol=2e-3, atol=2e-3)
    np.testing.assert_allclose(np.asarray(st32), np.asarray(ref_state),
                               rtol=2e-3, atol=2e-3)

    assert scores.shape == (1, 1, NB_CMDS)
    assert value.shape == (1, 1, 1)
    assert index.shape == (1, 1, 1)
    assert new_state_hidden.shape == (1, 1, H)

    print("KERNEL_OK")
</pallas_src>

<mosaic_0001>
module attributes {stable_mosaic.version = 11 : i64} {
  func.func @_fused_kernel(%arg0: memref<72x128xf32, #tpu.memory_space<vmem>>, %arg1: memref<384x384xbf16, #tpu.memory_space<vmem>>, %arg2: memref<408x384xf32, #tpu.memory_space<vmem>>, %arg3: memref<16x128xf32, #tpu.memory_space<vmem>>) attributes {dimension_semantics = [], scalar_prefetch = 0 : i64, scratch_operands = 0 : i64, tpu.core_type = #tpu.core_type<tc>} {
    %c384 = arith.constant 384 : index
    %c0 = arith.constant 0 : index
    %0 = vector.load %arg2[%c384, %c0] : memref<408x384xf32, #tpu.memory_space<vmem>>, vector<8x384xf32>
    %c392 = arith.constant 392 : index
    %c0_0 = arith.constant 0 : index
    %1 = vector.load %arg2[%c392, %c0_0] : memref<408x384xf32, #tpu.memory_space<vmem>>, vector<8x384xf32>
    %c0_1 = arith.constant 0 : index
    %c0_2 = arith.constant 0 : index
    %2 = vector.load %arg0[%c0_1, %c0_2] : memref<72x128xf32, #tpu.memory_space<vmem>>, vector<64x128xf32>
    %3 = arith.truncf %2 : vector<64x128xf32> to vector<64x128xbf16>
    %c0_3 = arith.constant 0 : index
    %c0_4 = arith.constant 0 : index
    %4 = vector.load %arg1[%c0_3, %c0_4] : memref<384x384xbf16, #tpu.memory_space<vmem>>, vector<128x384xbf16>
    %cst = arith.constant dense<0.000000e+00> : vector<64x384xf32>
    %5 = tpu.matmul %3, %4, %cst {dimension_numbers = #tpu.dot_dimension_numbers<[1], [0], [0], [1], [0, 0, 1, 1], [], []>} : vector<64x128xbf16>, vector<128x384xbf16>, vector<64x384xf32> -> vector<64x384xf32>
    %6 = tpu.iota {dimensions = array<i32: 0>} : vector<8x1xi32>
    %c0_i32 = arith.constant 0 : i32
    %7 = vector.broadcast %c0_i32 : i32 to vector<8x1xi32>
    %8 = arith.cmpi eq, %6, %7 : vector<8x1xi32>
    %9 = arith.extui %8 : vector<8x1xi1> to vector<8x1xi32>
    %10 = arith.sitofp %9 : vector<8x1xi32> to vector<8x1xf32>
    %cst_5 = arith.constant 1.000000e+00 : f32
    %11 = vector.broadcast %cst_5 : f32 to vector<8x1xf32>
    %12 = arith.subf %11, %10 : vector<8x1xf32>
    %cst_6 = arith.constant 0.000000e+00 : f32
    %13 = vector.broadcast %cst_6 : f32 to vector<8x128xf32>
    %14 = vector.extract_strided_slice %5 {offsets = [0, 0], sizes = [8, 384], strides = [1, 1]} : vector<64x384xf32> to vector<8x384xf32>
    %15 = arith.addf %14, %0 : vector<8x384xf32>
    %16 = vector.broadcast %10 : vector<8x1xf32> to vector<8x128xf32>
    %17 = arith.mulf %13, %16 : vector<8x128xf32>
    %18 = vector.broadcast %12 : vector<8x1xf32> to vector<8x128xf32>
    %19 = arith.mulf %13, %18 : vector<8x128xf32>
    %20 = tpu.concatenate %17, %19 in 1 : vector<8x128xf32>, vector<8x128xf32> -> vector<8x256xf32>
    %21 = arith.truncf %20 : vector<8x256xf32> to vector<8x256xbf16>
    %c128 = arith.constant 128 : index
    %c0_7 = arith.constant 0 : index
    %22 = vector.load %arg1[%c128, %c0_7] : memref<384x384xbf16, #tpu.memory_space<vmem>>, vector<256x384xbf16>
    %cst_8 = arith.constant dense<0.000000e+00> : vector<8x384xf32>
    %23 = tpu.matmul %21, %22, %cst_8 {dimension_numbers = #tpu.dot_dimension_numbers<[1], [0], [0], [1], [0, 0, 1, 1], [], []>} : vector<8x256xbf16>, vector<256x384xbf16>, vector<8x384xf32> -> vector<8x384xf32>
    %24 = arith.addf %23, %1 : vector<8x384xf32>
    %25 = vector.extract_strided_slice %15 {offsets = [0, 0], sizes = [8, 128], strides = [1, 1]} : vector<8x384xf32> to vector<8x128xf32>
    %26 = vector.extract_strided_slice %24 {offsets = [0, 0], sizes = [8, 128], strides = [1, 1]} : vector<8x384xf32> to vector<8x128xf32>
    %27 = arith.addf %25, %26 : vector<8x128xf32>
    %28 = arith.negf %27 : vector<8x128xf32>
    %29 = math.exp %28 : vector<8x128xf32>
    %cst_9 = arith.constant 1.000000e+00 : f32
    %30 = vector.broadcast %cst_9 : f32 to vector<8x128xf32>
    %31 = arith.addf %30, %29 : vector<8x128xf32>
    %32 = arith.divf %30, %31 : vector<8x128xf32>
    %33 = vector.extract_strided_slice %15 {offsets = [0, 128], sizes = [8, 128], strides = [1, 1]} : vector<8x384xf32> to vector<8x128xf32>
    %34 = vector.extract_strided_slice %24 {offsets = [0, 128], sizes = [8, 128], strides = [1, 1]} : vector<8x384xf32> to vector<8x128xf32>
    %35 = arith.addf %33, %34 : vector<8x128xf32>
    %36 = arith.negf %35 : vector<8x128xf32>
    %37 = math.exp %36 : vector<8x128xf32>
    %cst_10 = arith.constant 1.000000e+00 : f32
    %38 = vector.broadcast %cst_10 : f32 to vector<8x128xf32>
    %39 = arith.addf %38, %37 : vector<8x128xf32>
    %40 = arith.divf %38, %39 : vector<8x128xf32>
    %41 = vector.extract_strided_slice %15 {offsets = [0, 256], sizes = [8, 128], strides = [1, 1]} : vector<8x384xf32> to vector<8x128xf32>
    %42 = vector.extract_strided_slice %24 {offsets = [0, 256], sizes = [8, 128], strides = [1, 1]} : vector<8x384xf32> to vector<8x128xf32>
    %43 = arith.mulf %32, %42 : vector<8x128xf32>
    %44 = arith.addf %41, %43 : vector<8x128xf32>
    %45 = math.tanh %44 : vector<8x128xf32>
    %cst_11 = arith.constant 1.000000e+00 : f32
    %46 = vector.broadcast %cst_11 : f32 to vector<8x128xf32>
    %47 = arith.subf %46, %40 : vector<8x128xf32>
    %48 = arith.mulf %47, %45 : vector<8x128xf32>
    %49 = arith.mulf %40, %13 : vector<8x128xf32>
    %50 = arith.addf %48, %49 : vector<8x128xf32>
    %51 = vector.extract_strided_slice %5 {offsets = [8, 0], sizes = [8, 384], strides = [1, 1]} : vector<64x384xf32> to vector<8x384xf32>
    %52 = arith.addf %51, %0 : vector<8x384xf32>
    %53 = vector.broadcast %10 : vector<8x1xf32> to vector<8x128xf32>
    %54 = arith.mulf %50, %53 : vector<8x128xf32>
    %55 = vector.broadcast %12 : vector<8x1xf32> to vector<8x128xf32>
    %56 = arith.mulf %50, %55 : vector<8x128xf32>
    %57 = tpu.concatenate %54, %56 in 1 : vector<8x128xf32>, vector<8x128xf32> -> vector<8x256xf32>
    %58 = arith.truncf %57 : vector<8x256xf32> to vector<8x256xbf16>
    %c128_12 = arith.constant 128 : index
    %c0_13 = arith.constant 0 : index
    %59 = vector.load %arg1[%c128_12, %c0_13] : memref<384x384xbf16, #tpu.memory_space<vmem>>, vector<256x384xbf16>
    %cst_14 = arith.constant dense<0.000000e+00> : vector<8x384xf32>
    %60 = tpu.matmul %58, %59, %cst_14 {dimension_numbers = #tpu.dot_dimension_numbers<[1], [0], [0], [1], [0, 0, 1, 1], [], []>} : vector<8x256xbf16>, vector<256x384xbf16>, vector<8x384xf32> -> vector<8x384xf32>
    %61 = arith.addf %60, %1 : vector<8x384xf32>
    %62 = vector.extract_strided_slice %52 {offsets = [0, 0], sizes = [8, 128], strides = [1, 1]} : vector<8x384xf32> to vector<8x128xf32>
    %63 = vector.extract_strided_slice %61 {offsets = [0, 0], sizes = [8, 128], strides = [1, 1]} : vector<8x384xf32> to vector<8x128xf32>
    %64 = arith.addf %62, %63 : vector<8x128xf32>
    %65 = arith.negf %64 : vector<8x128xf32>
    %66 = math.exp %65 : vector<8x128xf32>
    %cst_15 = arith.constant 1.000000e+00 : f32
    %67 = vector.broadcast %cst_15 : f32 to vector<8x128xf32>
    %68 = arith.addf %67, %66 : vector<8x128xf32>
    %69 = arith.divf %67, %68 : vector<8x128xf32>
    %70 = vector.extract_strided_slice %52 {offsets = [0, 128], sizes = [8, 128], strides = [1, 1]} : vector<8x384xf32> to vector<8x128xf32>
    %71 = vector.extract_strided_slice %61 {offsets = [0, 128], sizes = [8, 128], strides = [1, 1]} : vector<8x384xf32> to vector<8x128xf32>
    %72 = arith.addf %70, %71 : vector<8x128xf32>
    %73 = arith.negf %72 : vector<8x128xf32>
    %74 = math.exp %73 : vector<8x128xf32>
    %cst_16 = arith.constant 1.000000e+00 : f32
    %75 = vector.broadcast %cst_16 : f32 to vector<8x128xf32>
    %76 = arith.addf %75, %74 : vector<8x128xf32>
    %77 = arith.divf %75, %76 : vector<8x128xf32>
    %78 = vector.extract_strided_slice %52 {offsets = [0, 256], sizes = [8, 128], strides = [1, 1]} : vector<8x384xf32> to vector<8x128xf32>
    %79 = vector.extract_strided_slice %61 {offsets = [0, 256], sizes = [8, 128], strides = [1, 1]} : vector<8x384xf32> to vector<8x128xf32>
    %80 = arith.mulf %69, %79 : vector<8x128xf32>
    %81 = arith.addf %78, %80 : vector<8x128xf32>
    %82 = math.tanh %81 : vector<8x128xf32>
    %cst_17 = arith.constant 1.000000e+00 : f32
    %83 = vector.broadcast %cst_17 : f32 to vector<8x128xf32>
    %84 = arith.subf %83, %77 : vector<8x128xf32>
    %85 = arith.mulf %84, %82 : vector<8x128xf32>
    %86 = arith.mulf %77, %50 : vector<8x128xf32>
    %87 = arith.addf %85, %86 : vector<8x128xf32>
    %88 = vector.extract_strided_slice %5 {offsets = [16, 0], sizes = [8, 384], strides = [1, 1]} : vector<64x384xf32> to vector<8x384xf32>
    %89 = arith.addf %88, %0 : vector<8x384xf32>
    %90 = vector.broadcast %10 : vector<8x1xf32> to vector<8x128xf32>
    %91 = arith.mulf %87, %90 : vector<8x128xf32>
    %92 = vector.broadcast %12 : vector<8x1xf32> to vector<8x128xf32>
    %93 = arith.mulf %87, %92 : vector<8x128xf32>
    %94 = tpu.concatenate %91, %93 in 1 : vector<8x128xf32>, vector<8x128xf32> -> vector<8x256xf32>
    %95 = arith.truncf %94 : vector<8x256xf32> to vector<8x256xbf16>
    %c128_18 = arith.constant 128 : index
    %c0_19 = arith.constant 0 : index
    %96 = vector.load %arg1[%c128_18, %c0_19] : memref<384x384xbf16, #tpu.memory_space<vmem>>, vector<256x384xbf16>
    %cst_20 = arith.constant dense<0.000000e+00> : vector<8x384xf32>
    %97 = tpu.matmul %95, %96, %cst_20 {dimension_numbers = #tpu.dot_dimension_numbers<[1], [0], [0], [1], [0, 0, 1, 1], [], []>} : vector<8x256xbf16>, vector<256x384xbf16>, vector<8x384xf32> -> vector<8x384xf32>
    %98 = arith.addf %97, %1 : vector<8x384xf32>
    %99 = vector.extract_strided_slice %89 {offsets = [0, 0], sizes = [8, 128], strides = [1, 1]} : vector<8x384xf32> to vector<8x128xf32>
    %100 = vector.extract_strided_slice %98 {offsets = [0, 0], sizes = [8, 128], strides = [1, 1]} : vector<8x384xf32> to vector<8x128xf32>
    %101 = arith.addf %99, %100 : vector<8x128xf32>
    %102 = arith.negf %101 : vector<8x128xf32>
    %103 = math.exp %102 : vector<8x128xf32>
    %cst_21 = arith.constant 1.000000e+00 : f32
    %104 = vector.broadcast %cst_21 : f32 to vector<8x128xf32>
    %105 = arith.addf %104, %103 : vector<8x128xf32>
    %106 = arith.divf %104, %105 : vector<8x128xf32>
    %107 = vector.extract_strided_slice %89 {offsets = [0, 128], sizes = [8, 128], strides = [1, 1]} : vector<8x384xf32> to vector<8x128xf32>
    %108 = vector.extract_strided_slice %98 {offsets = [0, 128], sizes = [8, 128], strides = [1, 1]} : vector<8x384xf32> to vector<8x128xf32>
    %109 = arith.addf %107, %108 : vector<8x128xf32>
    %110 = arith.negf %109 : vector<8x128xf32>
    %111 = math.exp %110 : vector<8x128xf32>
    %cst_22 = arith.constant 1.000000e+00 : f32
    %112 = vector.broadcast %cst_22 : f32 to vector<8x128xf32>
    %113 = arith.addf %112, %111 : vector<8x128xf32>
    %114 = arith.divf %112, %113 : vector<8x128xf32>
    %115 = vector.extract_strided_slice %89 {offsets = [0, 256], sizes = [8, 128], strides = [1, 1]} : vector<8x384xf32> to vector<8x128xf32>
    %116 = vector.extract_strided_slice %98 {offsets = [0, 256], sizes = [8, 128], strides = [1, 1]} : vector<8x384xf32> to vector<8x128xf32>
    %117 = arith.mulf %106, %116 : vector<8x128xf32>
    %118 = arith.addf %115, %117 : vector<8x128xf32>
    %119 = math.tanh %118 : vector<8x128xf32>
    %cst_23 = arith.constant 1.000000e+00 : f32
    %120 = vector.broadcast %cst_23 : f32 to vector<8x128xf32>
    %121 = arith.subf %120, %114 : vector<8x128xf32>
    %122 = arith.mulf %121, %119 : vector<8x128xf32>
    %123 = arith.mulf %114, %87 : vector<8x128xf32>
    %124 = arith.addf %122, %123 : vector<8x128xf32>
    %125 = vector.extract_strided_slice %5 {offsets = [24, 0], sizes = [8, 384], strides = [1, 1]} : vector<64x384xf32> to vector<8x384xf32>
    %126 = arith.addf %125, %0 : vector<8x384xf32>
    %127 = vector.broadcast %10 : vector<8x1xf32> to vector<8x128xf32>
    %128 = arith.mulf %124, %127 : vector<8x128xf32>
    %129 = vector.broadcast %12 : vector<8x1xf32> to vector<8x128xf32>
    %130 = arith.mulf %124, %129 : vector<8x128xf32>
    %131 = tpu.concatenate %128, %130 in 1 : vector<8x128xf32>, vector<8x128xf32> -> vector<8x256xf32>
    %132 = arith.truncf %131 : vector<8x256xf32> to vector<8x256xbf16>
    %c128_24 = arith.constant 128 : index
    %c0_25 = arith.constant 0 : index
    %133 = vector.load %arg1[%c128_24, %c0_25] : memref<384x384xbf16, #tpu.memory_space<vmem>>, vector<256x384xbf16>
    %cst_26 = arith.constant dense<0.000000e+00> : vector<8x384xf32>
    %134 = tpu.matmul %132, %133, %cst_26 {dimension_numbers = #tpu.dot_dimension_numbers<[1], [0], [0], [1], [0, 0, 1, 1], [], []>} : vector<8x256xbf16>, vector<256x384xbf16>, vector<8x384xf32> -> vector<8x384xf32>
    %135 = arith.addf %134, %1 : vector<8x384xf32>
    %136 = vector.extract_strided_slice %126 {offsets = [0, 0], sizes = [8, 128], strides = [1, 1]} : vector<8x384xf32> to vector<8x128xf32>
    %137 = vector.extract_strided_slice %135 {offsets = [0, 0], sizes = [8, 128], strides = [1, 1]} : vector<8x384xf32> to vector<8x128xf32>
    %138 = arith.addf %136, %137 : vector<8x128xf32>
    %139 = arith.negf %138 : vector<8x128xf32>
    %140 = math.exp %139 : vector<8x128xf32>
    %cst_27 = arith.constant 1.000000e+00 : f32
    %141 = vector.broadcast %cst_27 : f32 to vector<8x128xf32>
    %142 = arith.addf %141, %140 : vector<8x128xf32>
    %143 = arith.divf %141, %142 : vector<8x128xf32>
    %144 = vector.extract_strided_slice %126 {offsets = [0, 128], sizes = [8, 128], strides = [1, 1]} : vector<8x384xf32> to vector<8x128xf32>
    %145 = vector.extract_strided_slice %135 {offsets = [0, 128], sizes = [8, 128], strides = [1, 1]} : vector<8x384xf32> to vector<8x128xf32>
    %146 = arith.addf %144, %145 : vector<8x128xf32>
    %147 = arith.negf %146 : vector<8x128xf32>
    %148 = math.exp %147 : vector<8x128xf32>
    %cst_28 = arith.constant 1.000000e+00 : f32
    %149 = vector.broadcast %cst_28 : f32 to vector<8x128xf32>
    %150 = arith.addf %149, %148 : vector<8x128xf32>
    %151 = arith.divf %149, %150 : vector<8x128xf32>
    %152 = vector.extract_strided_slice %126 {offsets = [0, 256], sizes = [8, 128], strides = [1, 1]} : vector<8x384xf32> to vector<8x128xf32>
    %153 = vector.extract_strided_slice %135 {offsets = [0, 256], sizes = [8, 128], strides = [1, 1]} : vector<8x384xf32> to vector<8x128xf32>
    %154 = arith.mulf %143, %153 : vector<8x128xf32>
    %155 = arith.addf %152, %154 : vector<8x128xf32>
    %156 = math.tanh %155 : vector<8x128xf32>
    %cst_29 = arith.constant 1.000000e+00 : f32
    %157 = vector.broadcast %cst_29 : f32 to vector<8x128xf32>
    %158 = arith.subf %157, %151 : vector<8x128xf32>
    %159 = arith.mulf %158, %156 : vector<8x128xf32>
    %160 = arith.mulf %151, %124 : vector<8x128xf32>
    %161 = arith.addf %159, %160 : vector<8x128xf32>
    %162 = vector.extract_strided_slice %5 {offsets = [32, 0], sizes = [8, 384], strides = [1, 1]} : vector<64x384xf32> to vector<8x384xf32>
    %163 = arith.addf %162, %0 : vector<8x384xf32>
    %164 = vector.broadcast %10 : vector<8x1xf32> to vector<8x128xf32>
    %165 = arith.mulf %161, %164 : vector<8x128xf32>
    %166 = vector.broadcast %12 : vector<8x1xf32> to vector<8x128xf32>
    %167 = arith.mulf %161, %166 : vector<8x128xf32>
    %168 = tpu.concatenate %165, %167 in 1 : vector<8x128xf32>, vector<8x128xf32> -> vector<8x256xf32>
    %169 = arith.truncf %168 : vector<8x256xf32> to vector<8x256xbf16>
    %c128_30 = arith.constant 128 : index
    %c0_31 = arith.constant 0 : index
    %170 = vector.load %arg1[%c128_30, %c0_31] : memref<384x384xbf16, #tpu.memory_space<vmem>>, vector<256x384xbf16>
    %cst_32 = arith.constant dense<0.000000e+00> : vector<8x384xf32>
    %171 = tpu.matmul %169, %170, %cst_32 {dimension_numbers = #tpu.dot_dimension_numbers<[1], [0], [0], [1], [0, 0, 1, 1], [], []>} : vector<8x256xbf16>, vector<256x384xbf16>, vector<8x384xf32> -> vector<8x384xf32>
    %172 = arith.addf %171, %1 : vector<8x384xf32>
    %173 = vector.extract_strided_slice %163 {offsets = [0, 0], sizes = [8, 128], strides = [1, 1]} : vector<8x384xf32> to vector<8x128xf32>
    %174 = vector.extract_strided_slice %172 {offsets = [0, 0], sizes = [8, 128], strides = [1, 1]} : vector<8x384xf32> to vector<8x128xf32>
    %175 = arith.addf %173, %174 : vector<8x128xf32>
    %176 = arith.negf %175 : vector<8x128xf32>
    %177 = math.exp %176 : vector<8x128xf32>
    %cst_33 = arith.constant 1.000000e+00 : f32
    %178 = vector.broadcast %cst_33 : f32 to vector<8x128xf32>
    %179 = arith.addf %178, %177 : vector<8x128xf32>
    %180 = arith.divf %178, %179 : vector<8x128xf32>
    %181 = vector.extract_strided_slice %163 {offsets = [0, 128], sizes = [8, 128], strides = [1, 1]} : vector<8x384xf32> to vector<8x128xf32>
    %182 = vector.extract_strided_slice %172 {offsets = [0, 128], sizes = [8, 128], strides = [1, 1]} : vector<8x384xf32> to vector<8x128xf32>
    %183 = arith.addf %181, %182 : vector<8x128xf32>
    %184 = arith.negf %183 : vector<8x128xf32>
    %185 = math.exp %184 : vector<8x128xf32>
    %cst_34 = arith.constant 1.000000e+00 : f32
    %186 = vector.broadcast %cst_34 : f32 to vector<8x128xf32>
    %187 = arith.addf %186, %185 : vector<8x128xf32>
    %188 = arith.divf %186, %187 : vector<8x128xf32>
    %189 = vector.extract_strided_slice %163 {offsets = [0, 256], sizes = [8, 128], strides = [1, 1]} : vector<8x384xf32> to vector<8x128xf32>
    %190 = vector.extract_strided_slice %172 {offsets = [0, 256], sizes = [8, 128], strides = [1, 1]} : vector<8x384xf32> to vector<8x128xf32>
    %191 = arith.mulf %180, %190 : vector<8x128xf32>
    %192 = arith.addf %189, %191 : vector<8x128xf32>
    %193 = math.tanh %192 : vector<8x128xf32>
    %cst_35 = arith.constant 1.000000e+00 : f32
    %194 = vector.broadcast %cst_35 : f32 to vector<8x128xf32>
    %195 = arith.subf %194, %188 : vector<8x128xf32>
    %196 = arith.mulf %195, %193 : vector<8x128xf32>
    %197 = arith.mulf %188, %161 : vector<8x128xf32>
    %198 = arith.addf %196, %197 : vector<8x128xf32>
    %199 = vector.extract_strided_slice %5 {offsets = [40, 0], sizes = [8, 384], strides = [1, 1]} : vector<64x384xf32> to vector<8x384xf32>
    %200 = arith.addf %199, %0 : vector<8x384xf32>
    %201 = vector.broadcast %10 : vector<8x1xf32> to vector<8x128xf32>
    %202 = arith.mulf %198, %201 : vector<8x128xf32>
    %203 = vector.broadcast %12 : vector<8x1xf32> to vector<8x128xf32>
    %204 = arith.mulf %198, %203 : vector<8x128xf32>
    %205 = tpu.concatenate %202, %204 in 1 : vector<8x128xf32>, vector<8x128xf32> -> vector<8x256xf32>
    %206 = arith.truncf %205 : vector<8x256xf32> to vector<8x256xbf16>
    %c128_36 = arith.constant 128 : index
    %c0_37 = arith.constant 0 : index
    %207 = vector.load %arg1[%c128_36, %c0_37] : memref<384x384xbf16, #tpu.memory_space<vmem>>, vector<256x384xbf16>
    %cst_38 = arith.constant dense<0.000000e+00> : vector<8x384xf32>
    %208 = tpu.matmul %206, %207, %cst_38 {dimension_numbers = #tpu.dot_dimension_numbers<[1], [0], [0], [1], [0, 0, 1, 1], [], []>} : vector<8x256xbf16>, vector<256x384xbf16>, vector<8x384xf32> -> vector<8x384xf32>
    %209 = arith.addf %208, %1 : vector<8x384xf32>
    %210 = vector.extract_strided_slice %200 {offsets = [0, 0], sizes = [8, 128], strides = [1, 1]} : vector<8x384xf32> to vector<8x128xf32>
    %211 = vector.extract_strided_slice %209 {offsets = [0, 0], sizes = [8, 128], strides = [1, 1]} : vector<8x384xf32> to vector<8x128xf32>
    %212 = arith.addf %210, %211 : vector<8x128xf32>
    %213 = arith.negf %212 : vector<8x128xf32>
    %214 = math.exp %213 : vector<8x128xf32>
    %cst_39 = arith.constant 1.000000e+00 : f32
    %215 = vector.broadcast %cst_39 : f32 to vector<8x128xf32>
    %216 = arith.addf %215, %214 : vector<8x128xf32>
    %217 = arith.divf %215, %216 : vector<8x128xf32>
    %218 = vector.extract_strided_slice %200 {offsets = [0, 128], sizes = [8, 128], strides = [1, 1]} : vector<8x384xf32> to vector<8x128xf32>
    %219 = vector.extract_strided_slice %209 {offsets = [0, 128], sizes = [8, 128], strides = [1, 1]} : vector<8x384xf32> to vector<8x128xf32>
    %220 = arith.addf %218, %219 : vector<8x128xf32>
    %221 = arith.negf %220 : vector<8x128xf32>
    %222 = math.exp %221 : vector<8x128xf32>
    %cst_40 = arith.constant 1.000000e+00 : f32
    %223 = vector.broadcast %cst_40 : f32 to vector<8x128xf32>
    %224 = arith.addf %223, %222 : vector<8x128xf32>
    %225 = arith.divf %223, %224 : vector<8x128xf32>
    %226 = vector.extract_strided_slice %200 {offsets = [0, 256], sizes = [8, 128], strides = [1, 1]} : vector<8x384xf32> to vector<8x128xf32>
    %227 = vector.extract_strided_slice %209 {offsets = [0, 256], sizes = [8, 128], strides = [1, 1]} : vector<8x384xf32> to vector<8x128xf32>
    %228 = arith.mulf %217, %227 : vector<8x128xf32>
    %229 = arith.addf %226, %228 : vector<8x128xf32>
    %230 = math.tanh %229 : vector<8x128xf32>
    %cst_41 = arith.constant 1.000000e+00 : f32
    %231 = vector.broadcast %cst_41 : f32 to vector<8x128xf32>
    %232 = arith.subf %231, %225 : vector<8x128xf32>
    %233 = arith.mulf %232, %230 : vector<8x128xf32>
    %234 = arith.mulf %225, %198 : vector<8x128xf32>
    %235 = arith.addf %233, %234 : vector<8x128xf32>
    %236 = vector.extract_strided_slice %5 {offsets = [48, 0], sizes = [8, 384], strides = [1, 1]} : vector<64x384xf32> to vector<8x384xf32>
    %237 = arith.addf %236, %0 : vector<8x384xf32>
    %238 = vector.broadcast %10 : vector<8x1xf32> to vector<8x128xf32>
    %239 = arith.mulf %235, %238 : vector<8x128xf32>
    %240 = vector.broadcast %12 : vector<8x1xf32> to vector<8x128xf32>
    %241 = arith.mulf %235, %240 : vector<8x128xf32>
    %242 = tpu.concatenate %239, %241 in 1 : vector<8x128xf32>, vector<8x128xf32> -> vector<8x256xf32>
    %243 = arith.truncf %242 : vector<8x256xf32> to vector<8x256xbf16>
    %c128_42 = arith.constant 128 : index
    %c0_43 = arith.constant 0 : index
    %244 = vector.load %arg1[%c128_42, %c0_43] : memref<384x384xbf16, #tpu.memory_space<vmem>>, vector<256x384xbf16>
    %cst_44 = arith.constant dense<0.000000e+00> : vector<8x384xf32>
    %245 = tpu.matmul %243, %244, %cst_44 {dimension_numbers = #tpu.dot_dimension_numbers<[1], [0], [0], [1], [0, 0, 1, 1], [], []>} : vector<8x256xbf16>, vector<256x384xbf16>, vector<8x384xf32> -> vector<8x384xf32>
    %246 = arith.addf %245, %1 : vector<8x384xf32>
    %247 = vector.extract_strided_slice %237 {offsets = [0, 0], sizes = [8, 128], strides = [1, 1]} : vector<8x384xf32> to vector<8x128xf32>
    %248 = vector.extract_strided_slice %246 {offsets = [0, 0], sizes = [8, 128], strides = [1, 1]} : vector<8x384xf32> to vector<8x128xf32>
    %249 = arith.addf %247, %248 : vector<8x128xf32>
    %250 = arith.negf %249 : vector<8x128xf32>
    %251 = math.exp %250 : vector<8x128xf32>
    %cst_45 = arith.constant 1.000000e+00 : f32
    %252 = vector.broadcast %cst_45 : f32 to vector<8x128xf32>
    %253 = arith.addf %252, %251 : vector<8x128xf32>
    %254 = arith.divf %252, %253 : vector<8x128xf32>
    %255 = vector.extract_strided_slice %237 {offsets = [0, 128], sizes = [8, 128], strides = [1, 1]} : vector<8x384xf32> to vector<8x128xf32>
    %256 = vector.extract_strided_slice %246 {offsets = [0, 128], sizes = [8, 128], strides = [1, 1]} : vector<8x384xf32> to vector<8x128xf32>
    %257 = arith.addf %255, %256 : vector<8x128xf32>
    %258 = arith.negf %257 : vector<8x128xf32>
    %259 = math.exp %258 : vector<8x128xf32>
    %cst_46 = arith.constant 1.000000e+00 : f32
    %260 = vector.broadcast %cst_46 : f32 to vector<8x128xf32>
    %261 = arith.addf %260, %259 : vector<8x128xf32>
    %262 = arith.divf %260, %261 : vector<8x128xf32>
    %263 = vector.extract_strided_slice %237 {offsets = [0, 256], sizes = [8, 128], strides = [1, 1]} : vector<8x384xf32> to vector<8x128xf32>
    %264 = vector.extract_strided_slice %246 {offsets = [0, 256], sizes = [8, 128], strides = [1, 1]} : vector<8x384xf32> to vector<8x128xf32>
    %265 = arith.mulf %254, %264 : vector<8x128xf32>
    %266 = arith.addf %263, %265 : vector<8x128xf32>
    %267 = math.tanh %266 : vector<8x128xf32>
    %cst_47 = arith.constant 1.000000e+00 : f32
    %268 = vector.broadcast %cst_47 : f32 to vector<8x128xf32>
    %269 = arith.subf %268, %262 : vector<8x128xf32>
    %270 = arith.mulf %269, %267 : vector<8x128xf32>
    %271 = arith.mulf %262, %235 : vector<8x128xf32>
    %272 = arith.addf %270, %271 : vector<8x128xf32>
    %273 = vector.broadcast %10 : vector<8x1xf32> to vector<8x128xf32>
    %274 = arith.mulf %272, %273 : vector<8x128xf32>
    %275 = vector.broadcast %12 : vector<8x1xf32> to vector<8x128xf32>
    %276 = arith.mulf %235, %275 : vector<8x128xf32>
    %277 = arith.addf %274, %276 : vector<8x128xf32>
    %278 = vector.extract_strided_slice %5 {offsets = [56, 0], sizes = [8, 384], strides = [1, 1]} : vector<64x384xf32> to vector<8x384xf32>
    %279 = arith.addf %278, %0 : vector<8x384xf32>
    %280 = vector.broadcast %10 : vector<8x1xf32> to vector<8x128xf32>
    %281 = arith.mulf %277, %280 : vector<8x128xf32>
    %282 = vector.broadcast %12 : vector<8x1xf32> to vector<8x128xf32>
    %283 = arith.mulf %277, %282 : vector<8x128xf32>
    %284 = tpu.concatenate %281, %283 in 1 : vector<8x128xf32>, vector<8x128xf32> -> vector<8x256xf32>
    %285 = arith.truncf %284 : vector<8x256xf32> to vector<8x256xbf16>
    %c128_48 = arith.constant 128 : index
    %c0_49 = arith.constant 0 : index
    %286 = vector.load %arg1[%c128_48, %c0_49] : memref<384x384xbf16, #tpu.memory_space<vmem>>, vector<256x384xbf16>
    %cst_50 = arith.constant dense<0.000000e+00> : vector<8x384xf32>
    %287 = tpu.matmul %285, %286, %cst_50 {dimension_numbers = #tpu.dot_dimension_numbers<[1], [0], [0], [1], [0, 0, 1, 1], [], []>} : vector<8x256xbf16>, vector<256x384xbf16>, vector<8x384xf32> -> vector<8x384xf32>
    %288 = arith.addf %287, %1 : vector<8x384xf32>
    %289 = vector.extract_strided_slice %279 {offsets = [0, 0], sizes = [8, 128], strides = [1, 1]} : vector<8x384xf32> to vector<8x128xf32>
    %290 = vector.extract_strided_slice %288 {offsets = [0, 0], sizes = [8, 128], strides = [1, 1]} : vector<8x384xf32> to vector<8x128xf32>
    %291 = arith.addf %289, %290 : vector<8x128xf32>
    %292 = arith.negf %291 : vector<8x128xf32>
    %293 = math.exp %292 : vector<8x128xf32>
    %cst_51 = arith.constant 1.000000e+00 : f32
    %294 = vector.broadcast %cst_51 : f32 to vector<8x128xf32>
    %295 = arith.addf %294, %293 : vector<8x128xf32>
    %296 = arith.divf %294, %295 : vector<8x128xf32>
    %297 = vector.extract_strided_slice %279 {offsets = [0, 128], sizes = [8, 128], strides = [1, 1]} : vector<8x384xf32> to vector<8x128xf32>
    %298 = vector.extract_strided_slice %288 {offsets = [0, 128], sizes = [8, 128], strides = [1, 1]} : vector<8x384xf32> to vector<8x128xf32>
    %299 = arith.addf %297, %298 : vector<8x128xf32>
    %300 = arith.negf %299 : vector<8x128xf32>
    %301 = math.exp %300 : vector<8x128xf32>
    %cst_52 = arith.constant 1.000000e+00 : f32
    %302 = vector.broadcast %cst_52 : f32 to vector<8x128xf32>
    %303 = arith.addf %302, %301 : vector<8x128xf32>
    %304 = arith.divf %302, %303 : vector<8x128xf32>
    %305 = vector.extract_strided_slice %279 {offsets = [0, 256], sizes = [8, 128], strides = [1, 1]} : vector<8x384xf32> to vector<8x128xf32>
    %306 = vector.extract_strided_slice %288 {offsets = [0, 256], sizes = [8, 128], strides = [1, 1]} : vector<8x384xf32> to vector<8x128xf32>
    %307 = arith.mulf %296, %306 : vector<8x128xf32>
    %308 = arith.addf %305, %307 : vector<8x128xf32>
    %309 = math.tanh %308 : vector<8x128xf32>
    %cst_53 = arith.constant 1.000000e+00 : f32
    %310 = vector.broadcast %cst_53 : f32 to vector<8x128xf32>
    %311 = arith.subf %310, %304 : vector<8x128xf32>
    %312 = arith.mulf %311, %309 : vector<8x128xf32>
    %313 = arith.mulf %304, %277 : vector<8x128xf32>
    %314 = arith.addf %312, %313 : vector<8x128xf32>
    %315 = vector.broadcast %10 : vector<8x1xf32> to vector<8x128xf32>
    %316 = arith.mulf %314, %315 : vector<8x128xf32>
    %317 = vector.broadcast %12 : vector<8x1xf32> to vector<8x128xf32>
    %318 = arith.mulf %277, %317 : vector<8x128xf32>
    %319 = arith.addf %316, %318 : vector<8x128xf32>
    %320 = vector.extract_strided_slice %319 {offsets = [0, 0], sizes = [1, 128], strides = [1, 1]} : vector<8x128xf32> to vector<1x128xf32>
    %c64 = arith.constant 64 : index
    %c0_54 = arith.constant 0 : index
    %321 = vector.load %arg0[%c64, %c0_54] : memref<72x128xf32, #tpu.memory_space<vmem>>, vector<1x128xf32>
    %c0_55 = arith.constant 0 : index
    %c0_56 = arith.constant 0 : index
    %322 = vector.load %arg2[%c0_55, %c0_56] : memref<408x384xf32, #tpu.memory_space<vmem>>, vector<128x384xf32>
    %cst_57 = arith.constant dense<0.000000e+00> : vector<1x384xf32>
    %323 = tpu.matmul %320, %322, %cst_57 {dimension_numbers = #tpu.dot_dimension_numbers<[1], [0], [0], [1], [0, 0, 1, 1], [], []>} : vector<1x128xf32>, vector<128x384xf32>, vector<1x384xf32> -> vector<1x384xf32>
    %c400 = arith.constant 400 : index
    %c0_58 = arith.constant 0 : index
    %324 = vector.load %arg2[%c400, %c0_58] : memref<408x384xf32, #tpu.memory_space<vmem>>, vector<1x384xf32>
    %325 = arith.addf %323, %324 : vector<1x384xf32>
    %c128_59 = arith.constant 128 : index
    %c0_60 = arith.constant 0 : index
    %326 = vector.load %arg2[%c128_59, %c0_60] : memref<408x384xf32, #tpu.memory_space<vmem>>, vector<128x384xf32>
    %cst_61 = arith.constant dense<0.000000e+00> : vector<1x384xf32>
    %327 = tpu.matmul %321, %326, %cst_61 {dimension_numbers = #tpu.dot_dimension_numbers<[1], [0], [0], [1], [0, 0, 1, 1], [], []>} : vector<1x128xf32>, vector<128x384xf32>, vector<1x384xf32> -> vector<1x384xf32>
    %c401 = arith.constant 401 : index
    %c0_62 = arith.constant 0 : index
    %328 = vector.load %arg2[%c401, %c0_62] : memref<408x384xf32, #tpu.memory_space<vmem>>, vector<1x384xf32>
    %329 = arith.addf %327, %328 : vector<1x384xf32>
    %330 = vector.extract_strided_slice %325 {offsets = [0, 0], sizes = [1, 128], strides = [1, 1]} : vector<1x384xf32> to vector<1x128xf32>
    %331 = vector.extract_strided_slice %329 {offsets = [0, 0], sizes = [1, 128], strides = [1, 1]} : vector<1x384xf32> to vector<1x128xf32>
    %332 = arith.addf %330, %331 : vector<1x128xf32>
    %333 = arith.negf %332 : vector<1x128xf32>
    %334 = math.exp %333 : vector<1x128xf32>
    %cst_63 = arith.constant 1.000000e+00 : f32
    %335 = vector.broadcast %cst_63 : f32 to vector<1x128xf32>
    %336 = arith.addf %335, %334 : vector<1x128xf32>
    %337 = arith.divf %335, %336 : vector<1x128xf32>
    %338 = vector.extract_strided_slice %325 {offsets = [0, 128], sizes = [1, 128], strides = [1, 1]} : vector<1x384xf32> to vector<1x128xf32>
    %339 = vector.extract_strided_slice %329 {offsets = [0, 128], sizes = [1, 128], strides = [1, 1]} : vector<1x384xf32> to vector<1x128xf32>
    %340 = arith.addf %338, %339 : vector<1x128xf32>
    %341 = arith.negf %340 : vector<1x128xf32>
    %342 = math.exp %341 : vector<1x128xf32>
    %cst_64 = arith.constant 1.000000e+00 : f32
    %343 = vector.broadcast %cst_64 : f32 to vector<1x128xf32>
    %344 = arith.addf %343, %342 : vector<1x128xf32>
    %345 = arith.divf %343, %344 : vector<1x128xf32>
    %346 = vector.extract_strided_slice %325 {offsets = [0, 256], sizes = [1, 128], strides = [1, 1]} : vector<1x384xf32> to vector<1x128xf32>
    %347 = vector.extract_strided_slice %329 {offsets = [0, 256], sizes = [1, 128], strides = [1, 1]} : vector<1x384xf32> to vector<1x128xf32>
    %348 = arith.mulf %337, %347 : vector<1x128xf32>
    %349 = arith.addf %346, %348 : vector<1x128xf32>
    %350 = math.tanh %349 : vector<1x128xf32>
    %cst_65 = arith.constant 1.000000e+00 : f32
    %351 = vector.broadcast %cst_65 : f32 to vector<1x128xf32>
    %352 = arith.subf %351, %345 : vector<1x128xf32>
    %353 = arith.mulf %352, %350 : vector<1x128xf32>
    %354 = arith.mulf %345, %321 : vector<1x128xf32>
    %355 = arith.addf %353, %354 : vector<1x128xf32>
    %cst_66 = arith.constant 0.000000e+00 : f32
    %356 = vector.broadcast %cst_66 : f32 to vector<7x128xf32>
    %357 = tpu.concatenate %319, %355, %356 in 0 : vector<8x128xf32>, vector<1x128xf32>, vector<7x128xf32> -> vector<16x128xf32>
    %c256 = arith.constant 256 : index
    %c0_67 = arith.constant 0 : index
    %358 = vector.load %arg2[%c256, %c0_67] : memref<408x384xf32, #tpu.memory_space<vmem>>, vector<128x128xf32>
    %cst_68 = arith.constant dense<0.000000e+00> : vector<16x128xf32>
    %359 = tpu.matmul %357, %358, %cst_68 {dimension_numbers = #tpu.dot_dimension_numbers<[1], [0], [0], [1], [0, 0, 1, 1], [], []>} : vector<16x128xf32>, vector<128x128xf32>, vector<16x128xf32> -> vector<16x128xf32>
    %c402 = arith.constant 402 : index
    %c0_69 = arith.constant 0 : index
    %360 = vector.load %arg2[%c402, %c0_69] : memref<408x384xf32, #tpu.memory_space<vmem>>, vector<1x128xf32>
    %361 = vector.extract_strided_slice %359 {offsets = [8, 0], sizes = [1, 128], strides = [1, 1]} : vector<16x128xf32> to vector<1x128xf32>
    %362 = arith.addf %361, %360 : vector<1x128xf32>
    %363 = vector.extract_strided_slice %362 {offsets = [0, 1], sizes = [1, 1], strides = [1, 1]} : vector<1x128xf32> to vector<1x1xf32>
    %364 = vector.extract_strided_slice %359 {offsets = [0, 0], sizes = [8, 128], strides = [1, 1]} : vector<16x128xf32> to vector<8x128xf32>
    %365 = vector.broadcast %363 : vector<1x1xf32> to vector<8x128xf32>
    %366 = arith.addf %364, %365 : vector<8x128xf32>
    %cst_70 = arith.constant 0.000000e+00 : f32
    %367 = vector.broadcast %cst_70 : f32 to vector<8x128xf32>
    %368 = arith.maximumf %366, %367 : vector<8x128xf32>
    %cst_71 = arith.constant 0.000000e+00 : f32
    %369 = vector.broadcast %cst_71 : f32 to vector<6x128xf32>
    %370 = tpu.concatenate %368, %362, %355, %369 in 0 : vector<8x128xf32>, vector<1x128xf32>, vector<1x128xf32>, vector<6x128xf32> -> vector<16x128xf32>
    %c0_72 = arith.constant 0 : index
    %c0_73 = arith.constant 0 : index
    %371 = vector.load %arg3[%c0_72, %c0_73] : memref<16x128xf32, #tpu.memory_space<vmem>>, vector<16x128xf32>
    tpu.vector_store %arg3[%c0_72, %c0_73], %370 {strides = array<i32>} : memref<16x128xf32, #tpu.memory_space<vmem>>, vector<16x128xf32>,
    return
  }
}

</mosaic_0001>

<bundles_post_ra>
// kernel: forward.1
= control target key start
LH: loop header
LB: loop body
LE: loop exit
PB: predicated region body
PF: predicated region fallthrough
CT: control target
= control target key end

     0   :  { %8 = vsyncpa [#allocation3], 0  ;;  %s3897_s0 = inlined_call_operand.vmem [shape: f32[72,128], index: 0, kind: input, shape index: {}]   ;;  %s3898_s1 = inlined_call_operand.hbm [shape: bf16[384,384], index: 1, kind: input, shape index: {}]   ;;  %s3899_s2 = inlined_call_operand.hbm [shape: f32[408,384], index: 2, kind: input, shape index: {}]   ;;  %s3900_s3 = inlined_call_operand.vmem [shape: f32[16,128], index: 3, kind: output, shape index: {}]  }
   0x1   :  { %9 = vsyncpa [#allocation5], 0  ;;  %s3023_s12 = smov [#allocation2]   ;;  %s2975_s16 = scalar_lea.hbm %s3898_s1, 9216 }
   0x2   :  { %s17_s13 = sshll.u32 %s3023_s12, 4  ;;  %p2976_p0 = scmp.ne.s32.totalorder %s3898_s1, %s2975_s16  ;;  %s18_s13 = int_to_ptr.vmem [resolvable:$true] %s17_s13 }
   0x3   :  { %p2979_p1 = scmp.lt.u32.totalorder %s2975_s16, %s3898_s1 }
   0x5   :  { %p2981_p2 = pnand %p2979_p1, %p2976_p0 }
   0x7   :  { %2984 = shalt.err (!%p2981_p2)
}
   0x8   :  { %s2985_s21 = scalar_lea.vmem %s18_s13, 9216  ;;  %p2990_p4 = scmp.lt.s32.totalorder %s18_s13, %s18_s13 }
   0x9   :  { %p2986_p3 = scmp.ne.s32.totalorder %s18_s13, %s2985_s21  ;;  %p2991_p5 = scmp.lt.s32.totalorder %s2985_s21, %s2985_s21 }
   0xb   :  { %p2992_p6 = por %p2991_p5, %p2990_p4 }
   0xd   :  { %p2993_p7 = pnand %p2992_p6, %p2986_p3 }
   0xf   :  { %2996 = shalt.err (!%p2993_p7)
}
  0x10   :  { %s3024_s22 = smov 192   ;;  %s3025_s23 = smov 12  }
  0x11   :  { %23 = dma.hbm_to_vmem [thread:$0]  %s3898_s1, 9216, %s18_s13, [#allocation3], %s3024_s22, %s3024_s22, %s3025_s23  }
  0x12   :  { %s3026_s26 = smov [#allocation4]   ;;  %s2997_s30 = scalar_lea.hbm %s3899_s2, 19584 }
  0x13   :  { %s29_s27 = sshll.u32 %s3026_s26, 4  ;;  %p2998_p8 = scmp.ne.s32.totalorder %s3899_s2, %s2997_s30  ;;  %s30_s27 = int_to_ptr.vmem [resolvable:$true] %s29_s27 }
  0x14   :  { %p3001_p9 = scmp.lt.u32.totalorder %s2997_s30, %s3899_s2 }
  0x16   :  { %p3003_p10 = pnand %p3001_p9, %p2998_p8 }
  0x18   :  { %3006 = shalt.err (!%p3003_p10)
}
  0x19   :  { %s3007_s8 = scalar_lea.vmem %s30_s27, 19584  ;;  %p3012_p12 = scmp.lt.s32.totalorder %s30_s27, %s30_s27 }
  0x1a   :  { %p3008_p11 = scmp.ne.s32.totalorder %s30_s27, %s3007_s8  ;;  %p3013_p13 = scmp.lt.s32.totalorder %s3007_s8, %s3007_s8 }
  0x1c   :  { %p3014_p0 = por %p3013_p13, %p3012_p12 }
  0x1e   :  { %p3015_p1 = pnand %p3014_p0, %p3008_p11 }
  0x20   :  { %3018 = shalt.err (!%p3015_p1)
}
  0x21   :  { %s3027_s1 = smov 384   ;;  %s3028_s9 = smov 24  }
  0x22   :  { %35 = dma.hbm_to_vmem [thread:$0]  %s3899_s2, 19584, %s30_s27, [#allocation5], %s3027_s1, %s3027_s1, %s3028_s9  }
  0x23   :  { %3019 = dma.done.wait [#allocation3], 9216  }
  0x24   :  { %3020 = vsyncadd [#allocation3], 4294958080 }
  0x25   :  { %3021 = dma.done.wait [#allocation5], 19584  }
  0x26   :  { %3022 = vsyncadd [#allocation5], 4294947712  ;;  %v3029_v0 = vmov 0   ;;  %v2738_v1 = vld [vmem:[#allocation2 + $0x4] ss:$12 sps:$4 sm:$0xff]   ;;  %v50_v10 = vld [vmem:[%s3897_s0 + $0x8] sm:$0xff]  ;;  %v359_v26 = vlaneseq }
  0x27   :  { %253 = vmatprep.mubr.bf16.mxu0 %v3029_v0  ;;  %v2740_v2 = vld [vmem:[#allocation2] ss:$12 sps:$4 sm:$0xff]   ;;  %221 = vmatprep.subr.bf16.mxu0 %v2738_v1  ;;  %v2741_v3 = vld [vmem:[#allocation2 + $0x1c] ss:$12 sps:$4 sm:$0xff]   ;;  %v2743_v4 = vld [vmem:[#allocation2 + $0x18] ss:$12 sps:$4 sm:$0xff]  }
  0x28   :  { %222 = vmatpush1.bf16.msra.mxu0 %v2740_v2  ;;  %v2744_v5 = vld [vmem:[#allocation2 + $0x34] ss:$12 sps:$4 sm:$0xff]   ;;  %v2746_v6 = vld [vmem:[#allocation2 + $0x30] ss:$12 sps:$4 sm:$0xff]   ;;  %v2747_v7 = vld [vmem:[#allocation2 + $0x4c] ss:$12 sps:$4 sm:$0xff]  }
  0x29   :  { %223 = vmatprep.subr.bf16.mxu0 %v2741_v3  ;;  %v2749_v8 = vld [vmem:[#allocation2 + $0x48] ss:$12 sps:$4 sm:$0xff]   ;;  %v49_v9 = vld [vmem:[%s3897_s0] sm:$0xff]  ;;  %v2758_v19 = vld [vmem:[#allocation2 + $0x90] ss:$12 sps:$4 sm:$0xff]   ;;  %v3101_v32 = vshrl.u32 %v359_v26, 7 }
  0x2a   :  { %v2750_v11 = vld [vmem:[#allocation2 + $0x64] ss:$12 sps:$4 sm:$0xff]   ;;  %v57_v12 = vpack.c.bf16 %v50_v10, %v49_v9  ;;  %v2752_v13 = vld [vmem:[#allocation2 + $0x60] ss:$12 sps:$4 sm:$0xff]   ;;  %v2753_v14 = vld [vmem:[#allocation2 + $0x7c] ss:$12 sps:$4 sm:$0xff]  }
  0x2b   :  { %v2755_v15 = vld [vmem:[#allocation2 + $0x78] ss:$12 sps:$4 sm:$0xff]   ;;  %v2756_v16 = vld [vmem:[#allocation2 + $0x94] ss:$12 sps:$4 sm:$0xff]   ;;  %v2792_v24 = vld [vmem:[#allocation2 + $0x50] ss:$12 sps:$4 sm:$0xff]  }
  0x2c   :  { %224 = vmatpush1.bf16.msra.mxu0 %v2743_v4  ;;  %2462 = vmatprep.mubr.bf16.mxu1 %v57_v12  ;;  %v2780_v17 = vld [vmem:[#allocation2 + $0x8] ss:$12 sps:$4 sm:$0xff]   ;;  %v2784_v18 = vld [vmem:[#allocation2 + $0x20] ss:$12 sps:$4 sm:$0xff]   ;;  %v2788_v21 = vld [vmem:[#allocation2 + $0x38] ss:$12 sps:$4 sm:$0xff]  }
  0x2d   :  { %225 = vmatprep.subr.bf16.mxu0 %v2744_v5  ;;  %2446 = vmatprep.subr.bf16.mxu1 %v2780_v17  ;;  %v2759_v20 = vld [vmem:[#allocation2 + $0xac] ss:$12 sps:$4 sm:$0xff]   ;;  %v2761_v22 = vld [vmem:[#allocation2 + $0xa8] ss:$12 sps:$4 sm:$0xff]   ;;  %v3085_v23 = vld [vmem:[#allocation2 + $0xc4] ss:$12 sps:$4 sm:$0xff]  }
  0x2e   :  { %2447 = vmatpush3.bf16.msra.mxu1 %v2780_v17  ;;  %v3087_v25 = vld [vmem:[#allocation2 + $0xc0] ss:$12 sps:$4 sm:$0xff]   ;;  %v3090_v27 = vld [vmem:[#allocation2 + $0xdc] ss:$12 sps:$4 sm:$0xff]   ;;  %v3092_v29 = vld [vmem:[#allocation2 + $0xd8] ss:$12 sps:$4 sm:$0xff]  }
  0x2f   :  { %2448 = vmatprep.subr.bf16.mxu1 %v2784_v18  ;;  %v2796_v28 = vld [vmem:[#allocation2 + $0x68] ss:$12 sps:$4 sm:$0xff]   ;;  %v52_v31 = vld [vmem:[%s3897_s0 + $0x18] sm:$0xff]  ;;  %3936 = vst [vmem:[#allocation8_spill] sm:$0xff] %v3101_v32  ;;  %v2800_v34 = vld [vmem:[#allocation2 + $0x80] ss:$12 sps:$4 sm:$0xff]  }
  0x30   :  { %226 = vmatpush1.bf16.msra.mxu0 %v2746_v6  ;;  %v51_v30 = vld [vmem:[%s3897_s0 + $0x10] sm:$0xff]  ;;  %vm361_vm0 = vcmp.eq.s32.totalorder %v3101_v32, 0  ;;  %v3112_v37 = vld [vmem:[#allocation2 + $0x10c] ss:$12 sps:$4 sm:$0xff]   ;;  %v53_v41 = vld [vmem:[%s3897_s0 + $0x20] sm:$0xff]  ;;  %v3901_v43 = vmov 0.0  }
  0x31   :  { %227 = vmatprep.subr.bf16.mxu0 %v2747_v7  ;;  %v3104_v33 = vld [vmem:[#allocation2 + $0xf4] ss:$12 sps:$4 sm:$0xff]   ;;  %v58_v35 = vpack.c.bf16 %v52_v31, %v51_v30  ;;  %v3108_v36 = vld [vmem:[#allocation2 + $0xf0] ss:$12 sps:$4 sm:$0xff]   ;;  %v2804_v39 = vld [vmem:[#allocation2 + $0x98] ss:$12 sps:$4 sm:$0xff]  }
  0x32   :  { %2449 = vmatpush3.bf16.msra.mxu1 %v2784_v18  ;;  %v3114_v38 = vld [vmem:[#allocation2 + $0x108] ss:$12 sps:$4 sm:$0xff]   ;;  %v3116_v40 = vld [vmem:[#allocation2 + $0x124] ss:$12 sps:$4 sm:$0xff]   ;;  %v3126_v44 = vsel %vm361_vm0, 1.0, %v3901_v43  ;;  %v56_v54 = vld [vmem:[%s3897_s0 + $0x38] sm:$0xff] }
  0x33   :  { %2450 = vmatprep.subr.bf16.mxu1 %v2788_v21  ;;  %v54_v42 = vld [vmem:[%s3897_s0 + $0x28] sm:$0xff]  ;;  %v2808_v45 = vld [vmem:[#allocation2 + $0xb0] ss:$12 sps:$4 sm:$0xff]   ;;  %v3131_v47 = vsub.f32 1.0, %v3126_v44  ;;  %v3139_v50 = vld [vmem:[#allocation2 + $0x138] ss:$12 sps:$4 sm:$0xff]  }
  0x34   :  { %228 = vmatpush1.bf16.msra.mxu0 %v2749_v8  ;;  %v59_v46 = vpack.c.bf16 %v54_v42, %v53_v41  ;;  %v3134_v48 = vld [vmem:[#allocation2 + $0x120] ss:$12 sps:$4 sm:$0xff]   ;;  %v3137_v49 = vld [vmem:[#allocation2 + $0x13c] ss:$12 sps:$4 sm:$0xff]   ;;  %v55_v51 = vld [vmem:[%s3897_s0 + $0x30] sm:$0xff]  ;;  %vm3032_vm1 = vmmov 0  }
  0x35   :  { %229 = vmatprep.subr.bf16.mxu0 %v2750_v11  ;;  %v3144_v52 = vld [vmem:[#allocation2 + $0x188] ss:$12 sps:$4 sm:$0xff]   ;;  %v369_v55 = vmul.f32 0.0, %v3131_v47  ;;  %v3157_v57 = vld [vmem:[#allocation2 + $0x1a0] ss:$12 sps:$4 sm:$0xff]   ;;  %v60_v60 = vpack.c.bf16 %v56_v54, %v55_v51  ;;  %vm1997_vm2 = vcmask 1040384  }
  0x36   :  { %2451 = vmatpush3.bf16.msra.mxu1 %v2788_v21  ;;  %3937 = vst [vmem:[#allocation9_spill] sm:$0xff] %v3144_v52  ;;  %v3146_v53 = vld [vmem:[#allocation2 + $0x154] ss:$12 sps:$4 sm:$0xff]   ;;  %v3159_v58 = vld [vmem:[#allocation2 + $0x150] ss:$12 sps:$4 sm:$0xff]   ;;  %vm2104_vm3 = vcmask 1041408  }
  0x37   :  { %2452 = vmatprep.subr.bf16.mxu1 %v2792_v24  ;;  %v3153_v56 = vld [vmem:[#allocation2 + $0xc8] ss:$12 sps:$4 sm:$0xff]   ;;  %v3162_v59 = vld [vmem:[#allocation2 + $0x16c] ss:$12 sps:$4 sm:$0xff]   ;;  %v371_v63 = vpack.c.bf16 %v369_v55, %v369_v55  ;;  %v3179_v2 = vld [vmem:[#allocation2 + $0x184] ss:$12 sps:$4 sm:$0xff]  }
  0x38   :  { %230 = vmatpush1.bf16.msra.mxu0 %v2752_v13  ;;  %v3166_v61 = vld [vmem:[#allocation2 + $0xe0] ss:$12 sps:$4 sm:$0xff]   ;;  %v3170_v62 = vld [vmem:[#allocation2 + $0x1b8] ss:$12 sps:$4 sm:$0xff]   ;;  %v3182_v3 = vld [vmem:[#allocation2 + $0x1d0] ss:$12 sps:$4 sm:$0xff]  }
  0x39   :  { %231 = vmatprep.subr.bf16.mxu0 %v2753_v14  ;;  %v3176_v1 = vld [vmem:[#allocation2 + $0xf8] ss:$12 sps:$4 sm:$0xff]   ;;  %v3185_v4 = vld [vmem:[#allocation2 + $0x180] ss:$12 sps:$4 sm:$0xff]   ;;  %v3188_v5 = vld [vmem:[#allocation2 + $0x110] ss:$12 sps:$4 sm:$0xff]  }
  0x3a   :  { %2453 = vmatpush3.bf16.msra.mxu1 %v2792_v24  ;;  %v3191_v6 = vld [vmem:[#allocation2 + $0x19c] ss:$12 sps:$4 sm:$0xff]   ;;  %v3197_v8 = vld [vmem:[#allocation2 + $0x198] ss:$12 sps:$4 sm:$0xff]   ;;  %v3203_v10 = vld [vmem:[#allocation2 + $0x1b4] ss:$12 sps:$4 sm:$0xff]  }
  0x3b   :  { %2454 = vmatprep.subr.bf16.mxu1 %v2796_v28  ;;  %v3194_v7 = vld [vmem:[#allocation2 + $0x1e8] ss:$12 sps:$4 sm:$0xff]   ;;  %v3206_v11 = vld [vmem:[#allocation2 + $0x200] ss:$12 sps:$4 sm:$0xff]   ;;  %v3224_v17 = vld [vmem:[#allocation2 + $0x158] ss:$12 sps:$4 sm:$0xff]  }
  0x3c   :  { %232 = vmatpush1.bf16.msra.mxu0 %v2755_v15  ;;  %v3200_v9 = vld [vmem:[#allocation2 + $0x128] ss:$12 sps:$4 sm:$0xff]   ;;  %v3212_v13 = vld [vmem:[#allocation2 + $0x140] ss:$12 sps:$4 sm:$0xff]   ;;  %v3218_v15 = vld [vmem:[#allocation2 + $0x218] ss:$12 sps:$4 sm:$0xff]  }
  0x3d   :  { %233 = vmatprep.subr.bf16.mxu0 %v2756_v16  ;;  %v3215_v14 = vld [vmem:[#allocation2 + $0x1cc] ss:$12 sps:$4 sm:$0xff]   ;;  %v3221_v16 = vld [vmem:[#allocation2 + $0x1c8] ss:$12 sps:$4 sm:$0xff]   ;;  %v3227_v18 = vld [vmem:[#allocation2 + $0x1e4] ss:$12 sps:$4 sm:$0xff]  }
  0x3e   :  { %2455 = vmatpush3.bf16.msra.mxu1 %v2796_v28  ;;  %3938 = vst [vmem:[#allocation10_spill] sm:$0xff] %v3215_v14  ;;  %3939 = vst [vmem:[#allocation11_spill] sm:$0xff] %v3221_v16  ;;  %v3236_v21 = vld [vmem:[#allocation2 + $0x170] ss:$12 sps:$4 sm:$0xff]   ;;  %v368_v24 = vmul.f32 0.0, %v3126_v44 }
  0x3f   :  { %2456 = vmatprep.subr.bf16.mxu1 %v2800_v34  ;;  %3940 = vst [vmem:[#allocation12_spill] sm:$0xff] %v3227_v18  ;;  %v3244_v26 = vld [vmem:[#allocation2 + $0x1f8] ss:$12 sps:$4 sm:$0xff]   ;;  %v3248_v28 = vld [vmem:[#allocation2 + $0x214] ss:$12 sps:$4 sm:$0xff]  }
  0x40   :  { %234 = vmatpush1.bf16.msra.mxu0 %v2758_v19  ;;  %v3230_v19 = vld [vmem:[#allocation2 + $0x230] ss:$12 sps:$4 sm:$0xff]   ;;  %3943 = vst [vmem:[#allocation15_spill] sm:$0xff] %v3244_v26  ;;  %3944 = vst [vmem:[#allocation16_spill] sm:$0xff] %v3248_v28  ;;  %v370_v30 = vpack.c.bf16 %v368_v24, %v368_v24 }
  0x41   :  { %235 = vmatprep.subr.bf16.mxu0 %v2759_v20  ;;  %v3233_v20 = vld [vmem:[#allocation2 + $0x1e0] ss:$12 sps:$4 sm:$0xff]   ;;  %v3252_v31 = vld [vmem:[#allocation2 + $0x210] ss:$12 sps:$4 sm:$0xff]  }
  0x42   :  { %2457 = vmatpush3.bf16.msra.mxu1 %v2800_v34  ;;  %3941 = vst [vmem:[#allocation13_spill] sm:$0xff] %v3233_v20  ;;  %3945 = vst [vmem:[#allocation17_spill] sm:$0xff] %v3252_v31  ;;  %v3256_v34 = vld [vmem:[#allocation2 + $0x22c] ss:$12 sps:$4 sm:$0xff]  }
  0x43   :  { %2458 = vmatprep.subr.bf16.mxu1 %v2804_v39  ;;  %3946 = vst [vmem:[#allocation18_spill] sm:$0xff] %v3256_v34 }
  0x44   :  { %236 = vmatpush1.bf16.msra.mxu0 %v2761_v22  ;;  %v3239_v22 = vld [vmem:[#allocation2 + $0x1fc] ss:$12 sps:$4 sm:$0xff]  }
  0x45   :  { %692 = vmatprep.subr.bf16.mxu0 %v3085_v23  ;;  %3942 = vst [vmem:[#allocation14_spill] sm:$0xff] %v3239_v22 }
  0x46   :  { %2459 = vmatpush3.bf16.msra.mxu1 %v2804_v39  ;;  %v43_v39 = vld [vmem:[#allocation4 + $0x480] sm:$0xff] }
  0x47   :  { %254 = vmatmul.mubr.bf16.vlgmr.msra.gmra.mrb[0].mxu0 %v57_v12  ;;  %2460 = vmatprep.subr.bf16.mxu1 %v2808_v45  ;;  %v3209_v12 = vld [vmem:[#allocation2 + $0x1b0] ss:$12 sps:$4 sm:$0xff]  }
  0x48   :  { %693 = vmatpush1.bf16.msra.mxu0 %v3087_v25  ;;  %263 = vmatprep.mubr.bf16.mxu0 %v3029_v0 }
  0x49   :  { %694 = vmatprep.subr.bf16.mxu0 %v3090_v27 }
  0x4a   :  { %2461 = vmatpush3.bf16.msra.mxu1 %v2808_v45 }
  0x4b   :  { %2218 = vmatprep.subr.bf16.mxu1 %v3144_v52 }
  0x4c   :  { %695 = vmatpush1.bf16.msra.mxu0 %v3092_v29 }
  0x4d   :  { %696 = vmatprep.subr.bf16.mxu0 %v3104_v33  ;;  %2463 = vmatmul.mubr.bf16.vlgmr.msra.gmra.mrb[0].mxu1 %v58_v35 }
  0x4e   :  { %2219 = vmatpush3.bf16.msra.mxu1 %v3153_v56  ;;  %2466 = vmatprep.mubr.bf16.mxu1 %v59_v46 }
  0x4f   :  { %264 = vmatmul.mubr.bf16.gmra.mrb[4].mxu0 %v58_v35  ;;  %2220 = vmatprep.subr.bf16.mxu1 %v3157_v57  ;;  %v3260_v35 = vld [vmem:[#allocation2 + $0x228] ss:$12 sps:$4 sm:$0xff]  }
  0x50   :  { %697 = vmatpush1.bf16.msra.mxu0 %v3108_v36  ;;  %273 = vmatprep.mubr.bf16.mxu0 %v3029_v0  ;;  %3947 = vst [vmem:[#allocation19_spill] sm:$0xff] %v3260_v35 }
  0x51   :  { %698 = vmatprep.subr.bf16.mxu0 %v3112_v37 }
  0x52   :  { %2221 = vmatpush3.bf16.msra.mxu1 %v3166_v61 }
  0x53   :  { %2222 = vmatprep.subr.bf16.mxu1 %v3170_v62 }
  0x54   :  { %699 = vmatpush1.bf16.msra.mxu0 %v3114_v38 }
  0x55   :  { %700 = vmatprep.subr.bf16.mxu0 %v3116_v40  ;;  %2467 = vmatmul.mubr.bf16.gmra.mrb[4].mxu1 %v60_v60 }
  0x56   :  { %2223 = vmatpush3.bf16.msra.mxu1 %v3176_v1  ;;  %765 = vmatprep.mubr.bf16.mxu1 %v371_v63 }
  0x57   :  { %274 = vmatmul.mubr.bf16.gmra.mrb[8].mxu0 %v59_v46  ;;  %2224 = vmatprep.subr.bf16.mxu1 %v3182_v3  ;;  %v44_v46 = vld [vmem:[#allocation4 + $0x488] sm:$0xff] }
  0x58   :  { %701 = vmatpush1.bf16.msra.mxu0 %v3134_v48  ;;  %283 = vmatprep.mubr.bf16.mxu0 %v3029_v0  ;;  %v3173_v0 = vld [vmem:[#allocation2 + $0x168] ss:$12 sps:$4 sm:$0xff]  }
  0x59   :  { %702 = vmatprep.subr.bf16.mxu0 %v3137_v49 }
  0x5a   :  { %2225 = vmatpush3.bf16.msra.mxu1 %v3188_v5 }
  0x5b   :  { %2226 = vmatprep.subr.bf16.mxu1 %v3194_v7 }
  0x5c   :  { %703 = vmatpush1.bf16.msra.mxu0 %v3139_v50 }
  0x5d   :  { %704 = vmatprep.subr.bf16.mxu0 %v3146_v53 }
  0x5e   :  { %2227 = vmatpush3.bf16.msra.mxu1 %v3200_v9 }
  0x5f   :  { %284 = vmatmul.mubr.bf16.gmra.mrb[12].mxu0 %v60_v60  ;;  %2228 = vmatprep.subr.bf16.mxu1 %v3206_v11 }
  0x60   :  { %705 = vmatpush1.bf16.msra.mxu0 %v3159_v58  ;;  %724 = vmatprep.mubr.bf16.mxu0 %v371_v63 }
  0x61   :  { %706 = vmatprep.subr.bf16.mxu0 %v3162_v59 }
  0x62   :  { %2229 = vmatpush3.bf16.msra.mxu1 %v3212_v13 }
  0x63   :  { %2230 = vmatprep.subr.bf16.mxu1 %v3218_v15 }
  0x64   :  { %707 = vmatpush1.bf16.msra.mxu0 %v3173_v0 }
  0x65   :  { %708 = vmatprep.subr.bf16.mxu0 %v3179_v2 }
  0x66   :  { %2231 = vmatpush3.bf16.msra.mxu1 %v3224_v17 }
  0x67   :  { %2232 = vmatprep.subr.bf16.mxu1 %v3230_v19 }
  0x68   :  { %709 = vmatpush1.bf16.msra.mxu0 %v3185_v4 }
  0x69   :  { %710 = vmatprep.subr.bf16.mxu0 %v3191_v6 }
  0x6a   :  { %2233 = vmatpush3.bf16.msra.mxu1 %v3236_v21 }
  0x6b   :  { %801 = vmatprep.subr.bf16.mxu1 %v3085_v23 }
  0x6c   :  { %711 = vmatpush1.bf16.msra.mxu0 %v3197_v8 }
  0x6d   :  { %712 = vmatprep.subr.bf16.mxu0 %v3203_v10  ;;  %766 = vmatmul.mubr.bf16.vlgmr.msra.gmra.mrb[8].mxu1 %v370_v30 }
  0x6e   :  { %802 = vmatpush1.bf16.msra.mxu1 %v3087_v25 }
  0x6f   :  { %803 = vmatprep.subr.bf16.mxu1 %v3090_v27 }
  0x70   :  { %713 = vmatpush1.bf16.msra.mxu0 %v3209_v12 }
  0x71   :  { %714 = vmatprep.subr.bf16.mxu0 %v3215_v14 }
  0x72   :  { %804 = vmatpush1.bf16.msra.mxu1 %v3092_v29 }
  0x73   :  { %805 = vmatprep.subr.bf16.mxu1 %v3104_v33 }
  0x74   :  { %715 = vmatpush1.bf16.msra.mxu0 %v3221_v16 }
  0x75   :  { %716 = vmatprep.subr.bf16.mxu0 %v3227_v18 }
  0x76   :  { %806 = vmatpush1.bf16.msra.mxu1 %v3108_v36 }
  0x77   :  { %807 = vmatprep.subr.bf16.mxu1 %v3112_v37 }
  0x78   :  { %717 = vmatpush1.bf16.msra.mxu0 %v3233_v20 }
  0x79   :  { %718 = vmatprep.subr.bf16.mxu0 %v3239_v22 }
  0x7a   :  { %808 = vmatpush1.bf16.msra.mxu1 %v3114_v38 }
  0x7b   :  { %809 = vmatprep.subr.bf16.mxu1 %v3116_v40 }
  0x7c   :  { %719 = vmatpush1.bf16.msra.mxu0 %v3244_v26 }
  0x7d   :  { %720 = vmatprep.subr.bf16.mxu0 %v3248_v28 }
  0x7e   :  { %810 = vmatpush1.bf16.msra.mxu1 %v3134_v48 }
  0x7f   :  { %811 = vmatprep.subr.bf16.mxu1 %v3137_v49 }
  0x80   :  { %721 = vmatpush1.bf16.msra.mxu0 %v3252_v31 }
  0x81   :  { %722 = vmatprep.subr.bf16.mxu0 %v3256_v34 }
  0x82   :  { %812 = vmatpush1.bf16.msra.mxu1 %v3139_v50 }
  0x83   :  { %813 = vmatprep.subr.bf16.mxu1 %v3146_v53 }
  0x84   :  { %723 = vmatpush1.bf16.msra.mxu0 %v3260_v35 }
  0x85   :  { %2240 = vmatprep.subr.bf16.mxu0 %v3144_v52 }
  0x86   :  { %814 = vmatpush1.bf16.msra.mxu1 %v3159_v58 }
  0x87   :  { %725 = vmatmul.mubr.bf16.vlgmr.msra.gmra.mrb[16].mxu0 %v370_v30  ;;  %815 = vmatprep.subr.bf16.mxu1 %v3162_v59 }
  0x88   :  { %2241 = vmatpush3.bf16.msra.mxu0 %v3153_v56 }
  0x89   :  { %2242 = vmatprep.subr.bf16.mxu0 %v3157_v57 }
  0x8a   :  { %816 = vmatpush1.bf16.msra.mxu1 %v3173_v0 }
  0x8b   :  { %817 = vmatprep.subr.bf16.mxu1 %v3179_v2 }
  0x8c   :  { %2243 = vmatpush3.bf16.msra.mxu0 %v3166_v61 }
  0x8d   :  { %2244 = vmatprep.subr.bf16.mxu0 %v3170_v62 }
  0x8e   :  { %818 = vmatpush1.bf16.msra.mxu1 %v3185_v4 }
  0x8f   :  { %819 = vmatprep.subr.bf16.mxu1 %v3191_v6 }
  0x90   :  { %2245 = vmatpush3.bf16.msra.mxu0 %v3176_v1 }
  0x91   :  { %2246 = vmatprep.subr.bf16.mxu0 %v3182_v3 }
  0x92   :  { %820 = vmatpush1.bf16.msra.mxu1 %v3197_v8 }
  0x93   :  { %821 = vmatprep.subr.bf16.mxu1 %v3203_v10 }
  0x94   :  { %2247 = vmatpush3.bf16.msra.mxu0 %v3188_v5 }
  0x95   :  { %2248 = vmatprep.subr.bf16.mxu0 %v3194_v7 }
  0x96   :  { %822 = vmatpush1.bf16.msra.mxu1 %v3209_v12 }
  0x97   :  { %823 = vmatprep.subr.bf16.mxu1 %v3215_v14  ;;  %v3359_v14 = vld [vmem:[#allocation4 + $0x4a8] sm:$0xff] }
  0x98   :  { %2249 = vmatpush3.bf16.msra.mxu0 %v3200_v9 }
  0x99   :  { %2250 = vmatprep.subr.bf16.mxu0 %v3206_v11 }
  0x9a   :  { %824 = vmatpush1.bf16.msra.mxu1 %v3221_v16 }
  0x9b   :  { %825 = vmatprep.subr.bf16.mxu1 %v3227_v18 }
  0x9c   :  { %2251 = vmatpush3.bf16.msra.mxu0 %v3212_v13 }
  0x9d   :  { %2252 = vmatprep.subr.bf16.mxu0 %v3218_v15 }
  0x9e   :  { %826 = vmatpush1.bf16.msra.mxu1 %v3233_v20  ;;  %v3353_v20 = vld [vmem:[#allocation4 + $0x498] sm:$0xff] }
  0x9f   :  { %827 = vmatprep.subr.bf16.mxu1 %v3239_v22  ;;  %3969 = vst [vmem:[#allocation41_spill] sm:$0xff] %v3353_v20 }
  0xa0   :  { %2253 = vmatpush3.bf16.msra.mxu0 %v3224_v17 }
  0xa1   :  { %2254 = vmatprep.subr.bf16.mxu0 %v3230_v19 }
  0xa2   :  { %828 = vmatpush1.bf16.msra.mxu1 %v3244_v26 }
  0xa3   :  { %829 = vmatprep.subr.bf16.mxu1 %v3248_v28 }
  0xa4   :  { %2255 = vmatpush3.bf16.msra.mxu0 %v3236_v21 }
  0xa5   :  { %910 = vmatprep.subr.bf16.mxu0 %v3085_v23 }
  0xa6   :  { %830 = vmatpush1.bf16.msra.mxu1 %v3252_v31 }
  0xa7   :  { %831 = vmatprep.subr.bf16.mxu1 %v3256_v34 }
  0xaa   :  { %832 = vmatpush1.bf16.msra.mxu1 %v3260_v35 }
  0xab   :  { %2262 = vmatprep.subr.bf16.mxu1 %v3144_v52 }
 0x11a   :  { %v255_v41 = vpop.f32.mrb[0].mxu0 }
 0x11b   :  { %v257_v42 = vpop.f32.mrb[1].mxu0 }
 0x11c   :  { %v259_v45 = vpop.f32.mrb[2].mxu0 }
 0x11d   :  { %v3311_v51 = vadd.f32 %v259_v45, %v43_v39  ;;  %v261_v54 = vpop.f32.mrb[3].mxu0 }
 0x11e   :  { %v3313_v55 = vadd.f32 %v261_v54, %v44_v46 }
 0x11f   :  { %3948 = vst [vmem:[#allocation20_spill] sm:$0xff] %v3311_v51 }
 0x120   :  { %3949 = vst [vmem:[#allocation21_spill] sm:$0xff] %v3313_v55  ;;  %v45_v55 = vld [vmem:[#allocation4 + $0x490] sm:$0xff] }
 0x122   :  { %v265_v60 = vpop.f32.mrb[4].mxu0 }
 0x123   :  { %v3315_v63 = vadd.f32 %v265_v60, %v43_v39  ;;  %v267_v24 = vpop.f32.mrb[5].mxu0 }
 0x124   :  { %v3317_v30 = vadd.f32 %v267_v24, %v44_v46  ;;  %v269_v43 = vpop.f32.mrb[6].mxu0  ;;  %v2464_v24 = vpop.f32.mrb[0].mxu1 }
 0x125   :  { %3950 = vst [vmem:[#allocation22_spill] sm:$0xff] %v3315_v63  ;;  %v3319_v32 = vadd.f32 %v269_v43, %v43_v39  ;;  %v271_v52 = vpop.f32.mrb[7].mxu0  ;;  %v328_v43 = vpop.f32.mrb[1].mxu1 }
 0x126   :  { %3951 = vst [vmem:[#allocation23_spill] sm:$0xff] %v3317_v30  ;;  %v3321_v35 = vadd.f32 %v271_v52, %v44_v46  ;;  %v3331_v30 = vadd.f32 %v2464_v24, %v45_v55 }
 0x127   :  { %3952 = vst [vmem:[#allocation24_spill] sm:$0xff] %v3319_v32  ;;  %v2465_v32 = vpop.f32.mrb[2].mxu1 }
 0x128   :  { %3953 = vst [vmem:[#allocation25_spill] sm:$0xff] %v3321_v35  ;;  %3958 = vst [vmem:[#allocation30_spill] sm:$0xff] %v3331_v30  ;;  %v3333_v52 = vadd.f32 %v2465_v32, %v45_v55  ;;  %v331_v35 = vpop.f32.mrb[3].mxu1 }
 0x129   :  { %v2468_v24 = vpop.f32.mrb[4].mxu1 }
 0x12a   :  { %v275_v34 = vpop.f32.mrb[8].mxu0  ;;  %3959 = vst [vmem:[#allocation31_spill] sm:$0xff] %v3333_v52  ;;  %v3345_v30 = vadd.f32 %v2468_v24, %v45_v55  ;;  %v344_v32 = vpop.f32.mrb[5].mxu1 }
 0x12b   :  { %v3323_v31 = vadd.f32 %v275_v34, %v43_v39  ;;  %v277_v45 = vpop.f32.mrb[9].mxu0  ;;  %v3347_v52 = vadd.f32 %v344_v32, %v45_v55  ;;  %v2469_v22 = vpop.f32.mrb[6].mxu1 }
 0x12c   :  { %v3325_v51 = vadd.f32 %v277_v45, %v44_v46  ;;  %v279_v54 = vpop.f32.mrb[10].mxu0  ;;  %3965 = vst [vmem:[#allocation37_spill] sm:$0xff] %v3345_v30 }
 0x12d   :  { %3954 = vst [vmem:[#allocation26_spill] sm:$0xff] %v3323_v31  ;;  %v3327_v28 = vadd.f32 %v279_v54, %v43_v39  ;;  %v281_v60 = vpop.f32.mrb[11].mxu0  ;;  %v3335_v31 = vadd.f32 %v331_v35, %v45_v55  ;;  %3966 = vst [vmem:[#allocation38_spill] sm:$0xff] %v3347_v52  ;;  %v3349_v35 = vadd.f32 %v2469_v22, %v45_v55 }
 0x12e   :  { %3955 = vst [vmem:[#allocation27_spill] sm:$0xff] %v3325_v51  ;;  %v3329_v63 = vadd.f32 %v281_v60, %v44_v46  ;;  %v366_v52 = vadd.f32 %v257_v42, %v44_v46 }
 0x12f   :  { %3956 = vst [vmem:[#allocation28_spill] sm:$0xff] %v3327_v28  ;;  %3960 = vst [vmem:[#allocation32_spill] sm:$0xff] %v3335_v31 }
 0x130   :  { %3957 = vst [vmem:[#allocation29_spill] sm:$0xff] %v3329_v63  ;;  %3967 = vst [vmem:[#allocation39_spill] sm:$0xff] %v3349_v35 }
 0x132   :  { %v285_v34 = vpop.f32.mrb[12].mxu0 }
 0x133   :  { %v3337_v45 = vadd.f32 %v285_v34, %v43_v39  ;;  %v287_v51 = vpop.f32.mrb[13].mxu0  ;;  %v347_v34 = vpop.f32.mrb[7].mxu1 }
 0x134   :  { %v3339_v26 = vadd.f32 %v287_v51, %v44_v46  ;;  %v289_v54 = vpop.f32.mrb[14].mxu0 }
 0x135   :  { %3961 = vst [vmem:[#allocation33_spill] sm:$0xff] %v3337_v45  ;;  %v3341_v28 = vadd.f32 %v289_v54, %v43_v39  ;;  %v291_v60 = vpop.f32.mrb[15].mxu0  ;;  %v3351_v45 = vadd.f32 %v347_v34, %v45_v55 }
 0x136   :  { %3962 = vst [vmem:[#allocation34_spill] sm:$0xff] %v3339_v26  ;;  %v3343_v63 = vadd.f32 %v291_v60, %v44_v46  ;;  %v3355_v60 = vld [vmem:[#allocation4 + $0x4a0] sm:$0xff]  ;;  %v367_v46 = vadd.f32 %v328_v43, %v45_v55  ;;  %v3970_v55 = vld [vmem:[#allocation10_spill] sm:$0xff] }
 0x137   :  { %3963 = vst [vmem:[#allocation35_spill] sm:$0xff] %v3341_v28  ;;  %3968 = vst [vmem:[#allocation40_spill] sm:$0xff] %v3351_v45  ;;  %v3971_v43 = vld [vmem:[#allocation11_spill] sm:$0xff] }
 0x138   :  { %3964 = vst [vmem:[#allocation36_spill] sm:$0xff] %v3343_v63  ;;  %v365_v63 = vadd.f32 %v255_v41, %v43_v39 }
 0x140   :  { %v2234_v51 = vpop.f32.mrb[8].mxu1 }
 0x141   :  { %v2235_v26 = vpop.f32.mrb[9].mxu1 }
 0x142   :  { %v2236_v31 = vadd.f32 %v2235_v26, %v2234_v51  ;;  %v2237_v54 = vpop.f32.mrb[10].mxu1 }
 0x143   :  { %v2238_v28 = vpop.f32.mrb[11].mxu1 }
 0x144   :  { %v768_v41 = vadd.f32 %v2236_v31, %v3359_v14 }
 0x15a   :  { %v726_v24 = vpop.f32.mrb[16].mxu0 }
 0x15b   :  { %v727_v32 = vadd.f32 %v726_v24, %v3353_v20  ;;  %v728_v30 = vpop.f32.mrb[17].mxu0 }
 0x15c   :  { %v729_v22 = vadd.f32 %v728_v30, %v3355_v60  ;;  %v730_v35 = vpop.f32.mrb[18].mxu0 }
 0x15d   :  { %v773_v34 = vadd.f32 %v727_v32, %v365_v63  ;;  %v731_v45 = vpop.f32.mrb[19].mxu0 }
 0x15e   :  { %v780_v18 = vadd.f32 %v729_v22, %v366_v52 }
 0x15f   :  { %v2187_v16 = vmul.f32 -1.442695, %v773_v34 }
 0x160   :  { %v2188_v26 = vmul.f32 -1.442695, %v780_v18 }
 0x161   :  { %2834 = vpow2.f32 %v2187_v16 }
 0x162   :  { %2836 = vpow2.f32 %v2188_v26  ;;  %v3972_v26 = vld [vmem:[#allocation12_spill] sm:$0xff] }
 0x16b   :  { %v2835_v28 = vpop.eup %2834 }
 0x16c   :  { %v777_v51 = vadd.f32 1.0, %v2835_v28  ;;  %v2837_v54 = vpop.eup %2836  ;;  %v3973_v28 = vld [vmem:[#allocation13_spill] sm:$0xff] }
 0x16d   :  { %v784_v39 = vadd.f32 1.0, %v2837_v54  ;;  %v3975_v54 = vld [vmem:[#allocation15_spill] sm:$0xff] }
 0x16e   :  { %2838 = vrcp.f32 %v777_v51  ;;  %v3974_v51 = vld [vmem:[#allocation14_spill] sm:$0xff] }
 0x16f   :  { %2840 = vrcp.f32 %v784_v39  ;;  %v3976_v39 = vld [vmem:[#allocation16_spill] sm:$0xff] }
 0x178   :  { %v2839_v42 = vpop.eup %2838 }
 0x179   :  { %v787_v30 = vmul.f32 %v2839_v42, %v768_v41  ;;  %v2841_v52 = vpop.eup %2840  ;;  %v3977_v41 = vld [vmem:[#allocation17_spill] sm:$0xff]  ;;  %v3978_v42 = vld [vmem:[#allocation18_spill] sm:$0xff] }
 0x17a   :  { %v790_v45 = vsub.f32 1.0, %v2841_v52  ;;  %v792_v35 = vmul.f32 0.0, %v2841_v52 }
 0x17b   :  { %v788_v63 = vadd.f32 %v787_v30, %v367_v46  ;;  %v3979_v46 = vld [vmem:[#allocation19_spill] sm:$0xff]  ;;  %v3980_v30 = vld [vmem:[#allocation9_spill] sm:$0xff] }
 0x17d   :  { %2842 = vtanh.f32 %v788_v63 }
 0x187   :  { %v2843_v16 = vpop.eup %2842 }
 0x188   :  { %v791_v18 = vmul.f32 %v2843_v16, %v790_v45 }
 0x18a   :  { %v3362_v24 = vadd.f32 %v792_v35, %v791_v18 }
 0x18c   :  { %v798_v32 = vmul.f32 %v3362_v24, %v3131_v47  ;;  %v797_v22 = vmul.f32 %v3126_v44, %v3362_v24 }
 0x18e   :  { %v800_v31 = vpack.c.bf16 %v798_v32, %v798_v32  ;;  %v799_v34 = vpack.c.bf16 %v797_v22, %v797_v22 }
 0x190   :  { %833 = vmatprep.mubr.bf16.mxu1 %v800_v31  ;;  %874 = vmatprep.mubr.bf16.mxu0 %v800_v31 }
 0x191   :  { %834 = vmatmul.mubr.bf16.vlgmr.msra.gmra.mrb[12].mxu1 %v799_v34  ;;  %875 = vmatmul.mubr.bf16.vlgmr.msra.gmra.mrb[20].mxu0 %v799_v34  ;;  %v3981_v34 = vld [vmem:[#allocation20_spill] sm:$0xff] }
 0x192   :  { %911 = vmatpush1.bf16.msra.mxu0 %v3087_v25  ;;  %2263 = vmatpush3.bf16.msra.mxu1 %v3153_v56 }
 0x193   :  { %912 = vmatprep.subr.bf16.mxu0 %v3090_v27  ;;  %2264 = vmatprep.subr.bf16.mxu1 %v3157_v57 }
 0x196   :  { %913 = vmatpush1.bf16.msra.mxu0 %v3092_v29  ;;  %2265 = vmatpush3.bf16.msra.mxu1 %v3166_v61 }
 0x197   :  { %914 = vmatprep.subr.bf16.mxu0 %v3104_v33  ;;  %2266 = vmatprep.subr.bf16.mxu1 %v3170_v62 }
 0x19a   :  { %915 = vmatpush1.bf16.msra.mxu0 %v3108_v36  ;;  %2267 = vmatpush3.bf16.msra.mxu1 %v3176_v1 }
 0x19b   :  { %916 = vmatprep.subr.bf16.mxu0 %v3112_v37  ;;  %2268 = vmatprep.subr.bf16.mxu1 %v3182_v3 }
 0x19e   :  { %917 = vmatpush1.bf16.msra.mxu0 %v3114_v38  ;;  %2269 = vmatpush3.bf16.msra.mxu1 %v3188_v5 }
 0x19f   :  { %918 = vmatprep.subr.bf16.mxu0 %v3116_v40  ;;  %2270 = vmatprep.subr.bf16.mxu1 %v3194_v7 }
 0x1a2   :  { %919 = vmatpush1.bf16.msra.mxu0 %v3134_v48  ;;  %2271 = vmatpush3.bf16.msra.mxu1 %v3200_v9 }
 0x1a3   :  { %920 = vmatprep.subr.bf16.mxu0 %v3137_v49  ;;  %2272 = vmatprep.subr.bf16.mxu1 %v3206_v11 }
 0x1a6   :  { %921 = vmatpush1.bf16.msra.mxu0 %v3139_v50  ;;  %2273 = vmatpush3.bf16.msra.mxu1 %v3212_v13 }
 0x1a7   :  { %922 = vmatprep.subr.bf16.mxu0 %v3146_v53  ;;  %2274 = vmatprep.subr.bf16.mxu1 %v3218_v15 }
 0x1aa   :  { %923 = vmatpush1.bf16.msra.mxu0 %v3159_v58  ;;  %2275 = vmatpush3.bf16.msra.mxu1 %v3224_v17 }
 0x1ab   :  { %924 = vmatprep.subr.bf16.mxu0 %v3162_v59  ;;  %2276 = vmatprep.subr.bf16.mxu1 %v3230_v19 }
 0x1ae   :  { %925 = vmatpush1.bf16.msra.mxu0 %v3173_v0  ;;  %2277 = vmatpush3.bf16.msra.mxu1 %v3236_v21 }
 0x1af   :  { %926 = vmatprep.subr.bf16.mxu0 %v3179_v2  ;;  %1019 = vmatprep.subr.bf16.mxu1 %v3085_v23 }
 0x1b2   :  { %927 = vmatpush1.bf16.msra.mxu0 %v3185_v4 }
 0x1b3   :  { %928 = vmatprep.subr.bf16.mxu0 %v3191_v6 }
 0x1b6   :  { %929 = vmatpush1.bf16.msra.mxu0 %v3197_v8 }
 0x1b7   :  { %930 = vmatprep.subr.bf16.mxu0 %v3203_v10 }
 0x1ba   :  { %931 = vmatpush1.bf16.msra.mxu0 %v3209_v12 }
 0x1bb   :  { %932 = vmatprep.subr.bf16.mxu0 %v3970_v55 }
 0x1be   :  { %933 = vmatpush1.bf16.msra.mxu0 %v3971_v43 }
 0x1bf   :  { %934 = vmatprep.subr.bf16.mxu0 %v3972_v26 }
 0x1c2   :  { %935 = vmatpush1.bf16.msra.mxu0 %v3973_v28 }
 0x1c3   :  { %936 = vmatprep.subr.bf16.mxu0 %v3974_v51 }
 0x1c6   :  { %937 = vmatpush1.bf16.msra.mxu0 %v3975_v54 }
 0x1c7   :  { %938 = vmatprep.subr.bf16.mxu0 %v3976_v39 }
 0x1ca   :  { %939 = vmatpush1.bf16.msra.mxu0 %v3977_v41 }
 0x1cb   :  { %940 = vmatprep.subr.bf16.mxu0 %v3978_v42  ;;  %v3982_v42 = vld [vmem:[#allocation21_spill] sm:$0xff] }
 0x1ce   :  { %941 = vmatpush1.bf16.msra.mxu0 %v3979_v46 }
 0x1cf   :  { %2284 = vmatprep.subr.bf16.mxu0 %v3980_v30 }
 0x264   :  { %v835_v63 = vpop.f32.mrb[12].mxu1  ;;  %v2256_v52 = vpop.f32.mrb[20].mxu0 }
 0x265   :  { %v836_v45 = vadd.f32 %v835_v63, %v3353_v20  ;;  %v837_v16 = vpop.f32.mrb[13].mxu1  ;;  %v2257_v18 = vpop.f32.mrb[21].mxu0 }
 0x266   :  { %v838_v35 = vadd.f32 %v837_v16, %v3355_v60  ;;  %v2258_v32 = vadd.f32 %v2257_v18, %v2256_v52  ;;  %v839_v22 = vpop.f32.mrb[14].mxu1  ;;  %v2259_v31 = vpop.f32.mrb[22].mxu0 }
 0x267   :  { %v882_v39 = vadd.f32 %v836_v45, %v3981_v34  ;;  %v840_v41 = vpop.f32.mrb[15].mxu1  ;;  %v2260_v54 = vpop.f32.mrb[23].mxu0  ;;  %v3983_v22 = vld [vmem:[#allocation32_spill] sm:$0xff]  ;;  %v3990_v31 = vld [vmem:[#allocation18_spill] sm:$0xff]  ;;  %v3991_v34 = vld [vmem:[#allocation19_spill] sm:$0xff] }
 0x268   :  { %v889_v51 = vadd.f32 %v838_v35, %v3982_v42  ;;  %v877_v16 = vadd.f32 %v2258_v32, %v3359_v14  ;;  %v3988_v35 = vld [vmem:[#allocation16_spill] sm:$0xff]  ;;  %v3989_v32 = vld [vmem:[#allocation17_spill] sm:$0xff] }
 0x269   :  { %v2189_v46 = vmul.f32 -1.442695, %v882_v39 }
 0x26a   :  { %v2190_v30 = vmul.f32 -1.442695, %v889_v51 }
 0x26b   :  { %2844 = vpow2.f32 %v2189_v46 }
 0x26c   :  { %2846 = vpow2.f32 %v2190_v30 }
 0x275   :  { %v2845_v28 = vpop.eup %2844 }
 0x276   :  { %v886_v26 = vadd.f32 1.0, %v2845_v28  ;;  %v2847_v63 = vpop.eup %2846 }
 0x277   :  { %v893_v20 = vadd.f32 1.0, %v2847_v63  ;;  %v3992_v63 = vld [vmem:[#allocation9_spill] sm:$0xff] }
 0x278   :  { %2848 = vrcp.f32 %v886_v26 }
 0x279   :  { %2850 = vrcp.f32 %v893_v20 }
 0x282   :  { %v2849_v52 = vpop.eup %2848 }
 0x283   :  { %v896_v18 = vmul.f32 %v2849_v52, %v877_v16  ;;  %v2851_v54 = vpop.eup %2850 }
 0x284   :  { %v899_v41 = vsub.f32 1.0, %v2851_v54  ;;  %v901_v51 = vmul.f32 %v2851_v54, %v3362_v24  ;;  %v3986_v24 = vld [vmem:[#allocation14_spill] sm:$0xff] }
 0x285   :  { %v897_v45 = vadd.f32 %v896_v18, %v3983_v22  ;;  %v3993_v18 = vld [vmem:[#allocation41_spill] sm:$0xff] }
 0x287   :  { %2852 = vtanh.f32 %v897_v45 }
 0x291   :  { %v2853_v42 = vpop.eup %2852 }
 0x292   :  { %v900_v39 = vmul.f32 %v2853_v42, %v899_v41 }
 0x294   :  { %v3423_v46 = vadd.f32 %v901_v51, %v900_v39 }
 0x296   :  { %v907_v26 = vmul.f32 %v3423_v46, %v3131_v47  ;;  %v906_v28 = vmul.f32 %v3126_v44, %v3423_v46 }
 0x298   :  { %v909_v30 = vpack.c.bf16 %v907_v26, %v907_v26  ;;  %v908_v20 = vpack.c.bf16 %v906_v28, %v906_v28  ;;  %v3994_v26 = vld [vmem:[#allocation22_spill] sm:$0xff] }
 0x29a   :  { %942 = vmatprep.mubr.bf16.mxu0 %v909_v30  ;;  %983 = vmatprep.mubr.bf16.mxu1 %v909_v30 }
 0x29b   :  { %943 = vmatmul.mubr.bf16.vlgmr.msra.gmra.mrb[24].mxu0 %v908_v20  ;;  %984 = vmatmul.mubr.bf16.vlgmr.msra.gmra.mrb[16].mxu1 %v908_v20 }
 0x29c   :  { %1020 = vmatpush1.bf16.msra.mxu1 %v3087_v25  ;;  %2285 = vmatpush3.bf16.msra.mxu0 %v3153_v56  ;;  %v3984_v25 = vld [vmem:[#allocation12_spill] sm:$0xff] }
 0x29d   :  { %1021 = vmatprep.subr.bf16.mxu1 %v3090_v27  ;;  %2286 = vmatprep.subr.bf16.mxu0 %v3157_v57  ;;  %v3985_v27 = vld [vmem:[#allocation13_spill] sm:$0xff] }
 0x2a0   :  { %1022 = vmatpush1.bf16.msra.mxu1 %v3092_v29  ;;  %2287 = vmatpush3.bf16.msra.mxu0 %v3166_v61 }
 0x2a1   :  { %1023 = vmatprep.subr.bf16.mxu1 %v3104_v33  ;;  %2288 = vmatprep.subr.bf16.mxu0 %v3170_v62 }
 0x2a4   :  { %1024 = vmatpush1.bf16.msra.mxu1 %v3108_v36  ;;  %2289 = vmatpush3.bf16.msra.mxu0 %v3176_v1 }
 0x2a5   :  { %1025 = vmatprep.subr.bf16.mxu1 %v3112_v37  ;;  %2290 = vmatprep.subr.bf16.mxu0 %v3182_v3 }
 0x2a8   :  { %1026 = vmatpush1.bf16.msra.mxu1 %v3114_v38  ;;  %2291 = vmatpush3.bf16.msra.mxu0 %v3188_v5 }
 0x2a9   :  { %1027 = vmatprep.subr.bf16.mxu1 %v3116_v40  ;;  %2292 = vmatprep.subr.bf16.mxu0 %v3194_v7 }
 0x2ac   :  { %1028 = vmatpush1.bf16.msra.mxu1 %v3134_v48  ;;  %2293 = vmatpush3.bf16.msra.mxu0 %v3200_v9 }
 0x2ad   :  { %1029 = vmatprep.subr.bf16.mxu1 %v3137_v49  ;;  %2294 = vmatprep.subr.bf16.mxu0 %v3206_v11 }
 0x2b0   :  { %1030 = vmatpush1.bf16.msra.mxu1 %v3139_v50  ;;  %2295 = vmatpush3.bf16.msra.mxu0 %v3212_v13 }
 0x2b1   :  { %1031 = vmatprep.subr.bf16.mxu1 %v3146_v53  ;;  %2296 = vmatprep.subr.bf16.mxu0 %v3218_v15 }
 0x2b4   :  { %1032 = vmatpush1.bf16.msra.mxu1 %v3159_v58  ;;  %2297 = vmatpush3.bf16.msra.mxu0 %v3224_v17 }
 0x2b5   :  { %1033 = vmatprep.subr.bf16.mxu1 %v3162_v59  ;;  %2298 = vmatprep.subr.bf16.mxu0 %v3230_v19 }
 0x2b8   :  { %1034 = vmatpush1.bf16.msra.mxu1 %v3173_v0  ;;  %2299 = vmatpush3.bf16.msra.mxu0 %v3236_v21 }
 0x2b9   :  { %1035 = vmatprep.subr.bf16.mxu1 %v3179_v2  ;;  %1128 = vmatprep.subr.bf16.mxu0 %v3085_v23  ;;  %v3987_v23 = vld [vmem:[#allocation15_spill] sm:$0xff] }
 0x2bc   :  { %1036 = vmatpush1.bf16.msra.mxu1 %v3185_v4 }
 0x2bd   :  { %1037 = vmatprep.subr.bf16.mxu1 %v3191_v6 }
 0x2c0   :  { %1038 = vmatpush1.bf16.msra.mxu1 %v3197_v8 }
 0x2c1   :  { %1039 = vmatprep.subr.bf16.mxu1 %v3203_v10 }
 0x2c4   :  { %1040 = vmatpush1.bf16.msra.mxu1 %v3209_v12 }
 0x2c5   :  { %1041 = vmatprep.subr.bf16.mxu1 %v3970_v55 }
 0x2c8   :  { %1042 = vmatpush1.bf16.msra.mxu1 %v3971_v43 }
 0x2c9   :  { %1043 = vmatprep.subr.bf16.mxu1 %v3984_v25 }
 0x2cc   :  { %1044 = vmatpush1.bf16.msra.mxu1 %v3985_v27 }
 0x2cd   :  { %1045 = vmatprep.subr.bf16.mxu1 %v3986_v24 }
 0x2d0   :  { %1046 = vmatpush1.bf16.msra.mxu1 %v3987_v23 }
 0x2d1   :  { %1047 = vmatprep.subr.bf16.mxu1 %v3988_v35 }
 0x2d4   :  { %1048 = vmatpush1.bf16.msra.mxu1 %v3989_v32 }
 0x2d5   :  { %1049 = vmatprep.subr.bf16.mxu1 %v3990_v31  ;;  %v3995_v31 = vld [vmem:[#allocation23_spill] sm:$0xff] }
 0x2d8   :  { %1050 = vmatpush1.bf16.msra.mxu1 %v3991_v34 }
 0x2d9   :  { %2306 = vmatprep.subr.bf16.mxu1 %v3992_v63 }
 0x36e   :  { %v944_v16 = vpop.f32.mrb[24].mxu0  ;;  %v2278_v52 = vpop.f32.mrb[16].mxu1 }
 0x36f   :  { %v945_v22 = vadd.f32 %v944_v16, %v3993_v18  ;;  %v946_v45 = vpop.f32.mrb[25].mxu0  ;;  %v2279_v54 = vpop.f32.mrb[17].mxu1 }
 0x370   :  { %v947_v41 = vadd.f32 %v946_v45, %v3355_v60  ;;  %v2280_v42 = vadd.f32 %v2279_v54, %v2278_v52  ;;  %v948_v39 = vpop.f32.mrb[26].mxu0  ;;  %v2281_v51 = vpop.f32.mrb[18].mxu1 }
 0x371   :  { %v991_v28 = vadd.f32 %v945_v22, %v3994_v26  ;;  %v949_v30 = vpop.f32.mrb[27].mxu0  ;;  %v2282_v20 = vpop.f32.mrb[19].mxu1  ;;  %v3996_v39 = vld [vmem:[#allocation30_spill] sm:$0xff] }
 0x372   :  { %v998_v32 = vadd.f32 %v947_v41, %v3995_v31  ;;  %v986_v45 = vadd.f32 %v2280_v42, %v3359_v14  ;;  %v3490_v42 = vld [vmem:[#allocation2 + $0xc0] ss:$12 sps:$4 sm:$0xff]  }
 0x373   :  { %v2191_v34 = vmul.f32 -1.442695, %v991_v28 }
 0x374   :  { %v2192_v63 = vmul.f32 -1.442695, %v998_v32 }
 0x375   :  { %2854 = vpow2.f32 %v2191_v34 }
 0x376   :  { %2856 = vpow2.f32 %v2192_v63 }
 0x37f   :  { %v2855_v35 = vpop.eup %2854 }
 0x380   :  { %v995_v23 = vadd.f32 1.0, %v2855_v35  ;;  %v2857_v16 = vpop.eup %2856 }
 0x381   :  { %v1002_v18 = vadd.f32 1.0, %v2857_v16  ;;  %v4004_v16 = vld [vmem:[#allocation24_spill] sm:$0xff] }
 0x382   :  { %2858 = vrcp.f32 %v995_v23 }
 0x383   :  { %2860 = vrcp.f32 %v1002_v18 }
 0x38c   :  { %v2859_v52 = vpop.eup %2858 }
 0x38d   :  { %v1005_v54 = vmul.f32 %v2859_v52, %v986_v45  ;;  %v2861_v51 = vpop.eup %2860 }
 0x38e   :  { %v1008_v26 = vsub.f32 1.0, %v2861_v51  ;;  %v1010_v32 = vmul.f32 %v2861_v51, %v3423_v46  ;;  %v3494_v46 = vld [vmem:[#allocation2 + $0xdc] ss:$12 sps:$4 sm:$0xff]  }
 0x38f   :  { %v1006_v22 = vadd.f32 %v1005_v54, %v3996_v39  ;;  %v4005_v39 = vld [vmem:[#allocation25_spill] sm:$0xff] }
 0x391   :  { %2862 = vtanh.f32 %v1006_v22 }
 0x39b   :  { %v2863_v31 = vpop.eup %2862 }
 0x39c   :  { %v1009_v41 = vmul.f32 %v2863_v31, %v1008_v26 }
 0x39e   :  { %v3484_v34 = vadd.f32 %v1010_v32, %v1009_v41 }
 0x3a0   :  { %v1016_v23 = vmul.f32 %v3484_v34, %v3131_v47  ;;  %v1015_v35 = vmul.f32 %v3126_v44, %v3484_v34 }
 0x3a2   :  { %v1018_v63 = vpack.c.bf16 %v1016_v23, %v1016_v23  ;;  %v1017_v18 = vpack.c.bf16 %v1015_v35, %v1015_v35 }
 0x3a4   :  { %1051 = vmatprep.mubr.bf16.mxu1 %v1018_v63  ;;  %1092 = vmatprep.mubr.bf16.mxu0 %v1018_v63 }
 0x3a5   :  { %1052 = vmatmul.mubr.bf16.vlgmr.msra.gmra.mrb[20].mxu1 %v1017_v18  ;;  %1093 = vmatmul.mubr.bf16.vlgmr.msra.gmra.mrb[28].mxu0 %v1017_v18 }
 0x3a6   :  { %1129 = vmatpush1.bf16.msra.mxu0 %v3490_v42  ;;  %2307 = vmatpush3.bf16.msra.mxu1 %v3153_v56 }
 0x3a7   :  { %1130 = vmatprep.subr.bf16.mxu0 %v3494_v46  ;;  %2308 = vmatprep.subr.bf16.mxu1 %v3157_v57 }
 0x3aa   :  { %1131 = vmatpush1.bf16.msra.mxu0 %v3092_v29  ;;  %2309 = vmatpush3.bf16.msra.mxu1 %v3166_v61  ;;  %v3525_v29 = vld [vmem:[#allocation2 + $0xc4] ss:$12 sps:$4 sm:$0xff]  }
 0x3ab   :  { %1132 = vmatprep.subr.bf16.mxu0 %v3104_v33  ;;  %2310 = vmatprep.subr.bf16.mxu1 %v3170_v62  ;;  %v3997_v33 = vld [vmem:[#allocation15_spill] sm:$0xff] }
 0x3ae   :  { %1133 = vmatpush1.bf16.msra.mxu0 %v3108_v36  ;;  %2311 = vmatpush3.bf16.msra.mxu1 %v3176_v1  ;;  %v3998_v36 = vld [vmem:[#allocation16_spill] sm:$0xff] }
 0x3af   :  { %1134 = vmatprep.subr.bf16.mxu0 %v3112_v37  ;;  %2312 = vmatprep.subr.bf16.mxu1 %v3182_v3  ;;  %v3999_v37 = vld [vmem:[#allocation17_spill] sm:$0xff] }
 0x3b2   :  { %1135 = vmatpush1.bf16.msra.mxu0 %v3114_v38  ;;  %2313 = vmatpush3.bf16.msra.mxu1 %v3188_v5  ;;  %v4000_v38 = vld [vmem:[#allocation18_spill] sm:$0xff] }
 0x3b3   :  { %1136 = vmatprep.subr.bf16.mxu0 %v3116_v40  ;;  %2314 = vmatprep.subr.bf16.mxu1 %v3194_v7  ;;  %v4001_v40 = vld [vmem:[#allocation19_spill] sm:$0xff] }
 0x3b6   :  { %1137 = vmatpush1.bf16.msra.mxu0 %v3134_v48  ;;  %2315 = vmatpush3.bf16.msra.mxu1 %v3200_v9  ;;  %v4002_v48 = vld [vmem:[#allocation9_spill] sm:$0xff] }
 0x3b7   :  { %1138 = vmatprep.subr.bf16.mxu0 %v3137_v49  ;;  %2316 = vmatprep.subr.bf16.mxu1 %v3206_v11 }
 0x3ba   :  { %1139 = vmatpush1.bf16.msra.mxu0 %v3139_v50  ;;  %2317 = vmatpush3.bf16.msra.mxu1 %v3212_v13 }
 0x3bb   :  { %1140 = vmatprep.subr.bf16.mxu0 %v3146_v53  ;;  %2318 = vmatprep.subr.bf16.mxu1 %v3218_v15  ;;  %v4003_v53 = vld [vmem:[#allocation41_spill] sm:$0xff] }
 0x3be   :  { %1141 = vmatpush1.bf16.msra.mxu0 %v3159_v58  ;;  %2319 = vmatpush3.bf16.msra.mxu1 %v3224_v17 }
 0x3bf   :  { %1142 = vmatprep.subr.bf16.mxu0 %v3162_v59  ;;  %2320 = vmatprep.subr.bf16.mxu1 %v3230_v19 }
 0x3c2   :  { %1143 = vmatpush1.bf16.msra.mxu0 %v3173_v0  ;;  %2321 = vmatpush3.bf16.msra.mxu1 %v3236_v21 }
 0x3c3   :  { %1144 = vmatprep.subr.bf16.mxu0 %v3179_v2  ;;  %1237 = vmatprep.subr.bf16.mxu1 %v3525_v29 }
 0x3c6   :  { %1145 = vmatpush1.bf16.msra.mxu0 %v3185_v4 }
 0x3c7   :  { %1146 = vmatprep.subr.bf16.mxu0 %v3191_v6 }
 0x3ca   :  { %1147 = vmatpush1.bf16.msra.mxu0 %v3197_v8 }
 0x3cb   :  { %1148 = vmatprep.subr.bf16.mxu0 %v3203_v10 }
 0x3ce   :  { %1149 = vmatpush1.bf16.msra.mxu0 %v3209_v12 }
 0x3cf   :  { %1150 = vmatprep.subr.bf16.mxu0 %v3970_v55 }
 0x3d2   :  { %1151 = vmatpush1.bf16.msra.mxu0 %v3971_v43 }
 0x3d3   :  { %1152 = vmatprep.subr.bf16.mxu0 %v3984_v25 }
 0x3d6   :  { %1153 = vmatpush1.bf16.msra.mxu0 %v3985_v27 }
 0x3d7   :  { %1154 = vmatprep.subr.bf16.mxu0 %v3986_v24 }
 0x3da   :  { %1155 = vmatpush1.bf16.msra.mxu0 %v3997_v33 }
 0x3db   :  { %1156 = vmatprep.subr.bf16.mxu0 %v3998_v36 }
 0x3de   :  { %1157 = vmatpush1.bf16.msra.mxu0 %v3999_v37 }
 0x3df   :  { %1158 = vmatprep.subr.bf16.mxu0 %v4000_v38 }
 0x3e2   :  { %1159 = vmatpush1.bf16.msra.mxu0 %v4001_v40 }
 0x3e3   :  { %2328 = vmatprep.subr.bf16.mxu0 %v4002_v48  ;;  %v4006_v48 = vld [vmem:[#allocation31_spill] sm:$0xff] }
 0x478   :  { %v1053_v49 = vpop.f32.mrb[20].mxu1  ;;  %v2300_v50 = vpop.f32.mrb[28].mxu0 }
 0x479   :  { %v1054_v56 = vadd.f32 %v1053_v49, %v4003_v53  ;;  %v1055_v57 = vpop.f32.mrb[21].mxu1  ;;  %v2301_v58 = vpop.f32.mrb[29].mxu0 }
 0x47a   :  { %v1056_v59 = vadd.f32 %v1055_v57, %v3355_v60  ;;  %v2302_v28 = vadd.f32 %v2301_v58, %v2300_v50  ;;  %v1057_v30 = vpop.f32.mrb[22].mxu1  ;;  %v2303_v20 = vpop.f32.mrb[30].mxu0 }
 0x47b   :  { %v1100_v45 = vadd.f32 %v1054_v56, %v4004_v16  ;;  %v1058_v52 = vpop.f32.mrb[23].mxu1  ;;  %v2304_v54 = vpop.f32.mrb[31].mxu0 }
 0x47c   :  { %v1107_v22 = vadd.f32 %v1056_v59, %v4005_v39  ;;  %v1095_v35 = vadd.f32 %v2302_v28, %v3359_v14  ;;  %v3558_v52 = vld [vmem:[#allocation2 + $0xc8] ss:$12 sps:$4 sm:$0xff]   ;;  %v3565_v54 = vld [vmem:[#allocation2 + $0xd8] ss:$12 sps:$4 sm:$0xff]  }
 0x47d   :  { %v2193_v51 = vmul.f32 -1.442695, %v1100_v45  ;;  %v3569_v39 = vld [vmem:[#allocation2 + $0xf4] ss:$12 sps:$4 sm:$0xff]  }
 0x47e   :  { %v2194_v26 = vmul.f32 -1.442695, %v1107_v22  ;;  %v3573_v22 = vld [vmem:[#allocation2 + $0xf0] ss:$12 sps:$4 sm:$0xff]  }
 0x47f   :  { %2864 = vpow2.f32 %v2193_v51  ;;  %v3577_v51 = vld [vmem:[#allocation2 + $0x10c] ss:$12 sps:$4 sm:$0xff]  }
 0x480   :  { %2866 = vpow2.f32 %v2194_v26  ;;  %v3581_v26 = vld [vmem:[#allocation2 + $0x108] ss:$12 sps:$4 sm:$0xff]  }
 0x489   :  { %v2865_v31 = vpop.eup %2864 }
 0x48a   :  { %v1104_v41 = vadd.f32 1.0, %v2865_v31  ;;  %v2867_v32 = vpop.eup %2866 }
 0x48b   :  { %v1111_v23 = vadd.f32 1.0, %v2867_v32  ;;  %v4009_v32 = vld [vmem:[#allocation38_spill] sm:$0xff] }
 0x48c   :  { %2868 = vrcp.f32 %v1104_v41 }
 0x48d   :  { %2870 = vrcp.f32 %v1111_v23 }
 0x496   :  { %v2869_v63 = vpop.eup %2868 }
 0x497   :  { %v1114_v18 = vmul.f32 %v2869_v63, %v1095_v35  ;;  %v2871_v50 = vpop.eup %2870 }
 0x498   :  { %v1117_v56 = vsub.f32 1.0, %v2871_v50  ;;  %v1119_v59 = vmul.f32 %v2871_v50, %v3484_v34  ;;  %v3562_v34 = vld [vmem:[#allocation2 + $0x1a0] ss:$12 sps:$4 sm:$0xff]  }
 0x499   :  { %v1115_v49 = vadd.f32 %v1114_v18, %v4006_v48 }
 0x49b   :  { %2872 = vtanh.f32 %v1115_v49 }
 0x4a5   :  { %v2873_v57 = vpop.eup %2872 }
 0x4a6   :  { %v1118_v58 = vmul.f32 %v2873_v57, %v1117_v56 }
 0x4a8   :  { %v3551_v30 = vadd.f32 %v1119_v59, %v1118_v58 }
 0x4aa   :  { %v1125_v20 = vmul.f32 %v3551_v30, %v3131_v47  ;;  %v1124_v28 = vmul.f32 %v3126_v44, %v3551_v30 }
 0x4ac   :  { %v1127_v16 = vpack.c.bf16 %v1125_v20, %v1125_v20  ;;  %v1126_v45 = vpack.c.bf16 %v1124_v28, %v1124_v28  ;;  %v3657_v20 = vld [vmem:[#allocation2 + $0x1b8] ss:$12 sps:$4 sm:$0xff]  }
 0x4ad   :  { %v3661_v28 = vld [vmem:[#allocation2 + $0xf8] ss:$12 sps:$4 sm:$0xff]  }
 0x4ae   :  { %1160 = vmatprep.mubr.bf16.mxu0 %v1127_v16  ;;  %1201 = vmatprep.mubr.bf16.mxu1 %v1127_v16  ;;  %v3665_v16 = vld [vmem:[#allocation2 + $0x1d0] ss:$12 sps:$4 sm:$0xff]  }
 0x4af   :  { %1161 = vmatmul.mubr.bf16.vlgmr.msra.gmra.mrb[32].mxu0 %v1126_v45  ;;  %1202 = vmatmul.mubr.bf16.vlgmr.msra.gmra.mrb[24].mxu1 %v1126_v45  ;;  %v3669_v45 = vld [vmem:[#allocation2 + $0x110] ss:$12 sps:$4 sm:$0xff]  }
 0x4b0   :  { %1238 = vmatpush1.bf16.msra.mxu1 %v3490_v42  ;;  %2329 = vmatpush3.bf16.msra.mxu0 %v3558_v52 }
 0x4b1   :  { %1239 = vmatprep.subr.bf16.mxu1 %v3494_v46  ;;  %2330 = vmatprep.subr.bf16.mxu0 %v3562_v34 }
 0x4b4   :  { %1240 = vmatpush1.bf16.msra.mxu1 %v3565_v54  ;;  %2331 = vmatpush3.bf16.msra.mxu0 %v3166_v61  ;;  %v3585_v61 = vld [vmem:[#allocation2 + $0x124] ss:$12 sps:$4 sm:$0xff]  }
 0x4b5   :  { %1241 = vmatprep.subr.bf16.mxu1 %v3569_v39  ;;  %2332 = vmatprep.subr.bf16.mxu0 %v3170_v62  ;;  %v3589_v62 = vld [vmem:[#allocation2 + $0x120] ss:$12 sps:$4 sm:$0xff]  }
 0x4b8   :  { %1242 = vmatpush1.bf16.msra.mxu1 %v3573_v22  ;;  %2333 = vmatpush3.bf16.msra.mxu0 %v3176_v1  ;;  %v3593_v1 = vld [vmem:[#allocation2 + $0x13c] ss:$12 sps:$4 sm:$0xff]  }
 0x4b9   :  { %1243 = vmatprep.subr.bf16.mxu1 %v3577_v51  ;;  %2334 = vmatprep.subr.bf16.mxu0 %v3182_v3  ;;  %v3597_v3 = vld [vmem:[#allocation2 + $0x138] ss:$12 sps:$4 sm:$0xff]  }
 0x4bc   :  { %1244 = vmatpush1.bf16.msra.mxu1 %v3581_v26  ;;  %2335 = vmatpush3.bf16.msra.mxu0 %v3188_v5  ;;  %v3601_v5 = vld [vmem:[#allocation2 + $0x154] ss:$12 sps:$4 sm:$0xff]  }
 0x4bd   :  { %1245 = vmatprep.subr.bf16.mxu1 %v3585_v61  ;;  %2336 = vmatprep.subr.bf16.mxu0 %v3194_v7  ;;  %v3605_v7 = vld [vmem:[#allocation2 + $0x150] ss:$12 sps:$4 sm:$0xff]  }
 0x4c0   :  { %1246 = vmatpush1.bf16.msra.mxu1 %v3589_v62  ;;  %2337 = vmatpush3.bf16.msra.mxu0 %v3200_v9  ;;  %v3609_v9 = vld [vmem:[#allocation2 + $0x16c] ss:$12 sps:$4 sm:$0xff]  }
 0x4c1   :  { %1247 = vmatprep.subr.bf16.mxu1 %v3593_v1  ;;  %2338 = vmatprep.subr.bf16.mxu0 %v3206_v11 }
 0x4c4   :  { %1248 = vmatpush1.bf16.msra.mxu1 %v3597_v3  ;;  %2339 = vmatpush3.bf16.msra.mxu0 %v3212_v13 }
 0x4c5   :  { %1249 = vmatprep.subr.bf16.mxu1 %v3601_v5  ;;  %2340 = vmatprep.subr.bf16.mxu0 %v3218_v15 }
 0x4c8   :  { %1250 = vmatpush1.bf16.msra.mxu1 %v3605_v7  ;;  %2341 = vmatpush3.bf16.msra.mxu0 %v3224_v17  ;;  %v4007_v17 = vld [vmem:[#allocation26_spill] sm:$0xff] }
 0x4c9   :  { %1251 = vmatprep.subr.bf16.mxu1 %v3609_v9  ;;  %2342 = vmatprep.subr.bf16.mxu0 %v3230_v19 }
 0x4cc   :  { %1252 = vmatpush1.bf16.msra.mxu1 %v3173_v0  ;;  %2343 = vmatpush3.bf16.msra.mxu0 %v3236_v21  ;;  %v3632_v0 = vld [vmem:[#allocation2 + $0x188] ss:$12 sps:$4 sm:$0xff]  }
 0x4cd   :  { %1253 = vmatprep.subr.bf16.mxu1 %v3179_v2  ;;  %1346 = vmatprep.subr.bf16.mxu0 %v3525_v29 }
 0x4d0   :  { %1254 = vmatpush1.bf16.msra.mxu1 %v3185_v4 }
 0x4d1   :  { %1255 = vmatprep.subr.bf16.mxu1 %v3191_v6 }
 0x4d4   :  { %1256 = vmatpush1.bf16.msra.mxu1 %v3197_v8 }
 0x4d5   :  { %1257 = vmatprep.subr.bf16.mxu1 %v3203_v10 }
 0x4d8   :  { %1258 = vmatpush1.bf16.msra.mxu1 %v3209_v12 }
 0x4d9   :  { %1259 = vmatprep.subr.bf16.mxu1 %v3970_v55 }
 0x4dc   :  { %1260 = vmatpush1.bf16.msra.mxu1 %v3971_v43  ;;  %v4008_v43 = vld [vmem:[#allocation27_spill] sm:$0xff] }
 0x4dd   :  { %1261 = vmatprep.subr.bf16.mxu1 %v3984_v25 }
 0x4e0   :  { %1262 = vmatpush1.bf16.msra.mxu1 %v3985_v27 }
 0x4e1   :  { %1263 = vmatprep.subr.bf16.mxu1 %v3986_v24 }
 0x4e4   :  { %1264 = vmatpush1.bf16.msra.mxu1 %v3997_v33 }
 0x4e5   :  { %1265 = vmatprep.subr.bf16.mxu1 %v3998_v36 }
 0x4e8   :  { %1266 = vmatpush1.bf16.msra.mxu1 %v3999_v37 }
 0x4e9   :  { %1267 = vmatprep.subr.bf16.mxu1 %v4000_v38 }
 0x4ec   :  { %1268 = vmatpush1.bf16.msra.mxu1 %v4001_v40 }
 0x4ed   :  { %2350 = vmatprep.subr.bf16.mxu1 %v3632_v0 }
 0x582   :  { %v1162_v2 = vpop.f32.mrb[32].mxu0  ;;  %v2322_v4 = vpop.f32.mrb[24].mxu1 }
 0x583   :  { %v1163_v6 = vadd.f32 %v1162_v2, %v4003_v53  ;;  %v1164_v8 = vpop.f32.mrb[33].mxu0  ;;  %v2323_v10 = vpop.f32.mrb[25].mxu1  ;;  %v3673_v2 = vld [vmem:[#allocation2 + $0x1e8] ss:$12 sps:$4 sm:$0xff]  }
 0x584   :  { %v1165_v11 = vadd.f32 %v1164_v8, %v3355_v60  ;;  %v2324_v12 = vadd.f32 %v2323_v10, %v2322_v4  ;;  %v1166_v13 = vpop.f32.mrb[34].mxu0  ;;  %v2325_v15 = vpop.f32.mrb[26].mxu1  ;;  %v3677_v4 = vld [vmem:[#allocation2 + $0x128] ss:$12 sps:$4 sm:$0xff]   ;;  %v3685_v8 = vld [vmem:[#allocation2 + $0x140] ss:$12 sps:$4 sm:$0xff]  }
 0x585   :  { %v1209_v19 = vadd.f32 %v1163_v6, %v4007_v17  ;;  %v1167_v21 = vpop.f32.mrb[35].mxu0  ;;  %v2326_v55 = vpop.f32.mrb[27].mxu1  ;;  %v3681_v6 = vld [vmem:[#allocation2 + $0x200] ss:$12 sps:$4 sm:$0xff]   ;;  %v3689_v10 = vld [vmem:[#allocation2 + $0x218] ss:$12 sps:$4 sm:$0xff]  }
 0x586   :  { %v1216_v25 = vadd.f32 %v1165_v11, %v4008_v43  ;;  %v1204_v40 = vadd.f32 %v2324_v12, %v3359_v14  ;;  %v3693_v11 = vld [vmem:[#allocation2 + $0x158] ss:$12 sps:$4 sm:$0xff]   ;;  %v3697_v12 = vld [vmem:[#allocation2 + $0x230] ss:$12 sps:$4 sm:$0xff]   ;;  %v3700_v13 = vld [vmem:[#allocation2 + $0x168] ss:$12 sps:$4 sm:$0xff]  }
 0x587   :  { %v2195_v27 = vmul.f32 -1.442695, %v1209_v19  ;;  %v3703_v15 = vld [vmem:[#allocation2 + $0x170] ss:$12 sps:$4 sm:$0xff]   ;;  %v3710_v19 = vld [vmem:[#allocation2 + $0x180] ss:$12 sps:$4 sm:$0xff]  }
 0x588   :  { %v2196_v24 = vmul.f32 -1.442695, %v1216_v25  ;;  %v3706_v17 = vld [vmem:[#allocation2 + $0x184] ss:$12 sps:$4 sm:$0xff]   ;;  %v3713_v21 = vld [vmem:[#allocation2 + $0x19c] ss:$12 sps:$4 sm:$0xff]  }
 0x589   :  { %2874 = vpow2.f32 %v2195_v27  ;;  %v3716_v55 = vld [vmem:[#allocation2 + $0x198] ss:$12 sps:$4 sm:$0xff]   ;;  %v3719_v43 = vld [vmem:[#allocation2 + $0x1b4] ss:$12 sps:$4 sm:$0xff]   ;;  %v3722_v25 = vld [vmem:[#allocation2 + $0x1b0] ss:$12 sps:$4 sm:$0xff]  }
 0x58a   :  { %2876 = vpow2.f32 %v2196_v24  ;;  %v3728_v27 = vld [vmem:[#allocation2 + $0x1c8] ss:$12 sps:$4 sm:$0xff]   ;;  %v3731_v24 = vld [vmem:[#allocation2 + $0x1e4] ss:$12 sps:$4 sm:$0xff]  }
 0x593   :  { %v2875_v33 = vpop.eup %2874 }
 0x594   :  { %v1213_v36 = vadd.f32 1.0, %v2875_v33  ;;  %v2877_v37 = vpop.eup %2876  ;;  %v3734_v33 = vld [vmem:[#allocation2 + $0x1e0] ss:$12 sps:$4 sm:$0xff]  }
 0x595   :  { %v1220_v38 = vadd.f32 1.0, %v2877_v37  ;;  %4010 = vst [vmem:[#allocation10_spill] sm:$0xff] %v3734_v33  ;;  %v3740_v37 = vld [vmem:[#allocation2 + $0x1f8] ss:$12 sps:$4 sm:$0xff]  }
 0x596   :  { %2878 = vrcp.f32 %v1213_v36  ;;  %v3737_v36 = vld [vmem:[#allocation2 + $0x1fc] ss:$12 sps:$4 sm:$0xff]   ;;  %4012 = vst [vmem:[#allocation20_spill] sm:$0xff] %v3740_v37 }
 0x597   :  { %2880 = vrcp.f32 %v1220_v38  ;;  %4011 = vst [vmem:[#allocation11_spill] sm:$0xff] %v3737_v36  ;;  %v3743_v38 = vld [vmem:[#allocation2 + $0x214] ss:$12 sps:$4 sm:$0xff]  }
 0x598   :  { %4013 = vst [vmem:[#allocation21_spill] sm:$0xff] %v3743_v38 }
 0x5a0   :  { %v2879_v31 = vpop.eup %2878 }
 0x5a1   :  { %v1223_v41 = vmul.f32 %v2879_v31, %v1204_v40  ;;  %v2881_v35 = vpop.eup %2880  ;;  %v3746_v40 = vld [vmem:[#allocation2 + $0x210] ss:$12 sps:$4 sm:$0xff]   ;;  %v3749_v31 = vld [vmem:[#allocation2 + $0x22c] ss:$12 sps:$4 sm:$0xff]  }
 0x5a2   :  { %v1226_v63 = vsub.f32 1.0, %v2881_v35  ;;  %v1228_v49 = vmul.f32 %v2881_v35, %v3551_v30  ;;  %v3653_v30 = vld [vmem:[#allocation2 + $0xe0] ss:$12 sps:$4 sm:$0xff]   ;;  %4014 = vst [vmem:[#allocation32_spill] sm:$0xff] %v3746_v40  ;;  %4015 = vst [vmem:[#allocation12_spill] sm:$0xff] %v3749_v31 }
 0x5a3   :  { %v1224_v23 = vadd.f32 %v1223_v41, %v4009_v32  ;;  %v3752_v41 = vld [vmem:[#allocation2 + $0x228] ss:$12 sps:$4 sm:$0xff]  }
 0x5a4   :  { %4016 = vst [vmem:[#allocation13_spill] sm:$0xff] %v3752_v41 }
 0x5a5   :  { %2882 = vtanh.f32 %v1224_v23 }
 0x5af   :  { %v2883_v18 = vpop.eup %2882 }
 0x5b0   :  { %v1227_v48 = vmul.f32 %v2883_v18, %v1226_v63 }
 0x5b2   :  { %v3642_v50 = vadd.f32 %v1228_v49, %v1227_v48 }
 0x5b4   :  { %v1234_v56 = vmul.f32 %v3642_v50, %v3131_v47  ;;  %v1233_v57 = vmul.f32 %v3126_v44, %v3642_v50 }
 0x5b6   :  { %v1236_v58 = vpack.c.bf16 %v1234_v56, %v1234_v56  ;;  %v1235_v59 = vpack.c.bf16 %v1233_v57, %v1233_v57 }
 0x5b8   :  { %1269 = vmatprep.mubr.bf16.mxu1 %v1236_v58  ;;  %1310 = vmatprep.mubr.bf16.mxu0 %v1236_v58  ;;  %v4017_v58 = vld [vmem:[#allocation28_spill] sm:$0xff] }
 0x5b9   :  { %1270 = vmatmul.mubr.bf16.vlgmr.msra.gmra.mrb[28].mxu1 %v1235_v59  ;;  %1311 = vmatmul.mubr.bf16.vlgmr.msra.gmra.mrb[36].mxu0 %v1235_v59 }
 0x5ba   :  { %1347 = vmatpush1.bf16.msra.mxu0 %v3490_v42  ;;  %2351 = vmatpush3.bf16.msra.mxu1 %v3558_v52 }
 0x5bb   :  { %1348 = vmatprep.subr.bf16.mxu0 %v3494_v46  ;;  %2352 = vmatprep.subr.bf16.mxu1 %v3562_v34 }
 0x5be   :  { %1349 = vmatpush1.bf16.msra.mxu0 %v3565_v54  ;;  %2353 = vmatpush3.bf16.msra.mxu1 %v3653_v30 }
 0x5bf   :  { %1350 = vmatprep.subr.bf16.mxu0 %v3569_v39  ;;  %2354 = vmatprep.subr.bf16.mxu1 %v3657_v20 }
 0x5c2   :  { %1351 = vmatpush1.bf16.msra.mxu0 %v3573_v22  ;;  %2355 = vmatpush3.bf16.msra.mxu1 %v3661_v28 }
 0x5c3   :  { %1352 = vmatprep.subr.bf16.mxu0 %v3577_v51  ;;  %2356 = vmatprep.subr.bf16.mxu1 %v3665_v16 }
 0x5c6   :  { %1353 = vmatpush1.bf16.msra.mxu0 %v3581_v26  ;;  %2357 = vmatpush3.bf16.msra.mxu1 %v3669_v45 }
 0x5c7   :  { %1354 = vmatprep.subr.bf16.mxu0 %v3585_v61  ;;  %2358 = vmatprep.subr.bf16.mxu1 %v3673_v2 }
 0x5ca   :  { %1355 = vmatpush1.bf16.msra.mxu0 %v3589_v62  ;;  %2359 = vmatpush3.bf16.msra.mxu1 %v3677_v4 }
 0x5cb   :  { %1356 = vmatprep.subr.bf16.mxu0 %v3593_v1  ;;  %2360 = vmatprep.subr.bf16.mxu1 %v3681_v6 }
 0x5ce   :  { %1357 = vmatpush1.bf16.msra.mxu0 %v3597_v3  ;;  %2361 = vmatpush3.bf16.msra.mxu1 %v3685_v8 }
 0x5cf   :  { %1358 = vmatprep.subr.bf16.mxu0 %v3601_v5  ;;  %2362 = vmatprep.subr.bf16.mxu1 %v3689_v10 }
 0x5d2   :  { %1359 = vmatpush1.bf16.msra.mxu0 %v3605_v7  ;;  %2363 = vmatpush3.bf16.msra.mxu1 %v3693_v11 }
 0x5d3   :  { %1360 = vmatprep.subr.bf16.mxu0 %v3609_v9  ;;  %2364 = vmatprep.subr.bf16.mxu1 %v3697_v12 }
 0x5d6   :  { %1361 = vmatpush1.bf16.msra.mxu0 %v3700_v13  ;;  %2365 = vmatpush3.bf16.msra.mxu1 %v3703_v15 }
 0x5d7   :  { %1362 = vmatprep.subr.bf16.mxu0 %v3706_v17  ;;  %1457 = vmatprep.subr.bf16.mxu1 %v3525_v29  ;;  %v3725_v29 = vld [vmem:[#allocation2 + $0x1cc] ss:$12 sps:$4 sm:$0xff]  }
 0x5da   :  { %1363 = vmatpush1.bf16.msra.mxu0 %v3710_v19 }
 0x5db   :  { %1364 = vmatprep.subr.bf16.mxu0 %v3713_v21 }
 0x5de   :  { %1365 = vmatpush1.bf16.msra.mxu0 %v3716_v55 }
 0x5df   :  { %1366 = vmatprep.subr.bf16.mxu0 %v3719_v43 }
 0x5e2   :  { %1367 = vmatpush1.bf16.msra.mxu0 %v3722_v25 }
 0x5e3   :  { %1368 = vmatprep.subr.bf16.mxu0 %v3725_v29 }
 0x5e6   :  { %1369 = vmatpush1.bf16.msra.mxu0 %v3728_v27 }
 0x5e7   :  { %1370 = vmatprep.subr.bf16.mxu0 %v3731_v24 }
 0x5ea   :  { %1371 = vmatpush1.bf16.msra.mxu0 %v3734_v33 }
 0x5eb   :  { %1372 = vmatprep.subr.bf16.mxu0 %v3737_v36 }
 0x5ee   :  { %1373 = vmatpush1.bf16.msra.mxu0 %v3740_v37 }
 0x5ef   :  { %1374 = vmatprep.subr.bf16.mxu0 %v3743_v38  ;;  %v4018_v38 = vld [vmem:[#allocation29_spill] sm:$0xff] }
 0x5f2   :  { %1375 = vmatpush1.bf16.msra.mxu0 %v3746_v40 }
 0x5f3   :  { %1376 = vmatprep.subr.bf16.mxu0 %v3749_v31 }
 0x5f6   :  { %1377 = vmatpush1.bf16.msra.mxu0 %v3752_v41 }
 0x5f7   :  { %2372 = vmatprep.subr.bf16.mxu0 %v3632_v0 }
 0x68c   :  { %v1271_v32 = vpop.f32.mrb[28].mxu1  ;;  %v2344_v23 = vpop.f32.mrb[36].mxu0 }
 0x68d   :  { %v1272_v35 = vadd.f32 %v1271_v32, %v4003_v53  ;;  %v1273_v63 = vpop.f32.mrb[29].mxu1  ;;  %v2345_v18 = vpop.f32.mrb[37].mxu0 }
 0x68e   :  { %v1274_v48 = vadd.f32 %v1273_v63, %v3355_v60  ;;  %v2346_v49 = vadd.f32 %v2345_v18, %v2344_v23  ;;  %v1275_v56 = vpop.f32.mrb[30].mxu1  ;;  %v2347_v57 = vpop.f32.mrb[38].mxu0  ;;  %v4019_v18 = vld [vmem:[#allocation40_spill] sm:$0xff] }
 0x68f   :  { %v1318_v59 = vadd.f32 %v1272_v35, %v4017_v58  ;;  %v1276_v31 = vpop.f32.mrb[31].mxu1  ;;  %v2348_v40 = vpop.f32.mrb[39].mxu0 }
 0x690   :  { %v1325_v37 = vadd.f32 %v1274_v48, %v4018_v38  ;;  %v1313_v60 = vadd.f32 %v2346_v49, %v3359_v14 }
 0x691   :  { %v2197_v41 = vmul.f32 -1.442695, %v1318_v59 }
 0x692   :  { %v2198_v0 = vmul.f32 -1.442695, %v1325_v37 }
 0x693   :  { %2884 = vpow2.f32 %v2197_v41 }
 0x694   :  { %2886 = vpow2.f32 %v2198_v0 }
 0x69d   :  { %v2885_v36 = vpop.eup %2884 }
 0x69e   :  { %v1322_v33 = vadd.f32 1.0, %v2885_v36  ;;  %v2887_v53 = vpop.eup %2886 }
 0x69f   :  { %v1329_v32 = vadd.f32 1.0, %v2887_v53 }
 0x6a0   :  { %2888 = vrcp.f32 %v1322_v33 }
 0x6a1   :  { %2890 = vrcp.f32 %v1329_v32 }
 0x6aa   :  { %v2889_v23 = vpop.eup %2888 }
 0x6ab   :  { %v1332_v63 = vmul.f32 %v2889_v23, %v1313_v60  ;;  %v2891_v40 = vpop.eup %2890  ;;  %v4030_v23 = vmov 0.0  }
 0x6ac   :  { %v1335_v31 = vsub.f32 1.0, %v2891_v40  ;;  %v1337_v37 = vmul.f32 %v2891_v40, %v3642_v50  ;;  %v1562_v40 = vld [vmem:[#allocation4] sm:$0xff] }
 0x6ad   :  { %v1333_v35 = vadd.f32 %v1332_v63, %v4019_v18  ;;  %v1563_v63 = vld [vmem:[#allocation4 + $0x8] sm:$0xff]  ;;  %v1566_v18 = vld [vmem:[#allocation4 + $0x20] sm:$0xff] }
 0x6af   :  { %2892 = vtanh.f32 %v1333_v35  ;;  %v2575_v35 = vpack.c.bf16 %v1566_v18, %v1563_v63  ;;  %v1598_v18 = vld [vmem:[#allocation4 + $0x120] sm:$0xff] }
 0x6b9   :  { %v2893_v38 = vpop.eup %2892 }
 0x6ba   :  { %v1336_v48 = vmul.f32 %v2893_v38, %v1335_v31  ;;  %v1565_v31 = vld [vmem:[#allocation4 + $0x18] sm:$0xff]  ;;  %v1564_v38 = vld [vmem:[#allocation4 + $0x10] sm:$0xff] }
 0x6bc   :  { %v3763_v41 = vadd.f32 %v1337_v37, %v1336_v48  ;;  %v1567_v48 = vld [vmem:[#allocation4 + $0x28] sm:$0xff] }
 0x6bd   :  { %v2608_v37 = vpack.c.bf16 %v1567_v48, %v1564_v38  ;;  %v1608_v38 = vld [vmem:[#allocation4 + $0x170] sm:$0xff] }
 0x6be   :  { %v3767_v33 = vmul.f32 %v3763_v41, %v3131_v47  ;;  %v1342_v14 = vmul.f32 %v3126_v44, %v3763_v41 }
 0x6c0   :  { %v1345_v36 = vpack.c.bf16 %v3767_v33, %v3767_v33  ;;  %v1344_v49 = vpack.c.bf16 %v1342_v14, %v1342_v14  ;;  %v1572_v14 = vld [vmem:[#allocation4 + $0x50] sm:$0xff] }
 0x6c2   :  { %1378 = vmatprep.mubr.bf16.mxu0 %v1345_v36  ;;  %1419 = vmatprep.mubr.bf16.mxu1 %v1345_v36 }
 0x6c3   :  { %1379 = vmatmul.mubr.bf16.vlgmr.msra.gmra.mrb[40].mxu0 %v1344_v49  ;;  %1420 = vmatmul.mubr.bf16.vlgmr.msra.gmra.mrb[32].mxu1 %v1344_v49  ;;  %v1568_v49 = vld [vmem:[#allocation4 + $0x30] sm:$0xff] }
 0x6c4   :  { %1458 = vmatpush1.bf16.msra.mxu1 %v3490_v42  ;;  %2373 = vmatpush3.bf16.msra.mxu0 %v3558_v52  ;;  %v4020_v42 = vld [vmem:[#allocation10_spill] sm:$0xff]  ;;  %v4022_v52 = vld [vmem:[#allocation20_spill] sm:$0xff] }
 0x6c5   :  { %1459 = vmatprep.subr.bf16.mxu1 %v3494_v46  ;;  %2374 = vmatprep.subr.bf16.mxu0 %v3562_v34  ;;  %v4021_v46 = vld [vmem:[#allocation11_spill] sm:$0xff]  ;;  %v4023_v34 = vld [vmem:[#allocation21_spill] sm:$0xff] }
 0x6c8   :  { %1460 = vmatpush1.bf16.msra.mxu1 %v3565_v54  ;;  %2375 = vmatpush3.bf16.msra.mxu0 %v3653_v30  ;;  %v4024_v54 = vld [vmem:[#allocation32_spill] sm:$0xff] }
 0x6c9   :  { %1461 = vmatprep.subr.bf16.mxu1 %v3569_v39  ;;  %2376 = vmatprep.subr.bf16.mxu0 %v3657_v20  ;;  %v4025_v39 = vld [vmem:[#allocation12_spill] sm:$0xff]  ;;  %v4027_v20 = vld [vmem:[#allocation33_spill] sm:$0xff] }
 0x6cc   :  { %1462 = vmatpush1.bf16.msra.mxu1 %v3573_v22  ;;  %2377 = vmatpush3.bf16.msra.mxu0 %v3661_v28  ;;  %v4026_v22 = vld [vmem:[#allocation13_spill] sm:$0xff] }
 0x6cd   :  { %1463 = vmatprep.subr.bf16.mxu1 %v3577_v51  ;;  %2378 = vmatprep.subr.bf16.mxu0 %v3665_v16 }
 0x6d0   :  { %1464 = vmatpush1.bf16.msra.mxu1 %v3581_v26  ;;  %2379 = vmatpush3.bf16.msra.mxu0 %v3669_v45 }
 0x6d1   :  { %1465 = vmatprep.subr.bf16.mxu1 %v3585_v61  ;;  %2380 = vmatprep.subr.bf16.mxu0 %v3673_v2  ;;  %v3819_v61 = vld [vmem:[#allocation4 + $0x498] sm:$0xff] }
 0x6d2   :  { %v4028_v2 = vld [vmem:[#allocation34_spill] sm:$0xff] }
 0x6d4   :  { %1466 = vmatpush1.bf16.msra.mxu1 %v3589_v62  ;;  %2381 = vmatpush3.bf16.msra.mxu0 %v3677_v4 }
 0x6d5   :  { %1467 = vmatprep.subr.bf16.mxu1 %v3593_v1  ;;  %2382 = vmatprep.subr.bf16.mxu0 %v3681_v6 }
 0x6d8   :  { %1468 = vmatpush1.bf16.msra.mxu1 %v3597_v3  ;;  %2383 = vmatpush3.bf16.msra.mxu0 %v3685_v8 }
 0x6d9   :  { %1469 = vmatprep.subr.bf16.mxu1 %v3601_v5  ;;  %2384 = vmatprep.subr.bf16.mxu0 %v3689_v10  ;;  %v3822_v5 = vld [vmem:[#allocation4 + $0x4a0] sm:$0xff] }
 0x6dc   :  { %1470 = vmatpush1.bf16.msra.mxu1 %v3605_v7  ;;  %2385 = vmatpush3.bf16.msra.mxu0 %v3693_v11 }
 0x6dd   :  { %1471 = vmatprep.subr.bf16.mxu1 %v3609_v9  ;;  %2386 = vmatprep.subr.bf16.mxu0 %v3697_v12 }
 0x6e0   :  { %1472 = vmatpush1.bf16.msra.mxu1 %v3700_v13  ;;  %2387 = vmatpush3.bf16.msra.mxu0 %v3703_v15  ;;  %v3827_v15 = vld [vmem:[#allocation4 + $0x4a8] sm:$0xff] }
 0x6e1   :  { %1473 = vmatprep.subr.bf16.mxu1 %v3706_v17  ;;  %2576 = vmatprep.subr.bf16.mxu0 %v2575_v35  ;;  %v1601_v35 = vld [vmem:[#allocation4 + $0x138] sm:$0xff] }
 0x6e2   :  { %v2601_v48 = vpack.c.bf16 %v1601_v35, %v1598_v18 }
 0x6e4   :  { %1474 = vmatpush1.bf16.msra.mxu1 %v3710_v19 }
 0x6e5   :  { %1475 = vmatprep.subr.bf16.mxu1 %v3713_v21 }
 0x6e8   :  { %1476 = vmatpush1.bf16.msra.mxu1 %v3716_v55  ;;  %v4029_v55 = vld [vmem:[#allocation37_spill] sm:$0xff] }
 0x6e9   :  { %1477 = vmatprep.subr.bf16.mxu1 %v3719_v43 }
 0x6ec   :  { %1478 = vmatpush1.bf16.msra.mxu1 %v3722_v25 }
 0x6ed   :  { %1479 = vmatprep.subr.bf16.mxu1 %v3725_v29 }
 0x6f0   :  { %1480 = vmatpush1.bf16.msra.mxu1 %v3728_v27 }
 0x6f1   :  { %1481 = vmatprep.subr.bf16.mxu1 %v3731_v24 }
 0x6f4   :  { %1482 = vmatpush1.bf16.msra.mxu1 %v4020_v42  ;;  %v1571_v42 = vld [vmem:[#allocation4 + $0x48] sm:$0xff] }
 0x6f5   :  { %1483 = vmatprep.subr.bf16.mxu1 %v4021_v46  ;;  %v2581_v46 = vpack.c.bf16 %v1571_v42, %v1568_v49  ;;  %v1606_v49 = vld [vmem:[#allocation4 + $0x160] sm:$0xff]  ;;  %v1609_v42 = vld [vmem:[#allocation4 + $0x178] sm:$0xff] }
 0x6f8   :  { %1484 = vmatpush1.bf16.msra.mxu1 %v4022_v52  ;;  %v1570_v52 = vld [vmem:[#allocation4 + $0x40] sm:$0xff] }
 0x6f9   :  { %1485 = vmatprep.subr.bf16.mxu1 %v4023_v34  ;;  %v1573_v34 = vld [vmem:[#allocation4 + $0x58] sm:$0xff] }
 0x6fc   :  { %1486 = vmatpush1.bf16.msra.mxu1 %v4024_v54  ;;  %v2611_v54 = vpack.c.bf16 %v1573_v34, %v1570_v52  ;;  %v1773_v52 = vld [vmem:[#allocation4 + $0x1a0] sm:$0xff] }
 0x6fd   :  { %1487 = vmatprep.subr.bf16.mxu1 %v4025_v39  ;;  %v1575_v39 = vld [vmem:[#allocation4 + $0x68] sm:$0xff] }
 0x700   :  { %1488 = vmatpush1.bf16.msra.mxu1 %v4026_v22  ;;  %v1578_v22 = vld [vmem:[#allocation4 + $0x80] sm:$0xff] }
 0x796   :  { %v1380_v51 = vpop.f32.mrb[40].mxu0  ;;  %v2366_v26 = vpop.f32.mrb[32].mxu1 }
 0x797   :  { %v1381_v62 = vadd.f32 %v3819_v61, %v1380_v51  ;;  %v1382_v1 = vpop.f32.mrb[41].mxu0  ;;  %v2367_v3 = vpop.f32.mrb[33].mxu1  ;;  %v2583_v51 = vpack.c.bf16 %v1578_v22, %v1575_v39 }
 0x798   :  { %v1383_v7 = vadd.f32 %v3822_v5, %v1382_v1  ;;  %v2368_v9 = vadd.f32 %v2367_v3, %v2366_v26  ;;  %v1384_v50 = vpop.f32.mrb[42].mxu0  ;;  %v2369_v30 = vpop.f32.mrb[34].mxu1  ;;  %v1574_v26 = vld [vmem:[#allocation4 + $0x60] sm:$0xff]  ;;  %v1576_v3 = vld [vmem:[#allocation4 + $0x70] sm:$0xff] }
 0x799   :  { %v1427_v28 = vadd.f32 %v1381_v62, %v4027_v20  ;;  %v1385_v16 = vpop.f32.mrb[43].mxu0  ;;  %v2370_v45 = vpop.f32.mrb[35].mxu1  ;;  %v1577_v62 = vld [vmem:[#allocation4 + $0x78] sm:$0xff]  ;;  %v1584_v30 = vld [vmem:[#allocation4 + $0xb0] sm:$0xff] }
 0x79a   :  { %v1434_v4 = vadd.f32 %v1383_v7, %v4028_v2  ;;  %v1422_v17 = vadd.f32 %v3827_v15, %v2368_v9  ;;  %v2585_v1 = vpack.c.bf16 %v1577_v62, %v1574_v26  ;;  %v1579_v7 = vld [vmem:[#allocation4 + $0x88] sm:$0xff]  ;;  %v1581_v50 = vld [vmem:[#allocation4 + $0x98] sm:$0xff]  ;;  %v1582_v2 = vld [vmem:[#allocation4 + $0xa0] sm:$0xff] }
 0x79b   :  { %v2199_v6 = vmul.f32 -1.442695, %v1427_v28  ;;  %v2614_v9 = vpack.c.bf16 %v1579_v7, %v1576_v3  ;;  %v2587_v20 = vpack.c.bf16 %v1584_v30, %v1581_v50  ;;  %v1580_v28 = vld [vmem:[#allocation4 + $0x90] sm:$0xff]  ;;  %v1583_v16 = vld [vmem:[#allocation4 + $0xa8] sm:$0xff]  ;;  %v4031_v30 = vld [vmem:[#allocation35_spill] sm:$0xff] }
 0x79c   :  { %v2200_v8 = vmul.f32 -1.442695, %v1434_v4  ;;  %v2589_v45 = vpack.c.bf16 %v1583_v16, %v1580_v28  ;;  %v1585_v4 = vld [vmem:[#allocation4 + $0xb8] sm:$0xff] }
 0x79d   :  { %2894 = vpow2.f32 %v2199_v6  ;;  %v2617_v6 = vpack.c.bf16 %v1585_v4, %v1582_v2 }
 0x79e   :  { %2896 = vpow2.f32 %v2200_v8  ;;  %v1587_v8 = vld [vmem:[#allocation4 + $0xc8] sm:$0xff] }
 0x7a7   :  { %v2895_v10 = vpop.eup %2894 }
 0x7a8   :  { %v1431_v11 = vadd.f32 1.0, %v2895_v10  ;;  %v2897_v12 = vpop.eup %2896  ;;  %v1590_v10 = vld [vmem:[#allocation4 + $0xe0] sm:$0xff] }
 0x7a9   :  { %v1438_v13 = vadd.f32 1.0, %v2897_v12  ;;  %v1586_v12 = vld [vmem:[#allocation4 + $0xc0] sm:$0xff] }
 0x7aa   :  { %2898 = vrcp.f32 %v1431_v11  ;;  %v2591_v11 = vpack.c.bf16 %v1590_v10, %v1587_v8 }
 0x7ab   :  { %2900 = vrcp.f32 %v1438_v13  ;;  %v1589_v13 = vld [vmem:[#allocation4 + $0xd8] sm:$0xff] }
 0x7b4   :  { %v2899_v19 = vpop.eup %2898 }
 0x7b5   :  { %v1441_v21 = vmul.f32 %v2899_v19, %v1422_v17  ;;  %v2901_v25 = vpop.eup %2900  ;;  %v1588_v17 = vld [vmem:[#allocation4 + $0xd0] sm:$0xff]  ;;  %v2593_v19 = vpack.c.bf16 %v1589_v13, %v1586_v12 }
 0x7b6   :  { %v1444_v29 = vsub.f32 1.0, %v2901_v25  ;;  %v1446_v56 = vmul.f32 %v2901_v25, %v3763_v41  ;;  %v3031_v41 = vmov 0.0|0.0  }
 0x7b7   :  { %v1442_v43 = vadd.f32 %v1441_v21, %v4029_v55  ;;  %2607 = vmatprep.subr.bf16.mxu1 %v3031_v41  ;;  %v1591_v21 = vld [vmem:[#allocation4 + $0xe8] sm:$0xff]  ;;  %v1593_v55 = vld [vmem:[#allocation4 + $0xf8] sm:$0xff] }
 0x7b8   :  { %v2620_v25 = vpack.c.bf16 %v1591_v21, %v1588_v17  ;;  %v4033_v17 = vld [vmem:[#allocation39_spill] sm:$0xff] }
 0x7b9   :  { %2902 = vtanh.f32 %v1442_v43  ;;  %v1596_v43 = vld [vmem:[#allocation4 + $0x110] sm:$0xff] }
 0x7c3   :  { %v2903_v27 = vpop.eup %2902 }
 0x7c4   :  { %v1445_v24 = vmul.f32 %v2903_v27, %v1444_v29  ;;  %v2595_v29 = vpack.c.bf16 %v1596_v43, %v1593_v55  ;;  %v1592_v27 = vld [vmem:[#allocation4 + $0xf0] sm:$0xff] }
 0x7c6   :  { %v1447_v57 = vadd.f32 %v1446_v56, %v1445_v24  ;;  %v1595_v24 = vld [vmem:[#allocation4 + $0x108] sm:$0xff]  ;;  %v1594_v56 = vld [vmem:[#allocation4 + $0x100] sm:$0xff] }
 0x7c8   :  { %v1448_v58 = vmul.f32 %v3126_v44, %v1447_v57  ;;  %v2597_v57 = vpack.c.bf16 %v1595_v24, %v1592_v27  ;;  %v1769_v27 = vld [vmem:[#allocation4 + $0x180] sm:$0xff] }
 0x7ca   :  { %v3834_v59 = vadd.f32 %v1448_v58, %v3767_v33  ;;  %v1569_v33 = vld [vmem:[#allocation4 + $0x38] sm:$0xff] }
 0x7cb   :  { %v2579_v36 = vpack.c.bf16 %v1572_v14, %v1569_v33  ;;  %v1597_v58 = vld [vmem:[#allocation4 + $0x118] sm:$0xff]  ;;  %v1604_v14 = vld [vmem:[#allocation4 + $0x150] sm:$0xff] }
 0x7cc   :  { %v3838_v0 = vmul.f32 %v3834_v59, %v3131_v47  ;;  %v1453_v53 = vmul.f32 %v3126_v44, %v3834_v59  ;;  %v2577_v47 = vpack.c.bf16 %v1565_v31, %v1562_v40  ;;  %v1600_v40 = vld [vmem:[#allocation4 + $0x130] sm:$0xff]  ;;  %v1603_v31 = vld [vmem:[#allocation4 + $0x148] sm:$0xff] }
 0x7ce   :  { %v1456_v32 = vpack.c.bf16 %v3838_v0, %v3838_v0  ;;  %v1455_v60 = vpack.c.bf16 %v1453_v53, %v1453_v53  ;;  %v1599_v53 = vld [vmem:[#allocation4 + $0x128] sm:$0xff] }
 0x7d0   :  { %1489 = vmatprep.mubr.bf16.mxu1 %v1456_v32  ;;  %1530 = vmatprep.mubr.bf16.mxu0 %v1456_v32  ;;  %v1602_v32 = vld [vmem:[#allocation4 + $0x140] sm:$0xff] }
 0x7d1   :  { %1490 = vmatmul.mubr.bf16.vlgmr.msra.gmra.mrb[36].mxu1 %v1455_v60  ;;  %1531 = vmatmul.mubr.bf16.vlgmr.msra.gmra.mrb[44].mxu0 %v1455_v60  ;;  %v2623_v60 = vpack.c.bf16 %v1597_v58, %v1594_v56  ;;  %v2599_v63 = vpack.c.bf16 %v1602_v32, %v1599_v53  ;;  %v1772_v56 = vld [vmem:[#allocation4 + $0x198] sm:$0xff]  ;;  %v1774_v58 = vld [vmem:[#allocation4 + $0x1a8] sm:$0xff]  ;;  %v1779_v32 = vld [vmem:[#allocation4 + $0x1d0] sm:$0xff] }
 0x7d2   :  { %1692 = vmatprep.mubr.f32.mxu0 %v4030_v23  ;;  %2578 = vmatpush1.bf16.msra.mxu0 %v2577_v47  ;;  %v1605_v47 = vld [vmem:[#allocation4 + $0x158] sm:$0xff] }
 0x7d3   :  { %2609 = vmatpush3.bf16.msra.mxu1 %v2608_v37  ;;  %2580 = vmatprep.subr.bf16.mxu0 %v2579_v36  ;;  %v2626_v37 = vpack.c.bf16 %v1603_v31, %v1600_v40  ;;  %v2603_v33 = vpack.c.bf16 %v1608_v38, %v1605_v47  ;;  %v1607_v36 = vld [vmem:[#allocation4 + $0x168] sm:$0xff]  ;;  %v1776_v53 = vld [vmem:[#allocation4 + $0x1b8] sm:$0xff]  ;;  %v1777_v47 = vld [vmem:[#allocation4 + $0x1c0] sm:$0xff] }
 0x7d4   :  { %2610 = vmatprep.subr.bf16.mxu1 %v3031_v41  ;;  %2502 = vmatprep.mubr.msk.f32.mxu1 %vm3032_vm1, %v4030_v23  ;;  %v2605_v34 = vpack.c.bf16 %v1607_v36, %v1604_v14  ;;  %v2635_v40 = vpack.c.bf16 %v1779_v32, %v1776_v53  ;;  %v1778_v31 = vld [vmem:[#allocation4 + $0x1c8] sm:$0xff]  ;;  %v1780_v38 = vld [vmem:[#allocation4 + $0x1d8] sm:$0xff]  ;;  %v1813_v53 = vld [vmem:[#allocation4 + $0x2e0] sm:$0xff] }
 0x7d5   :  { %v1784_v36 = vld [vmem:[#allocation4 + $0x1f8] sm:$0xff] }
 0x7d6   :  { %2582 = vmatpush1.bf16.msra.mxu0 %v2581_v46  ;;  %v1770_v46 = vld [vmem:[#allocation4 + $0x188] sm:$0xff]  ;;  %v1816_v32 = vld [vmem:[#allocation4 + $0x2f8] sm:$0xff] }
 0x7d7   :  { %2612 = vmatpush3.bf16.msra.mxu1 %v2611_v54  ;;  %2584 = vmatprep.subr.bf16.mxu0 %v2583_v51  ;;  %v2629_v54 = vpack.c.bf16 %v1609_v42, %v1606_v49  ;;  %v2631_v39 = vpack.c.bf16 %v1773_v52, %v1770_v46  ;;  %v1786_v49 = vld [vmem:[#allocation4 + $0x208] sm:$0xff]  ;;  %v1788_v42 = vld [vmem:[#allocation4 + $0x218] sm:$0xff]  ;;  %v1791_v46 = vld [vmem:[#allocation4 + $0x230] sm:$0xff] }
 0x7d8   :  { %2613 = vmatprep.subr.bf16.mxu1 %v3031_v41 }
 0x7da   :  { %2586 = vmatpush1.bf16.msra.mxu0 %v2585_v1 }
 0x7db   :  { %2615 = vmatpush3.bf16.msra.mxu1 %v2614_v9  ;;  %2588 = vmatprep.subr.bf16.mxu0 %v2587_v20 }
 0x7dc   :  { %2616 = vmatprep.subr.bf16.mxu1 %v3031_v41 }
 0x7de   :  { %2590 = vmatpush1.bf16.msra.mxu0 %v2589_v45  ;;  %v4032_v45 = vld [vmem:[#allocation36_spill] sm:$0xff] }
 0x7df   :  { %2618 = vmatpush3.bf16.msra.mxu1 %v2617_v6  ;;  %2592 = vmatprep.subr.bf16.mxu0 %v2591_v11 }
 0x7e0   :  { %2619 = vmatprep.subr.bf16.mxu1 %v3031_v41 }
 0x7e2   :  { %2594 = vmatpush1.bf16.msra.mxu0 %v2593_v19 }
 0x7e3   :  { %2621 = vmatpush3.bf16.msra.mxu1 %v2620_v25  ;;  %2596 = vmatprep.subr.bf16.mxu0 %v2595_v29 }
 0x7e4   :  { %2622 = vmatprep.subr.bf16.mxu1 %v3031_v41 }
 0x7e6   :  { %2598 = vmatpush1.bf16.msra.mxu0 %v2597_v57  ;;  %v1771_v57 = vld [vmem:[#allocation4 + $0x190] sm:$0xff] }
 0x7e7   :  { %2624 = vmatpush3.bf16.msra.mxu1 %v2623_v60  ;;  %2600 = vmatprep.subr.bf16.mxu0 %v2599_v63  ;;  %v2633_v60 = vpack.c.bf16 %v1772_v56, %v1769_v27  ;;  %v1775_v63 = vld [vmem:[#allocation4 + $0x1b0] sm:$0xff]  ;;  %v2664_v18 = vpack.c.bf16 %v1774_v58, %v1771_v57  ;;  %v1814_v58 = vld [vmem:[#allocation4 + $0x2e8] sm:$0xff] }
 0x7e8   :  { %2625 = vmatprep.subr.bf16.mxu1 %v3031_v41 }
 0x7ea   :  { %2602 = vmatpush1.bf16.msra.mxu0 %v2601_v48  ;;  %v1785_v48 = vld [vmem:[#allocation4 + $0x200] sm:$0xff] }
 0x7eb   :  { %2627 = vmatpush3.bf16.msra.mxu1 %v2626_v37  ;;  %2604 = vmatprep.subr.bf16.mxu0 %v2603_v33  ;;  %v2637_v37 = vpack.c.bf16 %v1778_v31, %v1775_v63  ;;  %v1781_v33 = vld [vmem:[#allocation4 + $0x1e0] sm:$0xff] }
 0x7ec   :  { %2628 = vmatprep.subr.bf16.mxu1 %v3031_v41  ;;  %v2641_v52 = vpack.c.bf16 %v1784_v36, %v1781_v33  ;;  %v3882_v63 = vld [vmem:[%s3897_s0 + $0x40] sm:$0x1]  ;;  %v2005_v33 = vld [vmem:[#allocation4 + $0x390] sm:$0xff]  ;;  %v2008_v36 = vld [vmem:[#allocation4 + $0x3d8] sm:$0xff]  ;;  %s3033_s0 = smov 127  }
 0x7ee   :  { %2606 = vmatpush1.bf16.msra.mxu0 %v2605_v34  ;;  %v1787_v34 = vld [vmem:[#allocation4 + $0x210] sm:$0xff] }
 0x7ef   :  { %2630 = vmatpush3.bf16.msra.mxu1 %v2629_v54  ;;  %2632 = vmatprep.subr.bf16.mxu0 %v2631_v39  ;;  %v2643_v39 = vpack.c.bf16 %v1791_v46, %v1788_v42  ;;  %v2010_v42 = vld [vmem:[#allocation4 + $0x408] sm:$0xff]  ;;  %v2011_v46 = vld [vmem:[#allocation4 + $0x420] sm:$0xff] }
 0x7f0   :  { %2663 = vmatprep.subr.bf16.mxu1 %v3031_v41 }
 0x8a4   :  { %v1491_v22 = vpop.f32.mrb[36].mxu1  ;;  %v2388_v51 = vpop.f32.mrb[44].mxu0 }
 0x8a5   :  { %v1492_v26 = vadd.f32 %v3819_v61, %v1491_v22  ;;  %v1493_v62 = vpop.f32.mrb[37].mxu1  ;;  %v2389_v1 = vpop.f32.mrb[45].mxu0  ;;  %v1790_v22 = vld [vmem:[#allocation4 + $0x228] sm:$0xff] }
 0x8a6   :  { %v1494_v3 = vadd.f32 %v3822_v5, %v1493_v62  ;;  %v2390_v7 = vadd.f32 %v2389_v1, %v2388_v51  ;;  %v1495_v9 = vpop.f32.mrb[38].mxu1  ;;  %v2391_v50 = vpop.f32.mrb[46].mxu0  ;;  %v1789_v51 = vld [vmem:[#allocation4 + $0x220] sm:$0xff]  ;;  %v1794_v62 = vld [vmem:[#allocation4 + $0x248] sm:$0xff] }
 0x8a7   :  { %v1538_v20 = vadd.f32 %v1492_v26, %v4031_v30  ;;  %v1496_v28 = vpop.f32.mrb[39].mxu1  ;;  %v2392_v16 = vpop.f32.mrb[47].mxu0  ;;  %v1792_v26 = vld [vmem:[#allocation4 + $0x238] sm:$0xff]  ;;  %v1797_v1 = vld [vmem:[#allocation4 + $0x260] sm:$0xff]  ;;  %v1795_v30 = vld [vmem:[#allocation4 + $0x250] sm:$0xff] }
 0x8a8   :  { %v1545_v2 = vadd.f32 %v1494_v3, %v4032_v45  ;;  %v1533_v5 = vadd.f32 %v3827_v15, %v2390_v7  ;;  %v2645_v3 = vpack.c.bf16 %v1790_v22, %v1787_v34  ;;  %v1793_v7 = vld [vmem:[#allocation4 + $0x240] sm:$0xff]  ;;  %v2673_v9 = vpack.c.bf16 %v1792_v26, %v1789_v51  ;;  %v1796_v50 = vld [vmem:[#allocation4 + $0x258] sm:$0xff]  ;;  %v1803_v16 = vld [vmem:[#allocation4 + $0x290] sm:$0xff] }
 0x8a9   :  { %v2201_v4 = vmul.f32 -1.442695, %v1538_v20  ;;  %v1798_v20 = vld [vmem:[#allocation4 + $0x268] sm:$0xff]  ;;  %v1800_v28 = vld [vmem:[#allocation4 + $0x278] sm:$0xff]  ;;  %v2649_v45 = vpack.c.bf16 %v1796_v50, %v1793_v7 }
 0x8aa   :  { %v2202_v6 = vmul.f32 -1.442695, %v1545_v2  ;;  %v1799_v2 = vld [vmem:[#allocation4 + $0x270] sm:$0xff]  ;;  %v2012_v34 = vld [vmem:[#allocation4 + $0x438] sm:$0xff]  ;;  %v2014_v22 = vld [vmem:[#allocation4 + $0x468] sm:$0xff] }
 0x8ab   :  { %2904 = vpow2.f32 %v2201_v4  ;;  %v2676_v4 = vpack.c.bf16 %v1798_v20, %v1795_v30  ;;  %v1818_v7 = vld [vmem:[#allocation4 + $0x4b1] ss:$8 sm:$0x7] }
 0x8ac   :  { %2906 = vpow2.f32 %v2202_v6  ;;  %v2651_v6 = vpack.c.bf16 %v1803_v16, %v1800_v28 }
 0x8b5   :  { %v2905_v8 = vpop.eup %2904 }
 0x8b6   :  { %v1542_v10 = vadd.f32 1.0, %v2905_v8  ;;  %v2907_v61 = vpop.eup %2906  ;;  %v1802_v8 = vld [vmem:[#allocation4 + $0x288] sm:$0xff] }
 0x8b7   :  { %v1549_v11 = vadd.f32 1.0, %v2907_v61  ;;  %v1804_v61 = vld [vmem:[#allocation4 + $0x298] sm:$0xff] }
 0x8b8   :  { %2908 = vrcp.f32 %v1542_v10  ;;  %v1801_v10 = vld [vmem:[#allocation4 + $0x280] sm:$0xff] }
 0x8b9   :  { %2910 = vrcp.f32 %v1549_v11  ;;  %v1806_v11 = vld [vmem:[#allocation4 + $0x2a8] sm:$0xff] }
 0x8c2   :  { %v2909_v12 = vpop.eup %2908 }
 0x8c3   :  { %v1552_v13 = vmul.f32 %v2909_v12, %v1533_v5  ;;  %v2911_v21 = vpop.eup %2910  ;;  %v1809_v5 = vld [vmem:[#allocation4 + $0x2c0] sm:$0xff]  ;;  %v2653_v12 = vpack.c.bf16 %v1802_v8, %v1799_v2 }
 0x8c4   :  { %v1555_v55 = vsub.f32 1.0, %v2911_v21  ;;  %v1557_v29 = vmul.f32 %v2911_v21, %v3834_v59  ;;  %v1782_v59 = vld [vmem:[#allocation4 + $0x1e8] sm:$0xff]  ;;  %v1808_v21 = vld [vmem:[#allocation4 + $0x2b8] sm:$0xff] }
 0x8c5   :  { %v1553_v19 = vadd.f32 %v1552_v13, %v4033_v17  ;;  %v2639_v14 = vpack.c.bf16 %v1785_v48, %v1782_v59  ;;  %v1805_v13 = vld [vmem:[#allocation4 + $0x2a0] sm:$0xff]  ;;  %v2679_v17 = vpack.c.bf16 %v1804_v61, %v1801_v10  ;;  %v2004_v48 = vld [vmem:[#allocation4 + $0x378] sm:$0xff] }
 0x8c6   :  { %v2657_v27 = vpack.c.bf16 %v1808_v21, %v1805_v13  ;;  %v2003_v59 = vld [vmem:[#allocation4 + $0x360] sm:$0xff] }
 0x8c7   :  { %2912 = vtanh.f32 %v1553_v19  ;;  %v2655_v19 = vpack.c.bf16 %v1809_v5, %v1806_v11 }
 0x8d1   :  { %v2913_v43 = vpop.eup %2912 }
 0x8d2   :  { %v1556_v25 = vmul.f32 %v2913_v43, %v1555_v55  ;;  %v1807_v55 = vld [vmem:[#allocation4 + $0x2b0] sm:$0xff]  ;;  %v1810_v43 = vld [vmem:[#allocation4 + $0x2c8] sm:$0xff] }
 0x8d3   :  { %v2682_v56 = vpack.c.bf16 %v1810_v43, %v1807_v55 }
 0x8d4   :  { %v1558_v24 = vadd.f32 %v1557_v29, %v1556_v25  ;;  %v1812_v25 = vld [vmem:[#allocation4 + $0x2d8] sm:$0xff]  ;;  %v1815_v29 = vld [vmem:[#allocation4 + $0x2f0] sm:$0xff] }
 0x8d5   :  { %v2659_v57 = vpack.c.bf16 %v1815_v29, %v1812_v25 }
 0x8d6   :  { %v1559_v15 = vmul.f32 %v3126_v44, %v1558_v24  ;;  %v2667_v44 = vpack.c.bf16 %v1780_v38, %v1777_v47  ;;  %v1811_v24 = vld [vmem:[#allocation4 + $0x2d0] sm:$0xff] }
 0x8d7   :  { %v2001_v47 = vld [vmem:[#allocation4 + $0x330] sm:$0xff] }
 0x8d8   :  { %v3865_v35 = vadd.f32 %v1559_v15, %v3838_v0  ;;  %v1783_v0 = vld [vmem:[#allocation4 + $0x1f0] sm:$0xff]  ;;  %v2661_v15 = vpack.c.bf16 %v1814_v58, %v1811_v24 }
 0x8d9   :  { %v2670_v54 = vpack.c.bf16 %v1786_v49, %v1783_v0  ;;  %v2009_v49 = vld [vmem:[#allocation4 + $0x3f0] sm:$0xff] }
 0x8da   :  { %1693 = vmatmul.mubr.f32.vlgmr.msra.gmra.mrb[48].mxu0 %v3865_v35  ;;  %2503 = vmatmul.mubr.f32.vlgmr.msra.gmra.mrb[40].mxu1 %v3865_v35 }
 0x8db   :  { %2634 = vmatpush1.bf16.msra.mxu0 %v2633_v60  ;;  %2665 = vmatpush3.bf16.msra.mxu1 %v2664_v18  ;;  %v2685_v60 = vpack.c.bf16 %v1816_v32, %v1813_v53  ;;  %v1999_v18 = vld [vmem:[#allocation4 + $0x300] sm:$0xff] }
 0x8dc   :  { %2636 = vmatprep.subr.bf16.mxu0 %v2635_v40  ;;  %2666 = vmatprep.subr.bf16.mxu1 %v3031_v41  ;;  %v2000_v40 = vld [vmem:[#allocation4 + $0x318] sm:$0xff] }
 0x8dd   :  { %1899 = vmatprep.mubr.f32.mxu0 %v4030_v23  ;;  %2537 = vmatprep.mubr.msk.f32.mxu1 %vm3032_vm1, %v4030_v23  ;;  %v2647_v23 = vpack.c.bf16 %v1797_v1, %v1794_v62  ;;  %v2687_v31 = vpack.c.bf16 %v2000_v40, %v1999_v18  ;;  %v4034_v1 = vld [vmem:[#allocation8_spill] sm:$0xff]  ;;  %v2090_v18 = vld [vmem:[#allocation4 + $0x4b2] ss:$0 sm:$0xff] }
 0x8df   :  { %2638 = vmatpush1.bf16.msra.mxu0 %v2637_v37  ;;  %2668 = vmatpush3.bf16.msra.mxu1 %v2667_v44  ;;  %v2695_v37 = vpack.c.bf16 %v2004_v48, %v2003_v59  ;;  %v2006_v44 = vld [vmem:[#allocation4 + $0x3a8] sm:$0xff] }
 0x8e0   :  { %2640 = vmatprep.subr.bf16.mxu0 %v2639_v14  ;;  %2669 = vmatprep.subr.bf16.mxu1 %v3031_v41  ;;  %v2699_v14 = vpack.c.bf16 %v2006_v44, %v2005_v33 }
 0x8e3   :  { %2642 = vmatpush1.bf16.msra.mxu0 %v2641_v52  ;;  %2671 = vmatpush3.bf16.msra.mxu1 %v2670_v54  ;;  %v2707_v52 = vpack.c.bf16 %v2010_v42, %v2009_v49  ;;  %v2711_v54 = vpack.c.bf16 %v2012_v34, %v2011_v46 }
 0x8e4   :  { %2644 = vmatprep.subr.bf16.mxu0 %v2643_v39  ;;  %2672 = vmatprep.subr.bf16.mxu1 %v3031_v41  ;;  %v2013_v39 = vld [vmem:[#allocation4 + $0x450] sm:$0xff] }
 0x8e5   :  { %v2715_v51 = vpack.c.bf16 %v2014_v22, %v2013_v39 }
 0x8e7   :  { %2646 = vmatpush1.bf16.msra.mxu0 %v2645_v3  ;;  %2674 = vmatpush3.bf16.msra.mxu1 %v2673_v9  ;;  %v1615_v3 = vsub.s32 0, %v4034_v1  ;;  %v1611_v9 = vld [vmem:[#allocation4 + $0x4b0] ss:$8 sm:$0x7] }
 0x8e8   :  { %2648 = vmatprep.subr.bf16.mxu0 %v2647_v23  ;;  %2675 = vmatprep.subr.bf16.mxu1 %v3031_v41  ;;  %v1619_v23 = vsub.s32 1, %v4034_v1 }
 0x8e9   :  { %v1616_v50 = vrot.slane %v1611_v9, %v1615_v3  ;;  %v1823_v30 = vrot.slane %v1818_v7, %v1615_v3 }
 0x8ea   :  { %v1620_v20 = vrot.slane %v1611_v9, %v1619_v23  ;;  %v1827_v28 = vrot.slane %v1818_v7, %v1619_v23 }
 0x8eb   :  { %2650 = vmatpush1.bf16.msra.mxu0 %v2649_v45  ;;  %2677 = vmatpush3.bf16.msra.mxu1 %v2676_v4  ;;  %v2719_v16 = vadd.f32 %v1823_v30, %v1616_v50 }
 0x8ec   :  { %2652 = vmatprep.subr.bf16.mxu0 %v2651_v6  ;;  %2678 = vmatprep.subr.bf16.mxu1 %v3031_v41  ;;  %v2721_v2 = vadd.f32 %v1827_v28, %v1620_v20 }
 0x8ef   :  { %2654 = vmatpush1.bf16.msra.mxu0 %v2653_v12  ;;  %2680 = vmatpush3.bf16.msra.mxu1 %v2679_v17  ;;  %v1623_v17 = vsub.s32 2, %v4034_v1 }
 0x8f0   :  { %2656 = vmatprep.subr.bf16.mxu0 %v2655_v19  ;;  %2681 = vmatprep.subr.bf16.mxu1 %v3031_v41 }
 0x8f1   :  { %v1831_v19 = vrot.slane %v1818_v7, %v1623_v17  ;;  %v1624_v55 = vrot.slane %v1611_v9, %v1623_v17 }
 0x8f3   :  { %2658 = vmatpush1.bf16.msra.mxu0 %v2657_v27  ;;  %2683 = vmatpush3.bf16.msra.mxu1 %v2682_v56 }
 0x8f4   :  { %2660 = vmatprep.subr.bf16.mxu0 %v2659_v57  ;;  %2684 = vmatprep.subr.bf16.mxu1 %v3031_v41  ;;  %v2002_v41 = vld [vmem:[#allocation4 + $0x348] sm:$0xff] }
 0x8f5   :  { %v2691_v38 = vpack.c.bf16 %v2002_v41, %v2001_v47 }
 0x8f7   :  { %2662 = vmatpush1.bf16.msra.mxu0 %v2661_v15  ;;  %2686 = vmatpush3.bf16.msra.mxu1 %v2685_v60 }
 0x8f8   :  { %2688 = vmatprep.subr.bf16.mxu0 %v2687_v31 }
 0x8fa   :  { %1900 = vmatmul.mubr.f32.vlgmr.msra.gmra.mrb[48].mxu0 %v3882_v63  ;;  %2538 = vmatmul.mubr.f32.vlgmr.msra.gmra.mrb[42].mxu1 %v3882_v63 }
 0x8fb   :  { %2572 = vmatprep.mubr.f32.mxu0 %v3865_v35  ;;  %2690 = vmatpush3.bf16.msra.mxu0 %v2687_v31  ;;  %v2007_v35 = vld [vmem:[#allocation4 + $0x3c0] sm:$0xff] }
 0x8fc   :  { %2692 = vmatprep.subr.bf16.mxu0 %v2691_v38  ;;  %v2703_v0 = vpack.c.bf16 %v2008_v36, %v2007_v35 }
 0x8ff   :  { %2694 = vmatpush3.bf16.msra.mxu0 %v2691_v38 }
 0x900   :  { %2696 = vmatprep.subr.bf16.mxu0 %v2695_v37 }
 0x903   :  { %2698 = vmatpush3.bf16.msra.mxu0 %v2695_v37 }
 0x904   :  { %2700 = vmatprep.subr.bf16.mxu0 %v2699_v14 }
 0x907   :  { %2702 = vmatpush3.bf16.msra.mxu0 %v2699_v14 }
 0x908   :  { %2704 = vmatprep.subr.bf16.mxu0 %v2703_v0 }
 0x90b   :  { %2706 = vmatpush3.bf16.msra.mxu0 %v2703_v0 }
 0x90c   :  { %2708 = vmatprep.subr.bf16.mxu0 %v2707_v52 }
 0x90f   :  { %2710 = vmatpush3.bf16.msra.mxu0 %v2707_v52 }
 0x910   :  { %2712 = vmatprep.subr.bf16.mxu0 %v2711_v54 }
 0x913   :  { %2714 = vmatpush3.bf16.msra.mxu0 %v2711_v54 }
 0x914   :  { %2716 = vmatprep.subr.bf16.mxu0 %v2715_v51 }
 0x917   :  { %2718 = vmatpush3.bf16.msra.mxu0 %v2715_v51 }
 0x9ad   :  { %v1765_v26 = vpop.f32.mrb[40].mxu1 }
 0x9ae   :  { %v2504_v62 = vpop.f32.mrb[41].mxu1  ;;  %v1766_v27 = vadd.f32 %v1765_v26, %v1624_v55 }
 0x9cd   :  { %v1901_v45 = vpop.f32.mrb[48].mxu0  ;;  %v1972_v4 = vpop.f32.mrb[42].mxu1 }
 0x9ce   :  { %v2720_v6 = vadd.f32 %v2719_v16, %v1901_v45  ;;  %v1903_v8 = vpop.f32.mrb[49].mxu0  ;;  %v2539_v10 = vpop.f32.mrb[43].mxu1  ;;  %v1973_v25 = vadd.f32 %v1972_v4, %v1831_v19 }
 0x9cf   :  { %v2722_v11 = vadd.f32 %v2721_v2, %v1903_v8 }
 0x9d0   :  { %v2203_v61 = vmul.f32 -1.442695, %v2720_v6 }
 0x9d1   :  { %v2204_v5 = vmul.f32 -1.442695, %v2722_v11 }
 0x9d2   :  { %2914 = vpow2.f32 %v2203_v61 }
 0x9d3   :  { %2916 = vpow2.f32 %v2204_v5 }
 0x9dc   :  { %v2915_v12 = vpop.eup %2914 }
 0x9dd   :  { %v1980_v13 = vadd.f32 1.0, %v2915_v12  ;;  %v2917_v21 = vpop.eup %2916 }
 0x9de   :  { %v1987_v43 = vadd.f32 1.0, %v2917_v21 }
 0x9df   :  { %2918 = vrcp.f32 %v1980_v13 }
 0x9e0   :  { %2920 = vrcp.f32 %v1987_v43 }
 0x9e9   :  { %v2919_v29 = vpop.eup %2918 }
 0x9ea   :  { %v1990_v24 = vmul.f32 %v2919_v29, %v1973_v25  ;;  %v2921_v57 = vpop.eup %2920 }
 0x9eb   :  { %v1993_v58 = vsub.f32 1.0, %v2921_v57  ;;  %v1995_v15 = vmul.f32 %v2921_v57, %v3882_v63 }
 0x9ec   :  { %v1991_v56 = vadd.f32 %v1990_v24, %v1766_v27 }
 0x9ee   :  { %2922 = vtanh.f32 %v1991_v56 }
 0x9f8   :  { %v2923_v53 = vpop.eup %2922 }
 0x9f9   :  { %v1994_v32 = vmul.f32 %v2923_v53, %v1993_v58 }
 0x9fb   :  { %v1996_v60 = vadd.f32 %v1995_v15, %v1994_v32 }
 0x9fd   :  { %2573 = vmatmul.mubr.msk.f32.vlgmr.msra.gmra.mrb[50].mxu0 %vm1997_vm2, %v1996_v60  ;;  %v2101_v47 = vrot.slane %v1996_v60, 7 }
 0xad0   :  { %v2574_v40 = vpop.f32.mrb[50].mxu0 }
 0xad1   :  { %v2091_v31 = vadd.f32 %v2574_v40, %v2090_v18  ;;  %v2081_v41 = vpop.f32.mrb[51].mxu0 }
 0xad3   :  { %v2103_v38 = vsel %vm1997_vm2, %v2091_v31, %v2101_v47  ;;  %2093 = vrot.lane.b32.xlu0 %v2091_v31, %s3033_s0 }
 0xad4   :  { %v2105_v59 = vsel %vm2104_vm3, %v2103_v38, 0.0 }
 0xad5   :  { %2107 = vst [vmem:[%s3900_s3 + $0x8] sm:$0xff] %v2105_v59 }
 0xb45   :  { %v2094_v48 = vpop.permute.xlu0 %2093 }
 0xb46   :  { %2725 = vpush %v2094_v48 }
 0xb77   :  { %s2726_s4 = spop %2725 }
 0xb78   :  { %v2096_v63 = vstv %s2726_s4 }
 0xb79   :  { %v2098_v37 = vadd.f32 %v2096_v63, %v2081_v41 }
 0xb7b   :  { %v2099_v33 = vmax.f32 %v2098_v37, 0.0 }
 0xb7d   :  { %2106 = vst [vmem:[%s3900_s3] sm:$0xff] %v2099_v33 }
 0xb7e   :  { %2112 = vsyncpa [#allocation3], 1 }
 0xb7f   :  { %2113 = vsyncpa [#allocation5], 1 }

</bundles_post_ra>
